<compile_context>
chip_gen: v7x
topology: tpu7x:2x2x1
jax: 0.10.0
libtpu: 0.0.40
codegen_flags: <defaults>
</compile_context>

<pallas_src>
import functools

import numpy as np

import jax
import jax.numpy as jnp
from jax.experimental import pallas as pl
from jax.experimental.pallas import tpu as pltpu


# ----------------------------------------------------------------------------
# Network architecture (matches PyTorch Net.__init__ exactly)
#   (name, cin, cout, kernel, stride, padding)
# ----------------------------------------------------------------------------
_CONV_LAYERS = [
    ("a1",   5,  16, 3, 1, 1),
    ("a2",  16,  16, 3, 1, 1),
    ("a3",  16,  32, 3, 2, 0),
    ("b1",  32,  32, 3, 1, 1),
    ("b2",  32,  32, 3, 1, 1),
    ("b3",  32,  64, 3, 2, 0),
    ("c1",  64,  64, 2, 1, 1),
    ("c2",  64,  64, 2, 1, 1),
    ("c3",  64, 128, 2, 2, 0),
    ("d1", 128, 128, 1, 1, 0),
    ("d2", 128, 128, 1, 1, 0),
    ("d3", 128, 128, 1, 1, 0),
]

_ROW_ALIGN = 16          # activation row-count padding


def _rpad(v):
    return max(_ROW_ALIGN, ((v + _ROW_ALIGN - 1) // _ROW_ALIGN) * _ROW_ALIGN)


def _cpad(c):
    return max(8, ((c + 7) // 8) * 8)


# ----------------------------------------------------------------------------
# Pallas kernel: the ENTIRE network in one body (no grid, everything in VMEM)
# ----------------------------------------------------------------------------
def _net_kernel(*refs, meta):
    """refs = [x] + packed params (per `meta`) + [out, xbuf, icol].

    Activation layout: (rows, channels), row = b*H*W + y*W + x, channels on
    lanes.  Each conv layer = optional embed gather, im2col assembly via
    sublane-offset copies + one mask multiply, ONE weight dot, bias+ReLU,
    optional compaction gather.
    """
    *ins, out_ref, xbuf, icol = refs
    it = iter(ins)
    x = next(it)[...]                                    # f32 (rows, cin_pad)

    for kind, shifts in meta:
        if kind == "pw":                                 # 1x1 conv: plain matmul
            w_ref, b_ref = next(it), next(it)
            acc = jnp.dot(x.astype(jnp.bfloat16), w_ref[...],
                          preferred_element_type=jnp.float32)
            x = jnp.maximum(acc + b_ref[...], 0.0)
            continue
        if kind == "last":                               # Linear(128,1) + tanh
            w_ref, b_ref = next(it), next(it)
            # VPU broadcast-multiply + lane reduction instead of an N=1 MXU dot.
            y = jnp.sum(x * w_ref[...], axis=1, keepdims=True) + b_ref[...]
            out_ref[...] = jnp.tanh(y).astype(out_ref.dtype)
            continue
        if kind == "embed":                              # c1/c2: input -> canvas
            e_ref = next(it)
            x = jnp.dot(e_ref[...], x.astype(jnp.bfloat16),
                        preferred_element_type=jnp.float32)

        m_ref, w_ref, b_ref = next(it), next(it), next(it)
        rows, cp = x.shape
        kk = len(shifts)
        # Row-doubled activation buffer: every tap is then a plain offset read
        # (wrapped reads are zeroed by the mask, so circular semantics are fine).
        xbuf[0:rows, 0:cp] = x
        xbuf[rows:2 * rows, 0:cp] = x
        # Assemble im2col with sublane-offset load/store copies (no MXU work).
        for t, s in enumerate(shifts):
            icol[0:rows, t * cp:(t + 1) * cp] = (
                xbuf[s:s + rows, 0:cp].astype(jnp.bfloat16))
        im2col = icol[0:rows, 0:kk * cp] * m_ref[...]    # 0/1 boundary mask (VPU)
        acc = jnp.dot(im2col, w_ref[...],                # single dot per layer
                      preferred_element_type=jnp.float32)
        act = jnp.maximum(acc + b_ref[...], 0.0)
        if kind == "compact":                            # a3/b3/c3: strided pick
            c_ref = next(it)
            x = jnp.dot(c_ref[...], act.astype(jnp.bfloat16),
                        preferred_element_type=jnp.float32)
        else:
            x = act


# ----------------------------------------------------------------------------
# One-time parameter packing (host side, outside the hot path)
# ----------------------------------------------------------------------------
def _pack_conv(n, Hc, Wc, cin, cout, k, wt, d0):
    """Row-shift offsets, boundary-mask slab and (k*k*cin_pad, cout) weight
    slab for a conv evaluated on the (Hc, Wc) working grid with tap offsets
    (kh + d0, kw + d0)."""
    rows = n * Hc * Wc
    rp, cp = _rpad(rows), _cpad(cin)
    shifts = []
    mask = np.zeros((rp, k * k * cp), np.float32)
    wslab = np.zeros((k * k * cp, cout), np.float32)
    wt = np.asarray(wt)                                  # (cout, cin, k, k)
    for kh in range(k):
        for kw in range(k):
            t = kh * k + kw
            dy, dx = kh + d0, kw + d0
            shifts.append((dy * Wc + dx) % rp)
            wslab[t * cp:t * cp + cin, :] = wt[:, :, kh, kw].T
            for y in range(Hc):
                if not (0 <= y + dy < Hc):
                    continue
                for xx in range(Wc):
                    if not (0 <= xx + dx < Wc):
                        continue
                    for b in range(n):
                        mask[b * Hc * Wc + y * Wc + xx,
                             t * cp:(t + 1) * cp] = 1.0
    return tuple(shifts), mask, wslab


def _embed_matrix(n, Hi, Wi, Ho, Wo, pad):
    """0/1 matrix scattering input rows into the output-resolution canvas."""
    E = np.zeros((_rpad(n * Ho * Wo), _rpad(n * Hi * Wi)), np.float32)
    for b in range(n):
        for y in range(Hi):
            for x in range(Wi):
                E[b * Ho * Wo + (y + pad) * Wo + (x + pad),
                  b * Hi * Wi + y * Wi + x] = 1.0
    return E


def _compact_matrix(n, Hi, Wi, Ho, Wo, stride):
    """0/1 matrix picking the strided anchor rows of a full-resolution conv."""
    C = np.zeros((_rpad(n * Ho * Wo), _rpad(n * Hi * Wi)), np.float32)
    for b in range(n):
        for oy in range(Ho):
            for ox in range(Wo):
                C[b * Ho * Wo + oy * Wo + ox,
                  b * Hi * Wi + stride * oy * Wi + stride * ox] = 1.0
    return C


def pack_params(params, n, h, w):
    """Repack PyTorch-layout params into lane-dense kernel operands."""
    flat, meta = [], []
    H, W = h, w
    buf_rows = buf_ch = buf_cols = 1
    for name, cin, cout, k, stride, pad in _CONV_LAYERS:
        wt, bias = params[name]                          # (cout,cin,k,k), (cout,)
        b2 = jnp.asarray(np.asarray(bias).reshape(1, cout), jnp.float32)
        Ho = (H + 2 * pad - k) // stride + 1
        Wo = (W + 2 * pad - k) // stride + 1
        if k == 1:                                       # d1..d3 pointwise
            flat += [jnp.asarray(np.asarray(wt)[:, :, 0, 0].T, jnp.bfloat16), b2]
            meta.append(("pw", ()))
        elif stride > 1:                                 # a3, b3, c3
            shifts, mask, wslab = _pack_conv(n, H, W, cin, cout, k, wt, 0)
            comp = _compact_matrix(n, H, W, Ho, Wo, stride)
            flat += [jnp.asarray(mask, jnp.bfloat16),
                     jnp.asarray(wslab, jnp.bfloat16), b2,
                     jnp.asarray(comp, jnp.bfloat16)]
            meta.append(("compact", shifts))
            rp, cp = _rpad(n * H * W), _cpad(cin)
        elif Ho == H and Wo == W:                        # a1, a2, b1, b2
            shifts, mask, wslab = _pack_conv(n, H, W, cin, cout, k, wt, -pad)
            flat += [jnp.asarray(mask, jnp.bfloat16),
                     jnp.asarray(wslab, jnp.bfloat16), b2]
            meta.append(("same", shifts))
            rp, cp = _rpad(n * H * W), _cpad(cin)
        else:                                            # c1, c2 (pad grows size)
            emb = _embed_matrix(n, H, W, Ho, Wo, pad)
            shifts, mask, wslab = _pack_conv(n, Ho, Wo, cin, cout, k, wt, 0)
            flat += [jnp.asarray(emb, jnp.bfloat16),
                     jnp.asarray(mask, jnp.bfloat16),
                     jnp.asarray(wslab, jnp.bfloat16), b2]
            meta.append(("embed", shifts))
            rp, cp = _rpad(n * Ho * Wo), _cpad(cin)
        if k > 1:
            buf_rows = max(buf_rows, rp)
            buf_ch = max(buf_ch, cp)
            buf_cols = max(buf_cols, k * k * cp)
        H, W = Ho, Wo

    wl, bl = params["last"]                              # (1,128), (1,)
    flat += [jnp.asarray(np.asarray(wl).reshape(1, 128), jnp.float32),
             jnp.asarray(np.asarray(bl).reshape(1, 1), jnp.float32)]
    meta.append(("last", ()))
    static = (tuple(meta), _cpad(_CONV_LAYERS[0][1]), _rpad(n * h * w),
              _rpad(n * H * W), buf_rows, buf_ch, buf_cols)
    return flat, static


# ----------------------------------------------------------------------------
# Forward pass: one transpose/pad of the tiny input, then ONE pallas_call
# ----------------------------------------------------------------------------
def net_forward(flat, static, x_nchw):
    (meta, cin0_pad, in_rows_pad, out_rows_pad,
     buf_rows, buf_ch, buf_cols) = static
    n, c, h, w = x_nchw.shape
    rows = n * h * w
    # NCHW -> (rows, channels) with channels on the lane axis.
    x = jnp.transpose(x_nchw, (0, 2, 3, 1)).reshape(rows, c).astype(jnp.float32)
    x = jnp.pad(x, ((0, in_rows_pad - rows), (0, cin0_pad - c)))

    args = [x] + list(flat)
    vmem = pl.BlockSpec(memory_space=pltpu.MemorySpace.VMEM)
    # TODO(synk): if batch grows, add a leading "parallel" grid axis over boards
    # so both v7x TensorCores are used; pointless at batch=2.
    out = pl.pallas_call(
        functools.partial(_net_kernel, meta=meta),
        out_shape=jax.ShapeDtypeStruct((out_rows_pad, 1), jnp.float32),
        in_specs=[vmem] * len(args),
        out_specs=vmem,
        scratch_shapes=[pltpu.VMEM((2 * buf_rows, buf_ch), jnp.float32),
                        pltpu.VMEM((buf_rows, buf_cols), jnp.bfloat16)],
    )(*args)
    # Final spatial size is 1x1, so rows 0..n-1 match PyTorch's view(-1, 128).
    return out[:n]


# ----------------------------------------------------------------------------
# Parameter init (PyTorch default uniform init) and a pure-JAX f32 reference
# ----------------------------------------------------------------------------
def _conv_init(key, cout, cin, k):
    wkey, bkey = jax.random.split(key)
    bound = 1.0 / float(cin * k * k) ** 0.5
    w = jax.random.uniform(wkey, (cout, cin, k, k), jnp.float32, -bound, bound)
    b = jax.random.uniform(bkey, (cout,), jnp.float32, -bound, bound)
    return w, b


def init_params(key):
    params = {}
    keys = jax.random.split(key, len(_CONV_LAYERS) + 1)
    for lkey, (name, cin, cout, k, _, _) in zip(keys[:-1], _CONV_LAYERS):
        params[name] = _conv_init(lkey, cout, cin, k)
    wkey, bkey = jax.random.split(keys[-1])
    bound = 1.0 / float(128) ** 0.5
    wl = jax.random.uniform(wkey, (1, 128), jnp.float32, -bound, bound)
    bl = jax.random.uniform(bkey, (1,), jnp.float32, -bound, bound)
    params["last"] = (wl, bl)
    return params


def reference_forward(params, x_nchw):
    x = x_nchw.astype(jnp.float32)
    for name, _, cout, _, stride, pad in _CONV_LAYERS:
        wt, b = params[name]
        x = jax.lax.conv_general_dilated(
            x, wt, window_strides=(stride, stride),
            padding=[(pad, pad), (pad, pad)],
            dimension_numbers=("NCHW", "OIHW", "NCHW"),
            precision=jax.lax.Precision.HIGHEST)
        x = jnp.maximum(x + b.reshape(1, cout, 1, 1), 0.0)
    feats = x.reshape(-1, 128)
    wl, bl = params["last"]
    y = jnp.dot(feats, wl.T, precision=jax.lax.Precision.HIGHEST) + bl
    return jnp.tanh(y)


if __name__ == "__main__":
    key = jax.random.PRNGKey(0)
    pkey, xkey = jax.random.split(key)
    params = init_params(pkey)

    # 5-plane 8x8 board input (chess eval net), batch of 2, PyTorch NCHW order.
    batch, h, w = 2, 8, 8
    x = jax.random.normal(xkey, (batch, 5, h, w), jnp.float32)

    flat, static = pack_params(params, batch, h, w)
    fwd = jax.jit(net_forward, static_argnums=(1,))
    out = jax.block_until_ready(fwd(flat, static, x))

    assert out.shape == (batch, 1)
    assert bool(jnp.all(jnp.isfinite(out)))
    assert bool(jnp.all(jnp.abs(out) <= 1.0))            # tanh output range

    # Sanity check vs. a pure-JAX f32 reference (kernel uses bf16 MXU operands
    # with f32 accumulation -> loose tolerance).
    ref = jax.block_until_ready(jax.jit(reference_forward)(params, x))
    if not np.allclose(np.asarray(out), np.asarray(ref), atol=3e-2):
        raise AssertionError(f"kernel/reference mismatch:\n{out}\n{ref}")

    print("KERNEL_OK")
</pallas_src>

<mosaic_0001>
module attributes {stable_mosaic.version = 11 : i64} {
  func.func @_net_kernel(%arg0: memref<128x8xf32, #tpu.memory_space<vmem>>, %arg1: memref<128x72xbf16, #tpu.memory_space<vmem>>, %arg2: memref<72x16xbf16, #tpu.memory_space<vmem>>, %arg3: memref<1x16xf32, #tpu.memory_space<vmem>>, %arg4: memref<128x144xbf16, #tpu.memory_space<vmem>>, %arg5: memref<144x16xbf16, #tpu.memory_space<vmem>>, %arg6: memref<1x16xf32, #tpu.memory_space<vmem>>, %arg7: memref<128x144xbf16, #tpu.memory_space<vmem>>, %arg8: memref<144x32xbf16, #tpu.memory_space<vmem>>, %arg9: memref<1x32xf32, #tpu.memory_space<vmem>>, %arg10: memref<32x128xbf16, #tpu.memory_space<vmem>>, %arg11: memref<32x288xbf16, #tpu.memory_space<vmem>>, %arg12: memref<288x32xbf16, #tpu.memory_space<vmem>>, %arg13: memref<1x32xf32, #tpu.memory_space<vmem>>, %arg14: memref<32x288xbf16, #tpu.memory_space<vmem>>, %arg15: memref<288x32xbf16, #tpu.memory_space<vmem>>, %arg16: memref<1x32xf32, #tpu.memory_space<vmem>>, %arg17: memref<32x288xbf16, #tpu.memory_space<vmem>>, %arg18: memref<288x64xbf16, #tpu.memory_space<vmem>>, %arg19: memref<1x64xf32, #tpu.memory_space<vmem>>, %arg20: memref<16x32xbf16, #tpu.memory_space<vmem>>, %arg21: memref<16x16xbf16, #tpu.memory_space<vmem>>, %arg22: memref<16x256xbf16, #tpu.memory_space<vmem>>, %arg23: memref<256x64xbf16, #tpu.memory_space<vmem>>, %arg24: memref<1x64xf32, #tpu.memory_space<vmem>>, %arg25: memref<32x16xbf16, #tpu.memory_space<vmem>>, %arg26: memref<32x256xbf16, #tpu.memory_space<vmem>>, %arg27: memref<256x64xbf16, #tpu.memory_space<vmem>>, %arg28: memref<1x64xf32, #tpu.memory_space<vmem>>, %arg29: memref<32x256xbf16, #tpu.memory_space<vmem>>, %arg30: memref<256x128xbf16, #tpu.memory_space<vmem>>, %arg31: memref<1x128xf32, #tpu.memory_space<vmem>>, %arg32: memref<16x32xbf16, #tpu.memory_space<vmem>>, %arg33: memref<128x128xbf16, #tpu.memory_space<vmem>>, %arg34: memref<1x128xf32, #tpu.memory_space<vmem>>, %arg35: memref<128x128xbf16, #tpu.memory_space<vmem>>, %arg36: memref<1x128xf32, #tpu.memory_space<vmem>>, %arg37: memref<128x128xbf16, #tpu.memory_space<vmem>>, %arg38: memref<1x128xf32, #tpu.memory_space<vmem>>, %arg39: memref<1x128xf32, #tpu.memory_space<vmem>>, %arg40: memref<1x1xf32, #tpu.memory_space<vmem>>, %arg41: memref<16x1xf32, #tpu.memory_space<vmem>>, %arg42: memref<256x64xf32, #tpu.memory_space<vmem>>, %arg43: memref<128x288xbf16, #tpu.memory_space<vmem>>) attributes {dimension_semantics = [], scalar_prefetch = 0 : i64, scratch_operands = 2 : i64, tpu.core_type = #tpu.core_type<tc>} {
    %c0 = arith.constant 0 : index
    %c0_0 = arith.constant 0 : index
    %0 = vector.load %arg0[%c0, %c0_0] : memref<128x8xf32, #tpu.memory_space<vmem>>, vector<128x8xf32>
    %c0_1 = arith.constant 0 : index
    %c0_2 = arith.constant 0 : index
    %1 = vector.load %arg42[%c0_1, %c0_2] : memref<256x64xf32, #tpu.memory_space<vmem>>, vector<128x8xf32>
    tpu.vector_store %arg42[%c0_1, %c0_2], %0 {strides = array<i32>} : memref<256x64xf32, #tpu.memory_space<vmem>>, vector<128x8xf32>,
    %c128 = arith.constant 128 : index
    %c0_3 = arith.constant 0 : index
    %2 = vector.load %arg42[%c128, %c0_3] : memref<256x64xf32, #tpu.memory_space<vmem>>, vector<128x8xf32>
    tpu.vector_store %arg42[%c128, %c0_3], %0 {strides = array<i32>} : memref<256x64xf32, #tpu.memory_space<vmem>>, vector<128x8xf32>,
    %c119 = arith.constant 119 : index
    %c0_4 = arith.constant 0 : index
    %3 = vector.load %arg42[%c119, %c0_4] : memref<256x64xf32, #tpu.memory_space<vmem>>, vector<128x8xf32>
    %4 = arith.truncf %3 : vector<128x8xf32> to vector<128x8xbf16>
    %c0_5 = arith.constant 0 : index
    %c0_6 = arith.constant 0 : index
    %5 = vector.load %arg43[%c0_5, %c0_6] : memref<128x288xbf16, #tpu.memory_space<vmem>>, vector<128x8xbf16>
    tpu.vector_store %arg43[%c0_5, %c0_6], %4 {strides = array<i32>} : memref<128x288xbf16, #tpu.memory_space<vmem>>, vector<128x8xbf16>,
    %c120 = arith.constant 120 : index
    %c0_7 = arith.constant 0 : index
    %6 = vector.load %arg42[%c120, %c0_7] : memref<256x64xf32, #tpu.memory_space<vmem>>, vector<128x8xf32>
    %7 = arith.truncf %6 : vector<128x8xf32> to vector<128x8xbf16>
    %c0_8 = arith.constant 0 : index
    %c8 = arith.constant 8 : index
    %8 = vector.load %arg43[%c0_8, %c8] : memref<128x288xbf16, #tpu.memory_space<vmem>>, vector<128x8xbf16>
    tpu.vector_store %arg43[%c0_8, %c8], %7 {strides = array<i32>} : memref<128x288xbf16, #tpu.memory_space<vmem>>, vector<128x8xbf16>,
    %c121 = arith.constant 121 : index
    %c0_9 = arith.constant 0 : index
    %9 = vector.load %arg42[%c121, %c0_9] : memref<256x64xf32, #tpu.memory_space<vmem>>, vector<128x8xf32>
    %10 = arith.truncf %9 : vector<128x8xf32> to vector<128x8xbf16>
    %c0_10 = arith.constant 0 : index
    %c16 = arith.constant 16 : index
    %11 = vector.load %arg43[%c0_10, %c16] : memref<128x288xbf16, #tpu.memory_space<vmem>>, vector<128x8xbf16>
    tpu.vector_store %arg43[%c0_10, %c16], %10 {strides = array<i32>} : memref<128x288xbf16, #tpu.memory_space<vmem>>, vector<128x8xbf16>,
    %c127 = arith.constant 127 : index
    %c0_11 = arith.constant 0 : index
    %12 = vector.load %arg42[%c127, %c0_11] : memref<256x64xf32, #tpu.memory_space<vmem>>, vector<128x8xf32>
    %13 = arith.truncf %12 : vector<128x8xf32> to vector<128x8xbf16>
    %c0_12 = arith.constant 0 : index
    %c24 = arith.constant 24 : index
    %14 = vector.load %arg43[%c0_12, %c24] : memref<128x288xbf16, #tpu.memory_space<vmem>>, vector<128x8xbf16>
    tpu.vector_store %arg43[%c0_12, %c24], %13 {strides = array<i32>} : memref<128x288xbf16, #tpu.memory_space<vmem>>, vector<128x8xbf16>,
    %c0_13 = arith.constant 0 : index
    %c0_14 = arith.constant 0 : index
    %15 = vector.load %arg42[%c0_13, %c0_14] : memref<256x64xf32, #tpu.memory_space<vmem>>, vector<128x8xf32>
    %16 = arith.truncf %15 : vector<128x8xf32> to vector<128x8xbf16>
    %c0_15 = arith.constant 0 : index
    %c32 = arith.constant 32 : index
    %17 = vector.load %arg43[%c0_15, %c32] : memref<128x288xbf16, #tpu.memory_space<vmem>>, vector<128x8xbf16>
    tpu.vector_store %arg43[%c0_15, %c32], %16 {strides = array<i32>} : memref<128x288xbf16, #tpu.memory_space<vmem>>, vector<128x8xbf16>,
    %c1 = arith.constant 1 : index
    %c0_16 = arith.constant 0 : index
    %18 = vector.load %arg42[%c1, %c0_16] : memref<256x64xf32, #tpu.memory_space<vmem>>, vector<128x8xf32>
    %19 = arith.truncf %18 : vector<128x8xf32> to vector<128x8xbf16>
    %c0_17 = arith.constant 0 : index
    %c40 = arith.constant 40 : index
    %20 = vector.load %arg43[%c0_17, %c40] : memref<128x288xbf16, #tpu.memory_space<vmem>>, vector<128x8xbf16>
    tpu.vector_store %arg43[%c0_17, %c40], %19 {strides = array<i32>} : memref<128x288xbf16, #tpu.memory_space<vmem>>, vector<128x8xbf16>,
    %c7 = arith.constant 7 : index
    %c0_18 = arith.constant 0 : index
    %21 = vector.load %arg42[%c7, %c0_18] : memref<256x64xf32, #tpu.memory_space<vmem>>, vector<128x8xf32>
    %22 = arith.truncf %21 : vector<128x8xf32> to vector<128x8xbf16>
    %c0_19 = arith.constant 0 : index
    %c48 = arith.constant 48 : index
    %23 = vector.load %arg43[%c0_19, %c48] : memref<128x288xbf16, #tpu.memory_space<vmem>>, vector<128x8xbf16>
    tpu.vector_store %arg43[%c0_19, %c48], %22 {strides = array<i32>} : memref<128x288xbf16, #tpu.memory_space<vmem>>, vector<128x8xbf16>,
    %c8_20 = arith.constant 8 : index
    %c0_21 = arith.constant 0 : index
    %24 = vector.load %arg42[%c8_20, %c0_21] : memref<256x64xf32, #tpu.memory_space<vmem>>, vector<128x8xf32>
    %25 = arith.truncf %24 : vector<128x8xf32> to vector<128x8xbf16>
    %c0_22 = arith.constant 0 : index
    %c56 = arith.constant 56 : index
    %26 = vector.load %arg43[%c0_22, %c56] : memref<128x288xbf16, #tpu.memory_space<vmem>>, vector<128x8xbf16>
    tpu.vector_store %arg43[%c0_22, %c56], %25 {strides = array<i32>} : memref<128x288xbf16, #tpu.memory_space<vmem>>, vector<128x8xbf16>,
    %c9 = arith.constant 9 : index
    %c0_23 = arith.constant 0 : index
    %27 = vector.load %arg42[%c9, %c0_23] : memref<256x64xf32, #tpu.memory_space<vmem>>, vector<128x8xf32>
    %28 = arith.truncf %27 : vector<128x8xf32> to vector<128x8xbf16>
    %c0_24 = arith.constant 0 : index
    %c64 = arith.constant 64 : index
    %29 = vector.load %arg43[%c0_24, %c64] : memref<128x288xbf16, #tpu.memory_space<vmem>>, vector<128x8xbf16>
    tpu.vector_store %arg43[%c0_24, %c64], %28 {strides = array<i32>} : memref<128x288xbf16, #tpu.memory_space<vmem>>, vector<128x8xbf16>,
    %c0_25 = arith.constant 0 : index
    %c0_26 = arith.constant 0 : index
    %30 = vector.load %arg43[%c0_25, %c0_26] : memref<128x288xbf16, #tpu.memory_space<vmem>>, vector<128x72xbf16>
    %c0_27 = arith.constant 0 : index
    %c0_28 = arith.constant 0 : index
    %31 = vector.load %arg1[%c0_27, %c0_28] : memref<128x72xbf16, #tpu.memory_space<vmem>>, vector<128x72xbf16>
    %32 = arith.mulf %30, %31 : vector<128x72xbf16>
    %c0_29 = arith.constant 0 : index
    %c0_30 = arith.constant 0 : index
    %33 = vector.load %arg2[%c0_29, %c0_30] : memref<72x16xbf16, #tpu.memory_space<vmem>>, vector<72x16xbf16>
    %cst = arith.constant dense<0.000000e+00> : vector<128x16xf32>
    %34 = tpu.matmul %32, %33, %cst {dimension_numbers = #tpu.dot_dimension_numbers<[1], [0], [0], [1], [0, 0, 1, 1], [], []>} : vector<128x72xbf16>, vector<72x16xbf16>, vector<128x16xf32> -> vector<128x16xf32>
    %c0_31 = arith.constant 0 : index
    %c0_32 = arith.constant 0 : index
    %35 = vector.load %arg3[%c0_31, %c0_32] : memref<1x16xf32, #tpu.memory_space<vmem>>, vector<1x16xf32>
    %36 = vector.broadcast %35 : vector<1x16xf32> to vector<128x16xf32>
    %37 = arith.addf %34, %36 : vector<128x16xf32>
    %cst_33 = arith.constant 0.000000e+00 : f32
    %38 = vector.broadcast %cst_33 : f32 to vector<128x16xf32>
    %39 = arith.maximumf %37, %38 : vector<128x16xf32>
    %c0_34 = arith.constant 0 : index
    %c0_35 = arith.constant 0 : index
    %40 = vector.load %arg42[%c0_34, %c0_35] : memref<256x64xf32, #tpu.memory_space<vmem>>, vector<128x16xf32>
    tpu.vector_store %arg42[%c0_34, %c0_35], %39 {strides = array<i32>} : memref<256x64xf32, #tpu.memory_space<vmem>>, vector<128x16xf32>,
    %c128_36 = arith.constant 128 : index
    %c0_37 = arith.constant 0 : index
    %41 = vector.load %arg42[%c128_36, %c0_37] : memref<256x64xf32, #tpu.memory_space<vmem>>, vector<128x16xf32>
    tpu.vector_store %arg42[%c128_36, %c0_37], %39 {strides = array<i32>} : memref<256x64xf32, #tpu.memory_space<vmem>>, vector<128x16xf32>,
    %c119_38 = arith.constant 119 : index
    %c0_39 = arith.constant 0 : index
    %42 = vector.load %arg42[%c119_38, %c0_39] : memref<256x64xf32, #tpu.memory_space<vmem>>, vector<128x16xf32>
    %43 = arith.truncf %42 : vector<128x16xf32> to vector<128x16xbf16>
    %c0_40 = arith.constant 0 : index
    %c0_41 = arith.constant 0 : index
    %44 = vector.load %arg43[%c0_40, %c0_41] : memref<128x288xbf16, #tpu.memory_space<vmem>>, vector<128x16xbf16>
    tpu.vector_store %arg43[%c0_40, %c0_41], %43 {strides = array<i32>} : memref<128x288xbf16, #tpu.memory_space<vmem>>, vector<128x16xbf16>,
    %c120_42 = arith.constant 120 : index
    %c0_43 = arith.constant 0 : index
    %45 = vector.load %arg42[%c120_42, %c0_43] : memref<256x64xf32, #tpu.memory_space<vmem>>, vector<128x16xf32>
    %46 = arith.truncf %45 : vector<128x16xf32> to vector<128x16xbf16>
    %c0_44 = arith.constant 0 : index
    %c16_45 = arith.constant 16 : index
    %47 = vector.load %arg43[%c0_44, %c16_45] : memref<128x288xbf16, #tpu.memory_space<vmem>>, vector<128x16xbf16>
    tpu.vector_store %arg43[%c0_44, %c16_45], %46 {strides = array<i32>} : memref<128x288xbf16, #tpu.memory_space<vmem>>, vector<128x16xbf16>,
    %c121_46 = arith.constant 121 : index
    %c0_47 = arith.constant 0 : index
    %48 = vector.load %arg42[%c121_46, %c0_47] : memref<256x64xf32, #tpu.memory_space<vmem>>, vector<128x16xf32>
    %49 = arith.truncf %48 : vector<128x16xf32> to vector<128x16xbf16>
    %c0_48 = arith.constant 0 : index
    %c32_49 = arith.constant 32 : index
    %50 = vector.load %arg43[%c0_48, %c32_49] : memref<128x288xbf16, #tpu.memory_space<vmem>>, vector<128x16xbf16>
    tpu.vector_store %arg43[%c0_48, %c32_49], %49 {strides = array<i32>} : memref<128x288xbf16, #tpu.memory_space<vmem>>, vector<128x16xbf16>,
    %c127_50 = arith.constant 127 : index
    %c0_51 = arith.constant 0 : index
    %51 = vector.load %arg42[%c127_50, %c0_51] : memref<256x64xf32, #tpu.memory_space<vmem>>, vector<128x16xf32>
    %52 = arith.truncf %51 : vector<128x16xf32> to vector<128x16xbf16>
    %c0_52 = arith.constant 0 : index
    %c48_53 = arith.constant 48 : index
    %53 = vector.load %arg43[%c0_52, %c48_53] : memref<128x288xbf16, #tpu.memory_space<vmem>>, vector<128x16xbf16>
    tpu.vector_store %arg43[%c0_52, %c48_53], %52 {strides = array<i32>} : memref<128x288xbf16, #tpu.memory_space<vmem>>, vector<128x16xbf16>,
    %c0_54 = arith.constant 0 : index
    %c0_55 = arith.constant 0 : index
    %54 = vector.load %arg42[%c0_54, %c0_55] : memref<256x64xf32, #tpu.memory_space<vmem>>, vector<128x16xf32>
    %55 = arith.truncf %54 : vector<128x16xf32> to vector<128x16xbf16>
    %c0_56 = arith.constant 0 : index
    %c64_57 = arith.constant 64 : index
    %56 = vector.load %arg43[%c0_56, %c64_57] : memref<128x288xbf16, #tpu.memory_space<vmem>>, vector<128x16xbf16>
    tpu.vector_store %arg43[%c0_56, %c64_57], %55 {strides = array<i32>} : memref<128x288xbf16, #tpu.memory_space<vmem>>, vector<128x16xbf16>,
    %c1_58 = arith.constant 1 : index
    %c0_59 = arith.constant 0 : index
    %57 = vector.load %arg42[%c1_58, %c0_59] : memref<256x64xf32, #tpu.memory_space<vmem>>, vector<128x16xf32>
    %58 = arith.truncf %57 : vector<128x16xf32> to vector<128x16xbf16>
    %c0_60 = arith.constant 0 : index
    %c80 = arith.constant 80 : index
    %59 = vector.load %arg43[%c0_60, %c80] : memref<128x288xbf16, #tpu.memory_space<vmem>>, vector<128x16xbf16>
    tpu.vector_store %arg43[%c0_60, %c80], %58 {strides = array<i32>} : memref<128x288xbf16, #tpu.memory_space<vmem>>, vector<128x16xbf16>,
    %c7_61 = arith.constant 7 : index
    %c0_62 = arith.constant 0 : index
    %60 = vector.load %arg42[%c7_61, %c0_62] : memref<256x64xf32, #tpu.memory_space<vmem>>, vector<128x16xf32>
    %61 = arith.truncf %60 : vector<128x16xf32> to vector<128x16xbf16>
    %c0_63 = arith.constant 0 : index
    %c96 = arith.constant 96 : index
    %62 = vector.load %arg43[%c0_63, %c96] : memref<128x288xbf16, #tpu.memory_space<vmem>>, vector<128x16xbf16>
    tpu.vector_store %arg43[%c0_63, %c96], %61 {strides = array<i32>} : memref<128x288xbf16, #tpu.memory_space<vmem>>, vector<128x16xbf16>,
    %c8_64 = arith.constant 8 : index
    %c0_65 = arith.constant 0 : index
    %63 = vector.load %arg42[%c8_64, %c0_65] : memref<256x64xf32, #tpu.memory_space<vmem>>, vector<128x16xf32>
    %64 = arith.truncf %63 : vector<128x16xf32> to vector<128x16xbf16>
    %c0_66 = arith.constant 0 : index
    %c112 = arith.constant 112 : index
    %65 = vector.load %arg43[%c0_66, %c112] : memref<128x288xbf16, #tpu.memory_space<vmem>>, vector<128x16xbf16>
    tpu.vector_store %arg43[%c0_66, %c112], %64 {strides = array<i32>} : memref<128x288xbf16, #tpu.memory_space<vmem>>, vector<128x16xbf16>,
    %c9_67 = arith.constant 9 : index
    %c0_68 = arith.constant 0 : index
    %66 = vector.load %arg42[%c9_67, %c0_68] : memref<256x64xf32, #tpu.memory_space<vmem>>, vector<128x16xf32>
    %67 = arith.truncf %66 : vector<128x16xf32> to vector<128x16xbf16>
    %c0_69 = arith.constant 0 : index
    %c128_70 = arith.constant 128 : index
    %68 = vector.load %arg43[%c0_69, %c128_70] : memref<128x288xbf16, #tpu.memory_space<vmem>>, vector<128x16xbf16>
    tpu.vector_store %arg43[%c0_69, %c128_70], %67 {strides = array<i32>} : memref<128x288xbf16, #tpu.memory_space<vmem>>, vector<128x16xbf16>,
    %c0_71 = arith.constant 0 : index
    %c0_72 = arith.constant 0 : index
    %69 = vector.load %arg43[%c0_71, %c0_72] : memref<128x288xbf16, #tpu.memory_space<vmem>>, vector<128x144xbf16>
    %c0_73 = arith.constant 0 : index
    %c0_74 = arith.constant 0 : index
    %70 = vector.load %arg4[%c0_73, %c0_74] : memref<128x144xbf16, #tpu.memory_space<vmem>>, vector<128x144xbf16>
    %71 = arith.mulf %69, %70 : vector<128x144xbf16>
    %c0_75 = arith.constant 0 : index
    %c0_76 = arith.constant 0 : index
    %72 = vector.load %arg5[%c0_75, %c0_76] : memref<144x16xbf16, #tpu.memory_space<vmem>>, vector<144x16xbf16>
    %cst_77 = arith.constant dense<0.000000e+00> : vector<128x16xf32>
    %73 = tpu.matmul %71, %72, %cst_77 {dimension_numbers = #tpu.dot_dimension_numbers<[1], [0], [0], [1], [0, 0, 1, 1], [], []>} : vector<128x144xbf16>, vector<144x16xbf16>, vector<128x16xf32> -> vector<128x16xf32>
    %c0_78 = arith.constant 0 : index
    %c0_79 = arith.constant 0 : index
    %74 = vector.load %arg6[%c0_78, %c0_79] : memref<1x16xf32, #tpu.memory_space<vmem>>, vector<1x16xf32>
    %75 = vector.broadcast %74 : vector<1x16xf32> to vector<128x16xf32>
    %76 = arith.addf %73, %75 : vector<128x16xf32>
    %cst_80 = arith.constant 0.000000e+00 : f32
    %77 = vector.broadcast %cst_80 : f32 to vector<128x16xf32>
    %78 = arith.maximumf %76, %77 : vector<128x16xf32>
    %c0_81 = arith.constant 0 : index
    %c0_82 = arith.constant 0 : index
    %79 = vector.load %arg42[%c0_81, %c0_82] : memref<256x64xf32, #tpu.memory_space<vmem>>, vector<128x16xf32>
    tpu.vector_store %arg42[%c0_81, %c0_82], %78 {strides = array<i32>} : memref<256x64xf32, #tpu.memory_space<vmem>>, vector<128x16xf32>,
    %c128_83 = arith.constant 128 : index
    %c0_84 = arith.constant 0 : index
    %80 = vector.load %arg42[%c128_83, %c0_84] : memref<256x64xf32, #tpu.memory_space<vmem>>, vector<128x16xf32>
    tpu.vector_store %arg42[%c128_83, %c0_84], %78 {strides = array<i32>} : memref<256x64xf32, #tpu.memory_space<vmem>>, vector<128x16xf32>,
    %c0_85 = arith.constant 0 : index
    %c0_86 = arith.constant 0 : index
    %81 = vector.load %arg42[%c0_85, %c0_86] : memref<256x64xf32, #tpu.memory_space<vmem>>, vector<128x16xf32>
    %82 = arith.truncf %81 : vector<128x16xf32> to vector<128x16xbf16>
    %c0_87 = arith.constant 0 : index
    %c0_88 = arith.constant 0 : index
    %83 = vector.load %arg43[%c0_87, %c0_88] : memref<128x288xbf16, #tpu.memory_space<vmem>>, vector<128x16xbf16>
    tpu.vector_store %arg43[%c0_87, %c0_88], %82 {strides = array<i32>} : memref<128x288xbf16, #tpu.memory_space<vmem>>, vector<128x16xbf16>,
    %c1_89 = arith.constant 1 : index
    %c0_90 = arith.constant 0 : index
    %84 = vector.load %arg42[%c1_89, %c0_90] : memref<256x64xf32, #tpu.memory_space<vmem>>, vector<128x16xf32>
    %85 = arith.truncf %84 : vector<128x16xf32> to vector<128x16xbf16>
    %c0_91 = arith.constant 0 : index
    %c16_92 = arith.constant 16 : index
    %86 = vector.load %arg43[%c0_91, %c16_92] : memref<128x288xbf16, #tpu.memory_space<vmem>>, vector<128x16xbf16>
    tpu.vector_store %arg43[%c0_91, %c16_92], %85 {strides = array<i32>} : memref<128x288xbf16, #tpu.memory_space<vmem>>, vector<128x16xbf16>,
    %c2 = arith.constant 2 : index
    %c0_93 = arith.constant 0 : index
    %87 = vector.load %arg42[%c2, %c0_93] : memref<256x64xf32, #tpu.memory_space<vmem>>, vector<128x16xf32>
    %88 = arith.truncf %87 : vector<128x16xf32> to vector<128x16xbf16>
    %c0_94 = arith.constant 0 : index
    %c32_95 = arith.constant 32 : index
    %89 = vector.load %arg43[%c0_94, %c32_95] : memref<128x288xbf16, #tpu.memory_space<vmem>>, vector<128x16xbf16>
    tpu.vector_store %arg43[%c0_94, %c32_95], %88 {strides = array<i32>} : memref<128x288xbf16, #tpu.memory_space<vmem>>, vector<128x16xbf16>,
    %c8_96 = arith.constant 8 : index
    %c0_97 = arith.constant 0 : index
    %90 = vector.load %arg42[%c8_96, %c0_97] : memref<256x64xf32, #tpu.memory_space<vmem>>, vector<128x16xf32>
    %91 = arith.truncf %90 : vector<128x16xf32> to vector<128x16xbf16>
    %c0_98 = arith.constant 0 : index
    %c48_99 = arith.constant 48 : index
    %92 = vector.load %arg43[%c0_98, %c48_99] : memref<128x288xbf16, #tpu.memory_space<vmem>>, vector<128x16xbf16>
    tpu.vector_store %arg43[%c0_98, %c48_99], %91 {strides = array<i32>} : memref<128x288xbf16, #tpu.memory_space<vmem>>, vector<128x16xbf16>,
    %c9_100 = arith.constant 9 : index
    %c0_101 = arith.constant 0 : index
    %93 = vector.load %arg42[%c9_100, %c0_101] : memref<256x64xf32, #tpu.memory_space<vmem>>, vector<128x16xf32>
    %94 = arith.truncf %93 : vector<128x16xf32> to vector<128x16xbf16>
    %c0_102 = arith.constant 0 : index
    %c64_103 = arith.constant 64 : index
    %95 = vector.load %arg43[%c0_102, %c64_103] : memref<128x288xbf16, #tpu.memory_space<vmem>>, vector<128x16xbf16>
    tpu.vector_store %arg43[%c0_102, %c64_103], %94 {strides = array<i32>} : memref<128x288xbf16, #tpu.memory_space<vmem>>, vector<128x16xbf16>,
    %c10 = arith.constant 10 : index
    %c0_104 = arith.constant 0 : index
    %96 = vector.load %arg42[%c10, %c0_104] : memref<256x64xf32, #tpu.memory_space<vmem>>, vector<128x16xf32>
    %97 = arith.truncf %96 : vector<128x16xf32> to vector<128x16xbf16>
    %c0_105 = arith.constant 0 : index
    %c80_106 = arith.constant 80 : index
    %98 = vector.load %arg43[%c0_105, %c80_106] : memref<128x288xbf16, #tpu.memory_space<vmem>>, vector<128x16xbf16>
    tpu.vector_store %arg43[%c0_105, %c80_106], %97 {strides = array<i32>} : memref<128x288xbf16, #tpu.memory_space<vmem>>, vector<128x16xbf16>,
    %c16_107 = arith.constant 16 : index
    %c0_108 = arith.constant 0 : index
    %99 = vector.load %arg42[%c16_107, %c0_108] : memref<256x64xf32, #tpu.memory_space<vmem>>, vector<128x16xf32>
    %100 = arith.truncf %99 : vector<128x16xf32> to vector<128x16xbf16>
    %c0_109 = arith.constant 0 : index
    %c96_110 = arith.constant 96 : index
    %101 = vector.load %arg43[%c0_109, %c96_110] : memref<128x288xbf16, #tpu.memory_space<vmem>>, vector<128x16xbf16>
    tpu.vector_store %arg43[%c0_109, %c96_110], %100 {strides = array<i32>} : memref<128x288xbf16, #tpu.memory_space<vmem>>, vector<128x16xbf16>,
    %c17 = arith.constant 17 : index
    %c0_111 = arith.constant 0 : index
    %102 = vector.load %arg42[%c17, %c0_111] : memref<256x64xf32, #tpu.memory_space<vmem>>, vector<128x16xf32>
    %103 = arith.truncf %102 : vector<128x16xf32> to vector<128x16xbf16>
    %c0_112 = arith.constant 0 : index
    %c112_113 = arith.constant 112 : index
    %104 = vector.load %arg43[%c0_112, %c112_113] : memref<128x288xbf16, #tpu.memory_space<vmem>>, vector<128x16xbf16>
    tpu.vector_store %arg43[%c0_112, %c112_113], %103 {strides = array<i32>} : memref<128x288xbf16, #tpu.memory_space<vmem>>, vector<128x16xbf16>,
    %c18 = arith.constant 18 : index
    %c0_114 = arith.constant 0 : index
    %105 = vector.load %arg42[%c18, %c0_114] : memref<256x64xf32, #tpu.memory_space<vmem>>, vector<128x16xf32>
    %106 = arith.truncf %105 : vector<128x16xf32> to vector<128x16xbf16>
    %c0_115 = arith.constant 0 : index
    %c128_116 = arith.constant 128 : index
    %107 = vector.load %arg43[%c0_115, %c128_116] : memref<128x288xbf16, #tpu.memory_space<vmem>>, vector<128x16xbf16>
    tpu.vector_store %arg43[%c0_115, %c128_116], %106 {strides = array<i32>} : memref<128x288xbf16, #tpu.memory_space<vmem>>, vector<128x16xbf16>,
    %c0_117 = arith.constant 0 : index
    %c0_118 = arith.constant 0 : index
    %108 = vector.load %arg43[%c0_117, %c0_118] : memref<128x288xbf16, #tpu.memory_space<vmem>>, vector<128x144xbf16>
    %c0_119 = arith.constant 0 : index
    %c0_120 = arith.constant 0 : index
    %109 = vector.load %arg7[%c0_119, %c0_120] : memref<128x144xbf16, #tpu.memory_space<vmem>>, vector<128x144xbf16>
    %110 = arith.mulf %108, %109 : vector<128x144xbf16>
    %c0_121 = arith.constant 0 : index
    %c0_122 = arith.constant 0 : index
    %111 = vector.load %arg8[%c0_121, %c0_122] : memref<144x32xbf16, #tpu.memory_space<vmem>>, vector<144x32xbf16>
    %cst_123 = arith.constant dense<0.000000e+00> : vector<128x32xf32>
    %112 = tpu.matmul %110, %111, %cst_123 {dimension_numbers = #tpu.dot_dimension_numbers<[1], [0], [0], [1], [0, 0, 1, 1], [], []>} : vector<128x144xbf16>, vector<144x32xbf16>, vector<128x32xf32> -> vector<128x32xf32>
    %c0_124 = arith.constant 0 : index
    %c0_125 = arith.constant 0 : index
    %113 = vector.load %arg9[%c0_124, %c0_125] : memref<1x32xf32, #tpu.memory_space<vmem>>, vector<1x32xf32>
    %114 = vector.broadcast %113 : vector<1x32xf32> to vector<128x32xf32>
    %115 = arith.addf %112, %114 : vector<128x32xf32>
    %cst_126 = arith.constant 0.000000e+00 : f32
    %116 = vector.broadcast %cst_126 : f32 to vector<128x32xf32>
    %117 = arith.maximumf %115, %116 : vector<128x32xf32>
    %c0_127 = arith.constant 0 : index
    %c0_128 = arith.constant 0 : index
    %118 = vector.load %arg10[%c0_127, %c0_128] : memref<32x128xbf16, #tpu.memory_space<vmem>>, vector<32x128xbf16>
    %119 = arith.truncf %117 : vector<128x32xf32> to vector<128x32xbf16>
    %cst_129 = arith.constant dense<0.000000e+00> : vector<32x32xf32>
    %120 = tpu.matmul %118, %119, %cst_129 {dimension_numbers = #tpu.dot_dimension_numbers<[1], [0], [0], [1], [0, 0, 1, 1], [], []>} : vector<32x128xbf16>, vector<128x32xbf16>, vector<32x32xf32> -> vector<32x32xf32>
    %c0_130 = arith.constant 0 : index
    %c0_131 = arith.constant 0 : index
    %121 = vector.load %arg42[%c0_130, %c0_131] : memref<256x64xf32, #tpu.memory_space<vmem>>, vector<32x32xf32>
    tpu.vector_store %arg42[%c0_130, %c0_131], %120 {strides = array<i32>} : memref<256x64xf32, #tpu.memory_space<vmem>>, vector<32x32xf32>,
    %c32_132 = arith.constant 32 : index
    %c0_133 = arith.constant 0 : index
    %122 = vector.load %arg42[%c32_132, %c0_133] : memref<256x64xf32, #tpu.memory_space<vmem>>, vector<32x32xf32>
    tpu.vector_store %arg42[%c32_132, %c0_133], %120 {strides = array<i32>} : memref<256x64xf32, #tpu.memory_space<vmem>>, vector<32x32xf32>,
    %c28 = arith.constant 28 : index
    %c0_134 = arith.constant 0 : index
    %123 = vector.load %arg42[%c28, %c0_134] : memref<256x64xf32, #tpu.memory_space<vmem>>, vector<32x32xf32>
    %124 = arith.truncf %123 : vector<32x32xf32> to vector<32x32xbf16>
    %c0_135 = arith.constant 0 : index
    %c0_136 = arith.constant 0 : index
    %125 = vector.load %arg43[%c0_135, %c0_136] : memref<128x288xbf16, #tpu.memory_space<vmem>>, vector<32x32xbf16>
    tpu.vector_store %arg43[%c0_135, %c0_136], %124 {strides = array<i32>} : memref<128x288xbf16, #tpu.memory_space<vmem>>, vector<32x32xbf16>,
    %c29 = arith.constant 29 : index
    %c0_137 = arith.constant 0 : index
    %126 = vector.load %arg42[%c29, %c0_137] : memref<256x64xf32, #tpu.memory_space<vmem>>, vector<32x32xf32>
    %127 = arith.truncf %126 : vector<32x32xf32> to vector<32x32xbf16>
    %c0_138 = arith.constant 0 : index
    %c32_139 = arith.constant 32 : index
    %128 = vector.load %arg43[%c0_138, %c32_139] : memref<128x288xbf16, #tpu.memory_space<vmem>>, vector<32x32xbf16>
    tpu.vector_store %arg43[%c0_138, %c32_139], %127 {strides = array<i32>} : memref<128x288xbf16, #tpu.memory_space<vmem>>, vector<32x32xbf16>,
    %c30 = arith.constant 30 : index
    %c0_140 = arith.constant 0 : index
    %129 = vector.load %arg42[%c30, %c0_140] : memref<256x64xf32, #tpu.memory_space<vmem>>, vector<32x32xf32>
    %130 = arith.truncf %129 : vector<32x32xf32> to vector<32x32xbf16>
    %c0_141 = arith.constant 0 : index
    %c64_142 = arith.constant 64 : index
    %131 = vector.load %arg43[%c0_141, %c64_142] : memref<128x288xbf16, #tpu.memory_space<vmem>>, vector<32x32xbf16>
    tpu.vector_store %arg43[%c0_141, %c64_142], %130 {strides = array<i32>} : memref<128x288xbf16, #tpu.memory_space<vmem>>, vector<32x32xbf16>,
    %c31 = arith.constant 31 : index
    %c0_143 = arith.constant 0 : index
    %132 = vector.load %arg42[%c31, %c0_143] : memref<256x64xf32, #tpu.memory_space<vmem>>, vector<32x32xf32>
    %133 = arith.truncf %132 : vector<32x32xf32> to vector<32x32xbf16>
    %c0_144 = arith.constant 0 : index
    %c96_145 = arith.constant 96 : index
    %134 = vector.load %arg43[%c0_144, %c96_145] : memref<128x288xbf16, #tpu.memory_space<vmem>>, vector<32x32xbf16>
    tpu.vector_store %arg43[%c0_144, %c96_145], %133 {strides = array<i32>} : memref<128x288xbf16, #tpu.memory_space<vmem>>, vector<32x32xbf16>,
    %c0_146 = arith.constant 0 : index
    %c0_147 = arith.constant 0 : index
    %135 = vector.load %arg42[%c0_146, %c0_147] : memref<256x64xf32, #tpu.memory_space<vmem>>, vector<32x32xf32>
    %136 = arith.truncf %135 : vector<32x32xf32> to vector<32x32xbf16>
    %c0_148 = arith.constant 0 : index
    %c128_149 = arith.constant 128 : index
    %137 = vector.load %arg43[%c0_148, %c128_149] : memref<128x288xbf16, #tpu.memory_space<vmem>>, vector<32x32xbf16>
    tpu.vector_store %arg43[%c0_148, %c128_149], %136 {strides = array<i32>} : memref<128x288xbf16, #tpu.memory_space<vmem>>, vector<32x32xbf16>,
    %c1_150 = arith.constant 1 : index
    %c0_151 = arith.constant 0 : index
    %138 = vector.load %arg42[%c1_150, %c0_151] : memref<256x64xf32, #tpu.memory_space<vmem>>, vector<32x32xf32>
    %139 = arith.truncf %138 : vector<32x32xf32> to vector<32x32xbf16>
    %c0_152 = arith.constant 0 : index
    %c160 = arith.constant 160 : index
    %140 = vector.load %arg43[%c0_152, %c160] : memref<128x288xbf16, #tpu.memory_space<vmem>>, vector<32x32xbf16>
    tpu.vector_store %arg43[%c0_152, %c160], %139 {strides = array<i32>} : memref<128x288xbf16, #tpu.memory_space<vmem>>, vector<32x32xbf16>,
    %c2_153 = arith.constant 2 : index
    %c0_154 = arith.constant 0 : index
    %141 = vector.load %arg42[%c2_153, %c0_154] : memref<256x64xf32, #tpu.memory_space<vmem>>, vector<32x32xf32>
    %142 = arith.truncf %141 : vector<32x32xf32> to vector<32x32xbf16>
    %c0_155 = arith.constant 0 : index
    %c192 = arith.constant 192 : index
    %143 = vector.load %arg43[%c0_155, %c192] : memref<128x288xbf16, #tpu.memory_space<vmem>>, vector<32x32xbf16>
    tpu.vector_store %arg43[%c0_155, %c192], %142 {strides = array<i32>} : memref<128x288xbf16, #tpu.memory_space<vmem>>, vector<32x32xbf16>,
    %c3 = arith.constant 3 : index
    %c0_156 = arith.constant 0 : index
    %144 = vector.load %arg42[%c3, %c0_156] : memref<256x64xf32, #tpu.memory_space<vmem>>, vector<32x32xf32>
    %145 = arith.truncf %144 : vector<32x32xf32> to vector<32x32xbf16>
    %c0_157 = arith.constant 0 : index
    %c224 = arith.constant 224 : index
    %146 = vector.load %arg43[%c0_157, %c224] : memref<128x288xbf16, #tpu.memory_space<vmem>>, vector<32x32xbf16>
    tpu.vector_store %arg43[%c0_157, %c224], %145 {strides = array<i32>} : memref<128x288xbf16, #tpu.memory_space<vmem>>, vector<32x32xbf16>,
    %c4 = arith.constant 4 : index
    %c0_158 = arith.constant 0 : index
    %147 = vector.load %arg42[%c4, %c0_158] : memref<256x64xf32, #tpu.memory_space<vmem>>, vector<32x32xf32>
    %148 = arith.truncf %147 : vector<32x32xf32> to vector<32x32xbf16>
    %c0_159 = arith.constant 0 : index
    %c256 = arith.constant 256 : index
    %149 = vector.load %arg43[%c0_159, %c256] : memref<128x288xbf16, #tpu.memory_space<vmem>>, vector<32x32xbf16>
    tpu.vector_store %arg43[%c0_159, %c256], %148 {strides = array<i32>} : memref<128x288xbf16, #tpu.memory_space<vmem>>, vector<32x32xbf16>,
    %c0_160 = arith.constant 0 : index
    %c0_161 = arith.constant 0 : index
    %150 = vector.load %arg43[%c0_160, %c0_161] : memref<128x288xbf16, #tpu.memory_space<vmem>>, vector<32x288xbf16>
    %c0_162 = arith.constant 0 : index
    %c0_163 = arith.constant 0 : index
    %151 = vector.load %arg11[%c0_162, %c0_163] : memref<32x288xbf16, #tpu.memory_space<vmem>>, vector<32x288xbf16>
    %152 = arith.mulf %150, %151 : vector<32x288xbf16>
    %c0_164 = arith.constant 0 : index
    %c0_165 = arith.constant 0 : index
    %153 = vector.load %arg12[%c0_164, %c0_165] : memref<288x32xbf16, #tpu.memory_space<vmem>>, vector<288x32xbf16>
    %cst_166 = arith.constant dense<0.000000e+00> : vector<32x32xf32>
    %154 = tpu.matmul %152, %153, %cst_166 {dimension_numbers = #tpu.dot_dimension_numbers<[1], [0], [0], [1], [0, 0, 1, 1], [], []>} : vector<32x288xbf16>, vector<288x32xbf16>, vector<32x32xf32> -> vector<32x32xf32>
    %c0_167 = arith.constant 0 : index
    %c0_168 = arith.constant 0 : index
    %155 = vector.load %arg13[%c0_167, %c0_168] : memref<1x32xf32, #tpu.memory_space<vmem>>, vector<1x32xf32>
    %156 = vector.broadcast %155 : vector<1x32xf32> to vector<32x32xf32>
    %157 = arith.addf %154, %156 : vector<32x32xf32>
    %cst_169 = arith.constant 0.000000e+00 : f32
    %158 = vector.broadcast %cst_169 : f32 to vector<32x32xf32>
    %159 = arith.maximumf %157, %158 : vector<32x32xf32>
    %c0_170 = arith.constant 0 : index
    %c0_171 = arith.constant 0 : index
    %160 = vector.load %arg42[%c0_170, %c0_171] : memref<256x64xf32, #tpu.memory_space<vmem>>, vector<32x32xf32>
    tpu.vector_store %arg42[%c0_170, %c0_171], %159 {strides = array<i32>} : memref<256x64xf32, #tpu.memory_space<vmem>>, vector<32x32xf32>,
    %c32_172 = arith.constant 32 : index
    %c0_173 = arith.constant 0 : index
    %161 = vector.load %arg42[%c32_172, %c0_173] : memref<256x64xf32, #tpu.memory_space<vmem>>, vector<32x32xf32>
    tpu.vector_store %arg42[%c32_172, %c0_173], %159 {strides = array<i32>} : memref<256x64xf32, #tpu.memory_space<vmem>>, vector<32x32xf32>,
    %c28_174 = arith.constant 28 : index
    %c0_175 = arith.constant 0 : index
    %162 = vector.load %arg42[%c28_174, %c0_175] : memref<256x64xf32, #tpu.memory_space<vmem>>, vector<32x32xf32>
    %163 = arith.truncf %162 : vector<32x32xf32> to vector<32x32xbf16>
    %c0_176 = arith.constant 0 : index
    %c0_177 = arith.constant 0 : index
    %164 = vector.load %arg43[%c0_176, %c0_177] : memref<128x288xbf16, #tpu.memory_space<vmem>>, vector<32x32xbf16>
    tpu.vector_store %arg43[%c0_176, %c0_177], %163 {strides = array<i32>} : memref<128x288xbf16, #tpu.memory_space<vmem>>, vector<32x32xbf16>,
    %c29_178 = arith.constant 29 : index
    %c0_179 = arith.constant 0 : index
    %165 = vector.load %arg42[%c29_178, %c0_179] : memref<256x64xf32, #tpu.memory_space<vmem>>, vector<32x32xf32>
    %166 = arith.truncf %165 : vector<32x32xf32> to vector<32x32xbf16>
    %c0_180 = arith.constant 0 : index
    %c32_181 = arith.constant 32 : index
    %167 = vector.load %arg43[%c0_180, %c32_181] : memref<128x288xbf16, #tpu.memory_space<vmem>>, vector<32x32xbf16>
    tpu.vector_store %arg43[%c0_180, %c32_181], %166 {strides = array<i32>} : memref<128x288xbf16, #tpu.memory_space<vmem>>, vector<32x32xbf16>,
    %c30_182 = arith.constant 30 : index
    %c0_183 = arith.constant 0 : index
    %168 = vector.load %arg42[%c30_182, %c0_183] : memref<256x64xf32, #tpu.memory_space<vmem>>, vector<32x32xf32>
    %169 = arith.truncf %168 : vector<32x32xf32> to vector<32x32xbf16>
    %c0_184 = arith.constant 0 : index
    %c64_185 = arith.constant 64 : index
    %170 = vector.load %arg43[%c0_184, %c64_185] : memref<128x288xbf16, #tpu.memory_space<vmem>>, vector<32x32xbf16>
    tpu.vector_store %arg43[%c0_184, %c64_185], %169 {strides = array<i32>} : memref<128x288xbf16, #tpu.memory_space<vmem>>, vector<32x32xbf16>,
    %c31_186 = arith.constant 31 : index
    %c0_187 = arith.constant 0 : index
    %171 = vector.load %arg42[%c31_186, %c0_187] : memref<256x64xf32, #tpu.memory_space<vmem>>, vector<32x32xf32>
    %172 = arith.truncf %171 : vector<32x32xf32> to vector<32x32xbf16>
    %c0_188 = arith.constant 0 : index
    %c96_189 = arith.constant 96 : index
    %173 = vector.load %arg43[%c0_188, %c96_189] : memref<128x288xbf16, #tpu.memory_space<vmem>>, vector<32x32xbf16>
    tpu.vector_store %arg43[%c0_188, %c96_189], %172 {strides = array<i32>} : memref<128x288xbf16, #tpu.memory_space<vmem>>, vector<32x32xbf16>,
    %c0_190 = arith.constant 0 : index
    %c0_191 = arith.constant 0 : index
    %174 = vector.load %arg42[%c0_190, %c0_191] : memref<256x64xf32, #tpu.memory_space<vmem>>, vector<32x32xf32>
    %175 = arith.truncf %174 : vector<32x32xf32> to vector<32x32xbf16>
    %c0_192 = arith.constant 0 : index
    %c128_193 = arith.constant 128 : index
    %176 = vector.load %arg43[%c0_192, %c128_193] : memref<128x288xbf16, #tpu.memory_space<vmem>>, vector<32x32xbf16>
    tpu.vector_store %arg43[%c0_192, %c128_193], %175 {strides = array<i32>} : memref<128x288xbf16, #tpu.memory_space<vmem>>, vector<32x32xbf16>,
    %c1_194 = arith.constant 1 : index
    %c0_195 = arith.constant 0 : index
    %177 = vector.load %arg42[%c1_194, %c0_195] : memref<256x64xf32, #tpu.memory_space<vmem>>, vector<32x32xf32>
    %178 = arith.truncf %177 : vector<32x32xf32> to vector<32x32xbf16>
    %c0_196 = arith.constant 0 : index
    %c160_197 = arith.constant 160 : index
    %179 = vector.load %arg43[%c0_196, %c160_197] : memref<128x288xbf16, #tpu.memory_space<vmem>>, vector<32x32xbf16>
    tpu.vector_store %arg43[%c0_196, %c160_197], %178 {strides = array<i32>} : memref<128x288xbf16, #tpu.memory_space<vmem>>, vector<32x32xbf16>,
    %c2_198 = arith.constant 2 : index
    %c0_199 = arith.constant 0 : index
    %180 = vector.load %arg42[%c2_198, %c0_199] : memref<256x64xf32, #tpu.memory_space<vmem>>, vector<32x32xf32>
    %181 = arith.truncf %180 : vector<32x32xf32> to vector<32x32xbf16>
    %c0_200 = arith.constant 0 : index
    %c192_201 = arith.constant 192 : index
    %182 = vector.load %arg43[%c0_200, %c192_201] : memref<128x288xbf16, #tpu.memory_space<vmem>>, vector<32x32xbf16>
    tpu.vector_store %arg43[%c0_200, %c192_201], %181 {strides = array<i32>} : memref<128x288xbf16, #tpu.memory_space<vmem>>, vector<32x32xbf16>,
    %c3_202 = arith.constant 3 : index
    %c0_203 = arith.constant 0 : index
    %183 = vector.load %arg42[%c3_202, %c0_203] : memref<256x64xf32, #tpu.memory_space<vmem>>, vector<32x32xf32>
    %184 = arith.truncf %183 : vector<32x32xf32> to vector<32x32xbf16>
    %c0_204 = arith.constant 0 : index
    %c224_205 = arith.constant 224 : index
    %185 = vector.load %arg43[%c0_204, %c224_205] : memref<128x288xbf16, #tpu.memory_space<vmem>>, vector<32x32xbf16>
    tpu.vector_store %arg43[%c0_204, %c224_205], %184 {strides = array<i32>} : memref<128x288xbf16, #tpu.memory_space<vmem>>, vector<32x32xbf16>,
    %c4_206 = arith.constant 4 : index
    %c0_207 = arith.constant 0 : index
    %186 = vector.load %arg42[%c4_206, %c0_207] : memref<256x64xf32, #tpu.memory_space<vmem>>, vector<32x32xf32>
    %187 = arith.truncf %186 : vector<32x32xf32> to vector<32x32xbf16>
    %c0_208 = arith.constant 0 : index
    %c256_209 = arith.constant 256 : index
    %188 = vector.load %arg43[%c0_208, %c256_209] : memref<128x288xbf16, #tpu.memory_space<vmem>>, vector<32x32xbf16>
    tpu.vector_store %arg43[%c0_208, %c256_209], %187 {strides = array<i32>} : memref<128x288xbf16, #tpu.memory_space<vmem>>, vector<32x32xbf16>,
    %c0_210 = arith.constant 0 : index
    %c0_211 = arith.constant 0 : index
    %189 = vector.load %arg43[%c0_210, %c0_211] : memref<128x288xbf16, #tpu.memory_space<vmem>>, vector<32x288xbf16>
    %c0_212 = arith.constant 0 : index
    %c0_213 = arith.constant 0 : index
    %190 = vector.load %arg14[%c0_212, %c0_213] : memref<32x288xbf16, #tpu.memory_space<vmem>>, vector<32x288xbf16>
    %191 = arith.mulf %189, %190 : vector<32x288xbf16>
    %c0_214 = arith.constant 0 : index
    %c0_215 = arith.constant 0 : index
    %192 = vector.load %arg15[%c0_214, %c0_215] : memref<288x32xbf16, #tpu.memory_space<vmem>>, vector<288x32xbf16>
    %cst_216 = arith.constant dense<0.000000e+00> : vector<32x32xf32>
    %193 = tpu.matmul %191, %192, %cst_216 {dimension_numbers = #tpu.dot_dimension_numbers<[1], [0], [0], [1], [0, 0, 1, 1], [], []>} : vector<32x288xbf16>, vector<288x32xbf16>, vector<32x32xf32> -> vector<32x32xf32>
    %c0_217 = arith.constant 0 : index
    %c0_218 = arith.constant 0 : index
    %194 = vector.load %arg16[%c0_217, %c0_218] : memref<1x32xf32, #tpu.memory_space<vmem>>, vector<1x32xf32>
    %195 = vector.broadcast %194 : vector<1x32xf32> to vector<32x32xf32>
    %196 = arith.addf %193, %195 : vector<32x32xf32>
    %cst_219 = arith.constant 0.000000e+00 : f32
    %197 = vector.broadcast %cst_219 : f32 to vector<32x32xf32>
    %198 = arith.maximumf %196, %197 : vector<32x32xf32>
    %c0_220 = arith.constant 0 : index
    %c0_221 = arith.constant 0 : index
    %199 = vector.load %arg42[%c0_220, %c0_221] : memref<256x64xf32, #tpu.memory_space<vmem>>, vector<32x32xf32>
    tpu.vector_store %arg42[%c0_220, %c0_221], %198 {strides = array<i32>} : memref<256x64xf32, #tpu.memory_space<vmem>>, vector<32x32xf32>,
    %c32_222 = arith.constant 32 : index
    %c0_223 = arith.constant 0 : index
    %200 = vector.load %arg42[%c32_222, %c0_223] : memref<256x64xf32, #tpu.memory_space<vmem>>, vector<32x32xf32>
    tpu.vector_store %arg42[%c32_222, %c0_223], %198 {strides = array<i32>} : memref<256x64xf32, #tpu.memory_space<vmem>>, vector<32x32xf32>,
    %c0_224 = arith.constant 0 : index
    %c0_225 = arith.constant 0 : index
    %201 = vector.load %arg42[%c0_224, %c0_225] : memref<256x64xf32, #tpu.memory_space<vmem>>, vector<32x32xf32>
    %202 = arith.truncf %201 : vector<32x32xf32> to vector<32x32xbf16>
    %c0_226 = arith.constant 0 : index
    %c0_227 = arith.constant 0 : index
    %203 = vector.load %arg43[%c0_226, %c0_227] : memref<128x288xbf16, #tpu.memory_space<vmem>>, vector<32x32xbf16>
    tpu.vector_store %arg43[%c0_226, %c0_227], %202 {strides = array<i32>} : memref<128x288xbf16, #tpu.memory_space<vmem>>, vector<32x32xbf16>,
    %c1_228 = arith.constant 1 : index
    %c0_229 = arith.constant 0 : index
    %204 = vector.load %arg42[%c1_228, %c0_229] : memref<256x64xf32, #tpu.memory_space<vmem>>, vector<32x32xf32>
    %205 = arith.truncf %204 : vector<32x32xf32> to vector<32x32xbf16>
    %c0_230 = arith.constant 0 : index
    %c32_231 = arith.constant 32 : index
    %206 = vector.load %arg43[%c0_230, %c32_231] : memref<128x288xbf16, #tpu.memory_space<vmem>>, vector<32x32xbf16>
    tpu.vector_store %arg43[%c0_230, %c32_231], %205 {strides = array<i32>} : memref<128x288xbf16, #tpu.memory_space<vmem>>, vector<32x32xbf16>,
    %c2_232 = arith.constant 2 : index
    %c0_233 = arith.constant 0 : index
    %207 = vector.load %arg42[%c2_232, %c0_233] : memref<256x64xf32, #tpu.memory_space<vmem>>, vector<32x32xf32>
    %208 = arith.truncf %207 : vector<32x32xf32> to vector<32x32xbf16>
    %c0_234 = arith.constant 0 : index
    %c64_235 = arith.constant 64 : index
    %209 = vector.load %arg43[%c0_234, %c64_235] : memref<128x288xbf16, #tpu.memory_space<vmem>>, vector<32x32xbf16>
    tpu.vector_store %arg43[%c0_234, %c64_235], %208 {strides = array<i32>} : memref<128x288xbf16, #tpu.memory_space<vmem>>, vector<32x32xbf16>,
    %c3_236 = arith.constant 3 : index
    %c0_237 = arith.constant 0 : index
    %210 = vector.load %arg42[%c3_236, %c0_237] : memref<256x64xf32, #tpu.memory_space<vmem>>, vector<32x32xf32>
    %211 = arith.truncf %210 : vector<32x32xf32> to vector<32x32xbf16>
    %c0_238 = arith.constant 0 : index
    %c96_239 = arith.constant 96 : index
    %212 = vector.load %arg43[%c0_238, %c96_239] : memref<128x288xbf16, #tpu.memory_space<vmem>>, vector<32x32xbf16>
    tpu.vector_store %arg43[%c0_238, %c96_239], %211 {strides = array<i32>} : memref<128x288xbf16, #tpu.memory_space<vmem>>, vector<32x32xbf16>,
    %c4_240 = arith.constant 4 : index
    %c0_241 = arith.constant 0 : index
    %213 = vector.load %arg42[%c4_240, %c0_241] : memref<256x64xf32, #tpu.memory_space<vmem>>, vector<32x32xf32>
    %214 = arith.truncf %213 : vector<32x32xf32> to vector<32x32xbf16>
    %c0_242 = arith.constant 0 : index
    %c128_243 = arith.constant 128 : index
    %215 = vector.load %arg43[%c0_242, %c128_243] : memref<128x288xbf16, #tpu.memory_space<vmem>>, vector<32x32xbf16>
    tpu.vector_store %arg43[%c0_242, %c128_243], %214 {strides = array<i32>} : memref<128x288xbf16, #tpu.memory_space<vmem>>, vector<32x32xbf16>,
    %c5 = arith.constant 5 : index
    %c0_244 = arith.constant 0 : index
    %216 = vector.load %arg42[%c5, %c0_244] : memref<256x64xf32, #tpu.memory_space<vmem>>, vector<32x32xf32>
    %217 = arith.truncf %216 : vector<32x32xf32> to vector<32x32xbf16>
    %c0_245 = arith.constant 0 : index
    %c160_246 = arith.constant 160 : index
    %218 = vector.load %arg43[%c0_245, %c160_246] : memref<128x288xbf16, #tpu.memory_space<vmem>>, vector<32x32xbf16>
    tpu.vector_store %arg43[%c0_245, %c160_246], %217 {strides = array<i32>} : memref<128x288xbf16, #tpu.memory_space<vmem>>, vector<32x32xbf16>,
    %c6 = arith.constant 6 : index
    %c0_247 = arith.constant 0 : index
    %219 = vector.load %arg42[%c6, %c0_247] : memref<256x64xf32, #tpu.memory_space<vmem>>, vector<32x32xf32>
    %220 = arith.truncf %219 : vector<32x32xf32> to vector<32x32xbf16>
    %c0_248 = arith.constant 0 : index
    %c192_249 = arith.constant 192 : index
    %221 = vector.load %arg43[%c0_248, %c192_249] : memref<128x288xbf16, #tpu.memory_space<vmem>>, vector<32x32xbf16>
    tpu.vector_store %arg43[%c0_248, %c192_249], %220 {strides = array<i32>} : memref<128x288xbf16, #tpu.memory_space<vmem>>, vector<32x32xbf16>,
    %c7_250 = arith.constant 7 : index
    %c0_251 = arith.constant 0 : index
    %222 = vector.load %arg42[%c7_250, %c0_251] : memref<256x64xf32, #tpu.memory_space<vmem>>, vector<32x32xf32>
    %223 = arith.truncf %222 : vector<32x32xf32> to vector<32x32xbf16>
    %c0_252 = arith.constant 0 : index
    %c224_253 = arith.constant 224 : index
    %224 = vector.load %arg43[%c0_252, %c224_253] : memref<128x288xbf16, #tpu.memory_space<vmem>>, vector<32x32xbf16>
    tpu.vector_store %arg43[%c0_252, %c224_253], %223 {strides = array<i32>} : memref<128x288xbf16, #tpu.memory_space<vmem>>, vector<32x32xbf16>,
    %c8_254 = arith.constant 8 : index
    %c0_255 = arith.constant 0 : index
    %225 = vector.load %arg42[%c8_254, %c0_255] : memref<256x64xf32, #tpu.memory_space<vmem>>, vector<32x32xf32>
    %226 = arith.truncf %225 : vector<32x32xf32> to vector<32x32xbf16>
    %c0_256 = arith.constant 0 : index
    %c256_257 = arith.constant 256 : index
    %227 = vector.load %arg43[%c0_256, %c256_257] : memref<128x288xbf16, #tpu.memory_space<vmem>>, vector<32x32xbf16>
    tpu.vector_store %arg43[%c0_256, %c256_257], %226 {strides = array<i32>} : memref<128x288xbf16, #tpu.memory_space<vmem>>, vector<32x32xbf16>,
    %c0_258 = arith.constant 0 : index
    %c0_259 = arith.constant 0 : index
    %228 = vector.load %arg43[%c0_258, %c0_259] : memref<128x288xbf16, #tpu.memory_space<vmem>>, vector<32x288xbf16>
    %c0_260 = arith.constant 0 : index
    %c0_261 = arith.constant 0 : index
    %229 = vector.load %arg17[%c0_260, %c0_261] : memref<32x288xbf16, #tpu.memory_space<vmem>>, vector<32x288xbf16>
    %230 = arith.mulf %228, %229 : vector<32x288xbf16>
    %c0_262 = arith.constant 0 : index
    %c0_263 = arith.constant 0 : index
    %231 = vector.load %arg18[%c0_262, %c0_263] : memref<288x64xbf16, #tpu.memory_space<vmem>>, vector<288x64xbf16>
    %cst_264 = arith.constant dense<0.000000e+00> : vector<32x64xf32>
    %232 = tpu.matmul %230, %231, %cst_264 {dimension_numbers = #tpu.dot_dimension_numbers<[1], [0], [0], [1], [0, 0, 1, 1], [], []>} : vector<32x288xbf16>, vector<288x64xbf16>, vector<32x64xf32> -> vector<32x64xf32>
    %c0_265 = arith.constant 0 : index
    %c0_266 = arith.constant 0 : index
    %233 = vector.load %arg19[%c0_265, %c0_266] : memref<1x64xf32, #tpu.memory_space<vmem>>, vector<1x64xf32>
    %234 = vector.broadcast %233 : vector<1x64xf32> to vector<32x64xf32>
    %235 = arith.addf %232, %234 : vector<32x64xf32>
    %cst_267 = arith.constant 0.000000e+00 : f32
    %236 = vector.broadcast %cst_267 : f32 to vector<32x64xf32>
    %237 = arith.maximumf %235, %236 : vector<32x64xf32>
    %c0_268 = arith.constant 0 : index
    %c0_269 = arith.constant 0 : index
    %238 = vector.load %arg20[%c0_268, %c0_269] : memref<16x32xbf16, #tpu.memory_space<vmem>>, vector<16x32xbf16>
    %239 = arith.truncf %237 : vector<32x64xf32> to vector<32x64xbf16>
    %cst_270 = arith.constant dense<0.000000e+00> : vector<16x64xf32>
    %240 = tpu.matmul %238, %239, %cst_270 {dimension_numbers = #tpu.dot_dimension_numbers<[1], [0], [0], [1], [0, 0, 1, 1], [], []>} : vector<16x32xbf16>, vector<32x64xbf16>, vector<16x64xf32> -> vector<16x64xf32>
    %c0_271 = arith.constant 0 : index
    %c0_272 = arith.constant 0 : index
    %241 = vector.load %arg21[%c0_271, %c0_272] : memref<16x16xbf16, #tpu.memory_space<vmem>>, vector<16x16xbf16>
    %242 = arith.truncf %240 : vector<16x64xf32> to vector<16x64xbf16>
    %cst_273 = arith.constant dense<0.000000e+00> : vector<16x64xf32>
    %243 = tpu.matmul %241, %242, %cst_273 {dimension_numbers = #tpu.dot_dimension_numbers<[1], [0], [0], [1], [0, 0, 1, 1], [], []>} : vector<16x16xbf16>, vector<16x64xbf16>, vector<16x64xf32> -> vector<16x64xf32>
    %c0_274 = arith.constant 0 : index
    %c0_275 = arith.constant 0 : index
    %244 = vector.load %arg42[%c0_274, %c0_275] : memref<256x64xf32, #tpu.memory_space<vmem>>, vector<16x64xf32>
    tpu.vector_store %arg42[%c0_274, %c0_275], %243 {strides = array<i32>} : memref<256x64xf32, #tpu.memory_space<vmem>>, vector<16x64xf32>,
    %c16_276 = arith.constant 16 : index
    %c0_277 = arith.constant 0 : index
    %245 = vector.load %arg42[%c16_276, %c0_277] : memref<256x64xf32, #tpu.memory_space<vmem>>, vector<16x64xf32>
    tpu.vector_store %arg42[%c16_276, %c0_277], %243 {strides = array<i32>} : memref<256x64xf32, #tpu.memory_space<vmem>>, vector<16x64xf32>,
    %c0_278 = arith.constant 0 : index
    %c0_279 = arith.constant 0 : index
    %246 = vector.load %arg42[%c0_278, %c0_279] : memref<256x64xf32, #tpu.memory_space<vmem>>, vector<16x64xf32>
    %247 = arith.truncf %246 : vector<16x64xf32> to vector<16x64xbf16>
    %c0_280 = arith.constant 0 : index
    %c0_281 = arith.constant 0 : index
    %248 = vector.load %arg43[%c0_280, %c0_281] : memref<128x288xbf16, #tpu.memory_space<vmem>>, vector<16x64xbf16>
    tpu.vector_store %arg43[%c0_280, %c0_281], %247 {strides = array<i32>} : memref<128x288xbf16, #tpu.memory_space<vmem>>, vector<16x64xbf16>,
    %c1_282 = arith.constant 1 : index
    %c0_283 = arith.constant 0 : index
    %249 = vector.load %arg42[%c1_282, %c0_283] : memref<256x64xf32, #tpu.memory_space<vmem>>, vector<16x64xf32>
    %250 = arith.truncf %249 : vector<16x64xf32> to vector<16x64xbf16>
    %c0_284 = arith.constant 0 : index
    %c64_285 = arith.constant 64 : index
    %251 = vector.load %arg43[%c0_284, %c64_285] : memref<128x288xbf16, #tpu.memory_space<vmem>>, vector<16x64xbf16>
    tpu.vector_store %arg43[%c0_284, %c64_285], %250 {strides = array<i32>} : memref<128x288xbf16, #tpu.memory_space<vmem>>, vector<16x64xbf16>,
    %c2_286 = arith.constant 2 : index
    %c0_287 = arith.constant 0 : index
    %252 = vector.load %arg42[%c2_286, %c0_287] : memref<256x64xf32, #tpu.memory_space<vmem>>, vector<16x64xf32>
    %253 = arith.truncf %252 : vector<16x64xf32> to vector<16x64xbf16>
    %c0_288 = arith.constant 0 : index
    %c128_289 = arith.constant 128 : index
    %254 = vector.load %arg43[%c0_288, %c128_289] : memref<128x288xbf16, #tpu.memory_space<vmem>>, vector<16x64xbf16>
    tpu.vector_store %arg43[%c0_288, %c128_289], %253 {strides = array<i32>} : memref<128x288xbf16, #tpu.memory_space<vmem>>, vector<16x64xbf16>,
    %c3_290 = arith.constant 3 : index
    %c0_291 = arith.constant 0 : index
    %255 = vector.load %arg42[%c3_290, %c0_291] : memref<256x64xf32, #tpu.memory_space<vmem>>, vector<16x64xf32>
    %256 = arith.truncf %255 : vector<16x64xf32> to vector<16x64xbf16>
    %c0_292 = arith.constant 0 : index
    %c192_293 = arith.constant 192 : index
    %257 = vector.load %arg43[%c0_292, %c192_293] : memref<128x288xbf16, #tpu.memory_space<vmem>>, vector<16x64xbf16>
    tpu.vector_store %arg43[%c0_292, %c192_293], %256 {strides = array<i32>} : memref<128x288xbf16, #tpu.memory_space<vmem>>, vector<16x64xbf16>,
    %c0_294 = arith.constant 0 : index
    %c0_295 = arith.constant 0 : index
    %258 = vector.load %arg43[%c0_294, %c0_295] : memref<128x288xbf16, #tpu.memory_space<vmem>>, vector<16x256xbf16>
    %c0_296 = arith.constant 0 : index
    %c0_297 = arith.constant 0 : index
    %259 = vector.load %arg22[%c0_296, %c0_297] : memref<16x256xbf16, #tpu.memory_space<vmem>>, vector<16x256xbf16>
    %260 = arith.mulf %258, %259 : vector<16x256xbf16>
    %c0_298 = arith.constant 0 : index
    %c0_299 = arith.constant 0 : index
    %261 = vector.load %arg23[%c0_298, %c0_299] : memref<256x64xbf16, #tpu.memory_space<vmem>>, vector<256x64xbf16>
    %cst_300 = arith.constant dense<0.000000e+00> : vector<16x64xf32>
    %262 = tpu.matmul %260, %261, %cst_300 {dimension_numbers = #tpu.dot_dimension_numbers<[1], [0], [0], [1], [0, 0, 1, 1], [], []>} : vector<16x256xbf16>, vector<256x64xbf16>, vector<16x64xf32> -> vector<16x64xf32>
    %c0_301 = arith.constant 0 : index
    %c0_302 = arith.constant 0 : index
    %263 = vector.load %arg24[%c0_301, %c0_302] : memref<1x64xf32, #tpu.memory_space<vmem>>, vector<1x64xf32>
    %264 = vector.broadcast %263 : vector<1x64xf32> to vector<16x64xf32>
    %265 = arith.addf %262, %264 : vector<16x64xf32>
    %cst_303 = arith.constant 0.000000e+00 : f32
    %266 = vector.broadcast %cst_303 : f32 to vector<16x64xf32>
    %267 = arith.maximumf %265, %266 : vector<16x64xf32>
    %c0_304 = arith.constant 0 : index
    %c0_305 = arith.constant 0 : index
    %268 = vector.load %arg25[%c0_304, %c0_305] : memref<32x16xbf16, #tpu.memory_space<vmem>>, vector<32x16xbf16>
    %269 = arith.truncf %267 : vector<16x64xf32> to vector<16x64xbf16>
    %cst_306 = arith.constant dense<0.000000e+00> : vector<32x64xf32>
    %270 = tpu.matmul %268, %269, %cst_306 {dimension_numbers = #tpu.dot_dimension_numbers<[1], [0], [0], [1], [0, 0, 1, 1], [], []>} : vector<32x16xbf16>, vector<16x64xbf16>, vector<32x64xf32> -> vector<32x64xf32>
    %c0_307 = arith.constant 0 : index
    %c0_308 = arith.constant 0 : index
    %271 = vector.load %arg42[%c0_307, %c0_308] : memref<256x64xf32, #tpu.memory_space<vmem>>, vector<32x64xf32>
    tpu.vector_store %arg42[%c0_307, %c0_308], %270 {strides = array<i32>} : memref<256x64xf32, #tpu.memory_space<vmem>>, vector<32x64xf32>,
    %c32_309 = arith.constant 32 : index
    %c0_310 = arith.constant 0 : index
    %272 = vector.load %arg42[%c32_309, %c0_310] : memref<256x64xf32, #tpu.memory_space<vmem>>, vector<32x64xf32>
    tpu.vector_store %arg42[%c32_309, %c0_310], %270 {strides = array<i32>} : memref<256x64xf32, #tpu.memory_space<vmem>>, vector<32x64xf32>,
    %c0_311 = arith.constant 0 : index
    %c0_312 = arith.constant 0 : index
    %273 = vector.load %arg42[%c0_311, %c0_312] : memref<256x64xf32, #tpu.memory_space<vmem>>, vector<32x64xf32>
    %274 = arith.truncf %273 : vector<32x64xf32> to vector<32x64xbf16>
    %c0_313 = arith.constant 0 : index
    %c0_314 = arith.constant 0 : index
    %275 = vector.load %arg43[%c0_313, %c0_314] : memref<128x288xbf16, #tpu.memory_space<vmem>>, vector<32x64xbf16>
    tpu.vector_store %arg43[%c0_313, %c0_314], %274 {strides = array<i32>} : memref<128x288xbf16, #tpu.memory_space<vmem>>, vector<32x64xbf16>,
    %c1_315 = arith.constant 1 : index
    %c0_316 = arith.constant 0 : index
    %276 = vector.load %arg42[%c1_315, %c0_316] : memref<256x64xf32, #tpu.memory_space<vmem>>, vector<32x64xf32>
    %277 = arith.truncf %276 : vector<32x64xf32> to vector<32x64xbf16>
    %c0_317 = arith.constant 0 : index
    %c64_318 = arith.constant 64 : index
    %278 = vector.load %arg43[%c0_317, %c64_318] : memref<128x288xbf16, #tpu.memory_space<vmem>>, vector<32x64xbf16>
    tpu.vector_store %arg43[%c0_317, %c64_318], %277 {strides = array<i32>} : memref<128x288xbf16, #tpu.memory_space<vmem>>, vector<32x64xbf16>,
    %c3_319 = arith.constant 3 : index
    %c0_320 = arith.constant 0 : index
    %279 = vector.load %arg42[%c3_319, %c0_320] : memref<256x64xf32, #tpu.memory_space<vmem>>, vector<32x64xf32>
    %280 = arith.truncf %279 : vector<32x64xf32> to vector<32x64xbf16>
    %c0_321 = arith.constant 0 : index
    %c128_322 = arith.constant 128 : index
    %281 = vector.load %arg43[%c0_321, %c128_322] : memref<128x288xbf16, #tpu.memory_space<vmem>>, vector<32x64xbf16>
    tpu.vector_store %arg43[%c0_321, %c128_322], %280 {strides = array<i32>} : memref<128x288xbf16, #tpu.memory_space<vmem>>, vector<32x64xbf16>,
    %c4_323 = arith.constant 4 : index
    %c0_324 = arith.constant 0 : index
    %282 = vector.load %arg42[%c4_323, %c0_324] : memref<256x64xf32, #tpu.memory_space<vmem>>, vector<32x64xf32>
    %283 = arith.truncf %282 : vector<32x64xf32> to vector<32x64xbf16>
    %c0_325 = arith.constant 0 : index
    %c192_326 = arith.constant 192 : index
    %284 = vector.load %arg43[%c0_325, %c192_326] : memref<128x288xbf16, #tpu.memory_space<vmem>>, vector<32x64xbf16>
    tpu.vector_store %arg43[%c0_325, %c192_326], %283 {strides = array<i32>} : memref<128x288xbf16, #tpu.memory_space<vmem>>, vector<32x64xbf16>,
    %c0_327 = arith.constant 0 : index
    %c0_328 = arith.constant 0 : index
    %285 = vector.load %arg43[%c0_327, %c0_328] : memref<128x288xbf16, #tpu.memory_space<vmem>>, vector<32x256xbf16>
    %c0_329 = arith.constant 0 : index
    %c0_330 = arith.constant 0 : index
    %286 = vector.load %arg26[%c0_329, %c0_330] : memref<32x256xbf16, #tpu.memory_space<vmem>>, vector<32x256xbf16>
    %287 = arith.mulf %285, %286 : vector<32x256xbf16>
    %c0_331 = arith.constant 0 : index
    %c0_332 = arith.constant 0 : index
    %288 = vector.load %arg27[%c0_331, %c0_332] : memref<256x64xbf16, #tpu.memory_space<vmem>>, vector<256x64xbf16>
    %cst_333 = arith.constant dense<0.000000e+00> : vector<32x64xf32>
    %289 = tpu.matmul %287, %288, %cst_333 {dimension_numbers = #tpu.dot_dimension_numbers<[1], [0], [0], [1], [0, 0, 1, 1], [], []>} : vector<32x256xbf16>, vector<256x64xbf16>, vector<32x64xf32> -> vector<32x64xf32>
    %c0_334 = arith.constant 0 : index
    %c0_335 = arith.constant 0 : index
    %290 = vector.load %arg28[%c0_334, %c0_335] : memref<1x64xf32, #tpu.memory_space<vmem>>, vector<1x64xf32>
    %291 = vector.broadcast %290 : vector<1x64xf32> to vector<32x64xf32>
    %292 = arith.addf %289, %291 : vector<32x64xf32>
    %cst_336 = arith.constant 0.000000e+00 : f32
    %293 = vector.broadcast %cst_336 : f32 to vector<32x64xf32>
    %294 = arith.maximumf %292, %293 : vector<32x64xf32>
    %c0_337 = arith.constant 0 : index
    %c0_338 = arith.constant 0 : index
    %295 = vector.load %arg42[%c0_337, %c0_338] : memref<256x64xf32, #tpu.memory_space<vmem>>, vector<32x64xf32>
    tpu.vector_store %arg42[%c0_337, %c0_338], %294 {strides = array<i32>} : memref<256x64xf32, #tpu.memory_space<vmem>>, vector<32x64xf32>,
    %c32_339 = arith.constant 32 : index
    %c0_340 = arith.constant 0 : index
    %296 = vector.load %arg42[%c32_339, %c0_340] : memref<256x64xf32, #tpu.memory_space<vmem>>, vector<32x64xf32>
    tpu.vector_store %arg42[%c32_339, %c0_340], %294 {strides = array<i32>} : memref<256x64xf32, #tpu.memory_space<vmem>>, vector<32x64xf32>,
    %c0_341 = arith.constant 0 : index
    %c0_342 = arith.constant 0 : index
    %297 = vector.load %arg42[%c0_341, %c0_342] : memref<256x64xf32, #tpu.memory_space<vmem>>, vector<32x64xf32>
    %298 = arith.truncf %297 : vector<32x64xf32> to vector<32x64xbf16>
    %c0_343 = arith.constant 0 : index
    %c0_344 = arith.constant 0 : index
    %299 = vector.load %arg43[%c0_343, %c0_344] : memref<128x288xbf16, #tpu.memory_space<vmem>>, vector<32x64xbf16>
    tpu.vector_store %arg43[%c0_343, %c0_344], %298 {strides = array<i32>} : memref<128x288xbf16, #tpu.memory_space<vmem>>, vector<32x64xbf16>,
    %c1_345 = arith.constant 1 : index
    %c0_346 = arith.constant 0 : index
    %300 = vector.load %arg42[%c1_345, %c0_346] : memref<256x64xf32, #tpu.memory_space<vmem>>, vector<32x64xf32>
    %301 = arith.truncf %300 : vector<32x64xf32> to vector<32x64xbf16>
    %c0_347 = arith.constant 0 : index
    %c64_348 = arith.constant 64 : index
    %302 = vector.load %arg43[%c0_347, %c64_348] : memref<128x288xbf16, #tpu.memory_space<vmem>>, vector<32x64xbf16>
    tpu.vector_store %arg43[%c0_347, %c64_348], %301 {strides = array<i32>} : memref<128x288xbf16, #tpu.memory_space<vmem>>, vector<32x64xbf16>,
    %c3_349 = arith.constant 3 : index
    %c0_350 = arith.constant 0 : index
    %303 = vector.load %arg42[%c3_349, %c0_350] : memref<256x64xf32, #tpu.memory_space<vmem>>, vector<32x64xf32>
    %304 = arith.truncf %303 : vector<32x64xf32> to vector<32x64xbf16>
    %c0_351 = arith.constant 0 : index
    %c128_352 = arith.constant 128 : index
    %305 = vector.load %arg43[%c0_351, %c128_352] : memref<128x288xbf16, #tpu.memory_space<vmem>>, vector<32x64xbf16>
    tpu.vector_store %arg43[%c0_351, %c128_352], %304 {strides = array<i32>} : memref<128x288xbf16, #tpu.memory_space<vmem>>, vector<32x64xbf16>,
    %c4_353 = arith.constant 4 : index
    %c0_354 = arith.constant 0 : index
    %306 = vector.load %arg42[%c4_353, %c0_354] : memref<256x64xf32, #tpu.memory_space<vmem>>, vector<32x64xf32>
    %307 = arith.truncf %306 : vector<32x64xf32> to vector<32x64xbf16>
    %c0_355 = arith.constant 0 : index
    %c192_356 = arith.constant 192 : index
    %308 = vector.load %arg43[%c0_355, %c192_356] : memref<128x288xbf16, #tpu.memory_space<vmem>>, vector<32x64xbf16>
    tpu.vector_store %arg43[%c0_355, %c192_356], %307 {strides = array<i32>} : memref<128x288xbf16, #tpu.memory_space<vmem>>, vector<32x64xbf16>,
    %c0_357 = arith.constant 0 : index
    %c0_358 = arith.constant 0 : index
    %309 = vector.load %arg43[%c0_357, %c0_358] : memref<128x288xbf16, #tpu.memory_space<vmem>>, vector<32x256xbf16>
    %c0_359 = arith.constant 0 : index
    %c0_360 = arith.constant 0 : index
    %310 = vector.load %arg29[%c0_359, %c0_360] : memref<32x256xbf16, #tpu.memory_space<vmem>>, vector<32x256xbf16>
    %311 = arith.mulf %309, %310 : vector<32x256xbf16>
    %c0_361 = arith.constant 0 : index
    %c0_362 = arith.constant 0 : index
    %312 = vector.load %arg30[%c0_361, %c0_362] : memref<256x128xbf16, #tpu.memory_space<vmem>>, vector<256x128xbf16>
    %cst_363 = arith.constant dense<0.000000e+00> : vector<32x128xf32>
    %313 = tpu.matmul %311, %312, %cst_363 {dimension_numbers = #tpu.dot_dimension_numbers<[1], [0], [0], [1], [0, 0, 1, 1], [], []>} : vector<32x256xbf16>, vector<256x128xbf16>, vector<32x128xf32> -> vector<32x128xf32>
    %c0_364 = arith.constant 0 : index
    %c0_365 = arith.constant 0 : index
    %314 = vector.load %arg31[%c0_364, %c0_365] : memref<1x128xf32, #tpu.memory_space<vmem>>, vector<1x128xf32>
    %315 = vector.broadcast %314 : vector<1x128xf32> to vector<32x128xf32>
    %316 = arith.addf %313, %315 : vector<32x128xf32>
    %cst_366 = arith.constant 0.000000e+00 : f32
    %317 = vector.broadcast %cst_366 : f32 to vector<32x128xf32>
    %318 = arith.maximumf %316, %317 : vector<32x128xf32>
    %c0_367 = arith.constant 0 : index
    %c0_368 = arith.constant 0 : index
    %319 = vector.load %arg32[%c0_367, %c0_368] : memref<16x32xbf16, #tpu.memory_space<vmem>>, vector<16x32xbf16>
    %320 = arith.truncf %318 : vector<32x128xf32> to vector<32x128xbf16>
    %cst_369 = arith.constant dense<0.000000e+00> : vector<16x128xf32>
    %321 = tpu.matmul %319, %320, %cst_369 {dimension_numbers = #tpu.dot_dimension_numbers<[1], [0], [0], [1], [0, 0, 1, 1], [], []>} : vector<16x32xbf16>, vector<32x128xbf16>, vector<16x128xf32> -> vector<16x128xf32>
    %322 = arith.truncf %321 : vector<16x128xf32> to vector<16x128xbf16>
    %c0_370 = arith.constant 0 : index
    %c0_371 = arith.constant 0 : index
    %323 = vector.load %arg33[%c0_370, %c0_371] : memref<128x128xbf16, #tpu.memory_space<vmem>>, vector<128x128xbf16>
    %cst_372 = arith.constant dense<0.000000e+00> : vector<16x128xf32>
    %324 = tpu.matmul %322, %323, %cst_372 {dimension_numbers = #tpu.dot_dimension_numbers<[1], [0], [0], [1], [0, 0, 1, 1], [], []>} : vector<16x128xbf16>, vector<128x128xbf16>, vector<16x128xf32> -> vector<16x128xf32>
    %c0_373 = arith.constant 0 : index
    %c0_374 = arith.constant 0 : index
    %325 = vector.load %arg34[%c0_373, %c0_374] : memref<1x128xf32, #tpu.memory_space<vmem>>, vector<1x128xf32>
    %326 = vector.broadcast %325 : vector<1x128xf32> to vector<16x128xf32>
    %327 = arith.addf %324, %326 : vector<16x128xf32>
    %cst_375 = arith.constant 0.000000e+00 : f32
    %328 = vector.broadcast %cst_375 : f32 to vector<16x128xf32>
    %329 = arith.maximumf %327, %328 : vector<16x128xf32>
    %330 = arith.truncf %329 : vector<16x128xf32> to vector<16x128xbf16>
    %c0_376 = arith.constant 0 : index
    %c0_377 = arith.constant 0 : index
    %331 = vector.load %arg35[%c0_376, %c0_377] : memref<128x128xbf16, #tpu.memory_space<vmem>>, vector<128x128xbf16>
    %cst_378 = arith.constant dense<0.000000e+00> : vector<16x128xf32>
    %332 = tpu.matmul %330, %331, %cst_378 {dimension_numbers = #tpu.dot_dimension_numbers<[1], [0], [0], [1], [0, 0, 1, 1], [], []>} : vector<16x128xbf16>, vector<128x128xbf16>, vector<16x128xf32> -> vector<16x128xf32>
    %c0_379 = arith.constant 0 : index
    %c0_380 = arith.constant 0 : index
    %333 = vector.load %arg36[%c0_379, %c0_380] : memref<1x128xf32, #tpu.memory_space<vmem>>, vector<1x128xf32>
    %334 = vector.broadcast %333 : vector<1x128xf32> to vector<16x128xf32>
    %335 = arith.addf %332, %334 : vector<16x128xf32>
    %cst_381 = arith.constant 0.000000e+00 : f32
    %336 = vector.broadcast %cst_381 : f32 to vector<16x128xf32>
    %337 = arith.maximumf %335, %336 : vector<16x128xf32>
    %338 = arith.truncf %337 : vector<16x128xf32> to vector<16x128xbf16>
    %c0_382 = arith.constant 0 : index
    %c0_383 = arith.constant 0 : index
    %339 = vector.load %arg37[%c0_382, %c0_383] : memref<128x128xbf16, #tpu.memory_space<vmem>>, vector<128x128xbf16>
    %cst_384 = arith.constant dense<0.000000e+00> : vector<16x128xf32>
    %340 = tpu.matmul %338, %339, %cst_384 {dimension_numbers = #tpu.dot_dimension_numbers<[1], [0], [0], [1], [0, 0, 1, 1], [], []>} : vector<16x128xbf16>, vector<128x128xbf16>, vector<16x128xf32> -> vector<16x128xf32>
    %c0_385 = arith.constant 0 : index
    %c0_386 = arith.constant 0 : index
    %341 = vector.load %arg38[%c0_385, %c0_386] : memref<1x128xf32, #tpu.memory_space<vmem>>, vector<1x128xf32>
    %342 = vector.broadcast %341 : vector<1x128xf32> to vector<16x128xf32>
    %343 = arith.addf %340, %342 : vector<16x128xf32>
    %cst_387 = arith.constant 0.000000e+00 : f32
    %344 = vector.broadcast %cst_387 : f32 to vector<16x128xf32>
    %345 = arith.maximumf %343, %344 : vector<16x128xf32>
    %c0_388 = arith.constant 0 : index
    %c0_389 = arith.constant 0 : index
    %346 = vector.load %arg39[%c0_388, %c0_389] : memref<1x128xf32, #tpu.memory_space<vmem>>, vector<1x128xf32>
    %347 = vector.broadcast %346 : vector<1x128xf32> to vector<16x128xf32>
    %348 = arith.mulf %345, %347 : vector<16x128xf32>
    %cst_390 = arith.constant dense<0.000000e+00> : vector<16xf32>
    %349 = vector.multi_reduction <add>, %348, %cst_390 [1] : vector<16x128xf32> to vector<16xf32>
    %350 = vector.shape_cast %349 : vector<16xf32> to vector<16x1xf32>
    %c0_391 = arith.constant 0 : index
    %c0_392 = arith.constant 0 : index
    %351 = vector.load %arg40[%c0_391, %c0_392] : memref<1x1xf32, #tpu.memory_space<vmem>>, vector<1x1xf32>
    %352 = vector.broadcast %351 : vector<1x1xf32> to vector<16x1xf32>
    %353 = arith.addf %350, %352 : vector<16x1xf32>
    %354 = math.tanh %353 : vector<16x1xf32>
    %c0_393 = arith.constant 0 : index
    %c0_394 = arith.constant 0 : index
    %355 = vector.load %arg41[%c0_393, %c0_394] : memref<16x1xf32, #tpu.memory_space<vmem>>, vector<16x1xf32>
    tpu.vector_store %arg41[%c0_393, %c0_394], %354 {strides = array<i32>} : memref<16x1xf32, #tpu.memory_space<vmem>>, vector<16x1xf32>,
    return
  }
}

</mosaic_0001>

<bundles_post_ra>
// kernel: net_forward.1
= control target key start
LH: loop header
LB: loop body
LE: loop exit
PB: predicated region body
PF: predicated region fallthrough
CT: control target
= control target key end

     0   :  { %vm189_vm0 = vcmask 64512   ;;  %s6597_s6 = smov 8   ;;  %s6598_s10 = smov 16   ;;  %vm922_vm1 = vcmask 1043456   ;;  %vm310_vm2 = vcmask 130112   ;;  %vm375_vm3 = vcmask 195712   ;;  %s8091_s0 = inlined_call_operand.smem [shape: u32[42], index: -1, kind: input, shape index: {}] }
   0x1   :  { %s6655_s5 = sld [smem:[%s8091_s0]]   ;;  %s6599_s11 = smov 24   ;;  %vm440_vm4 = vcmask 261312   ;;  %vm505_vm5 = vcmask 326912   ;;  %vm570_vm6 = vcmask 392512   ;;  %vm635_vm7 = vcmask 458112  }
   0x2   :  { %s6661_s9 = sld [smem:[%s8091_s0 + %s6597_s6]]   ;;  %s6600_s12 = smov 32   ;;  %vm700_vm8 = vcmask 523712   ;;  %vm765_vm9 = vcmask 589312   ;;  %vm897_vm10 = vcmask 588800   ;;  %vm1039_vm11 = vcmask 130048  }
   0x3   :  { %s6601_s13 = smov 40   ;;  %s6602_s14 = smov 48   ;;  %vm1160_vm12 = vcmask 261248   ;;  %vm1225_vm13 = vcmask 392448   ;;  %vm1290_vm14 = vcmask 523648   ;;  %vm1355_vm15 = vcmask 654848  }
   0x4   :  { %s6603_s15 = smov 2   ;;  %s6604_s19 = smov 56  }
   0x5   :  { %s6754_s18 = sld [smem:[%s8091_s0 + %s6603_s15]]   ;;  %s6605_s20 = smov 1  }
   0x6   :  { %s6765_s23 = sld [smem:[%s8091_s0 + %s6605_s20]]   ;;  %s6606_s24 = smov 64  }
   0x7   :  { %v173_v0 = vld [vmem:[%s6655_s5] sm:$0xff]  ;;  %v188_v1 = vld [vmem:[%s6655_s5 + $0x78] sm:$0xff]  ;;  %v174_v2 = vld [vmem:[%s6655_s5 + $0x8] sm:$0xff]  ;;  %s6607_s25 = smov 4   ;;  %s6608_s29 = smov 3  }
   0x8   :  { %205 = vst.msk [vmem:[#allocation2 + $0x78] sm:$0xff] %vm189_vm0, %v188_v1  ;;  %206 = vst.msk [vmem:[#allocation2 + $0x80] sm:$0xff] %vm189_vm0, %v173_v0  ;;  %v175_v3 = vld [vmem:[%s6655_s5 + $0x10] sm:$0xff]  ;;  %v176_v4 = vld [vmem:[%s6655_s5 + $0x18] sm:$0xff]  ;;  %s6927_s28 = sld [smem:[%s8091_s0 + %s6607_s25]]   ;;  %s6609_s3 = smov 80  }
   0x9   :  { %221 = vst.msk [vmem:[#allocation2 + $0xf8] sm:$0xff] %vm189_vm0, %v188_v1  ;;  %190 = vst.msk [vmem:[#allocation2] sm:$0xff] %vm189_vm0, %v173_v0  ;;  %v177_v5 = vld [vmem:[%s6655_s5 + $0x20] sm:$0xff]  ;;  %v178_v6 = vld [vmem:[%s6655_s5 + $0x28] sm:$0xff]  ;;  %s5599_s2 = sld [smem:[%s8091_s0 + %s6608_s29]]   ;;  %s6610_s4 = smov 96  }
   0xa   :  { %207 = vst.msk [vmem:[#allocation2 + $0x88] sm:$0xff] %vm189_vm0, %v174_v2  ;;  %191 = vst.msk [vmem:[#allocation2 + $0x8] sm:$0xff] %vm189_vm0, %v174_v2  ;;  %v179_v7 = vld [vmem:[%s6655_s5 + $0x30] sm:$0xff]  ;;  %v180_v8 = vld [vmem:[%s6655_s5 + $0x38] sm:$0xff]  ;;  %s6614_s16 = smov 7   ;;  %s6615_s20 = smov 6  }
   0xb   :  { %208 = vst.msk [vmem:[#allocation2 + $0x90] sm:$0xff] %vm189_vm0, %v175_v3  ;;  %192 = vst.msk [vmem:[#allocation2 + $0x10] sm:$0xff] %vm189_vm0, %v175_v3  ;;  %v181_v9 = vld [vmem:[%s6655_s5 + $0x40] sm:$0xff]  ;;  %v182_v10 = vld [vmem:[%s6655_s5 + $0x48] sm:$0xff]  ;;  %s6617_s27 = smov 9   ;;  %s6618_s1 = smov 12  }
   0xc   :  { %209 = vst.msk [vmem:[#allocation2 + $0x98] sm:$0xff] %vm189_vm0, %v176_v4  ;;  %193 = vst.msk [vmem:[#allocation2 + $0x18] sm:$0xff] %vm189_vm0, %v176_v4  ;;  %v183_v11 = vld [vmem:[%s6655_s5 + $0x50] sm:$0xff]  ;;  %v184_v12 = vld [vmem:[%s6655_s5 + $0x58] sm:$0xff]  ;;  %s5605_s30 = sld [smem:[%s8091_s0 + %s6617_s27]]   ;;  %s6623_s27 = smov 18  }
   0xd   :  { %194 = vst.msk [vmem:[#allocation2 + $0x20] sm:$0xff] %vm189_vm0, %v177_v5  ;;  %210 = vst.msk [vmem:[#allocation2 + $0xa0] sm:$0xff] %vm189_vm0, %v177_v5  ;;  %v185_v13 = vld [vmem:[%s6655_s5 + $0x60] sm:$0xff]  ;;  %v186_v14 = vld [vmem:[%s6655_s5 + $0x68] sm:$0xff]  ;;  %s5612_s8 = sld [smem:[%s8091_s0 + %s6598_s10]]   ;;  %s6628_s17 = smov 19  }
   0xe   :  { %195 = vst.msk [vmem:[#allocation2 + $0x28] sm:$0xff] %vm189_vm0, %v178_v6  ;;  %211 = vst.msk [vmem:[#allocation2 + $0xa8] sm:$0xff] %vm189_vm0, %v178_v6  ;;  %v187_v15 = vld [vmem:[%s6655_s5 + $0x70] sm:$0xff]  ;;  %s6611_s5 = smov 112   ;;  %s6629_s21 = smov 21  }
   0xf   :  { %212 = vst.msk [vmem:[#allocation2 + $0xb0] sm:$0xff] %vm189_vm0, %v179_v7  ;;  %196 = vst.msk [vmem:[#allocation2 + $0x30] sm:$0xff] %vm189_vm0, %v179_v7  ;;  %v6711_v16 = vld [vmem:[#allocation2 + $0x78] sm:$0xff]  ;;  %v255_v17 = vld [vmem:[#allocation2 + $0x80] sm:$0xff]  ;;  %s6645_s7 = smov 39  }
  0x10   :  { %213 = vst.msk [vmem:[#allocation2 + $0xb8] sm:$0xff] %vm189_vm0, %v180_v8  ;;  %197 = vst.msk [vmem:[#allocation2 + $0x38] sm:$0xff] %vm189_vm0, %v180_v8  ;;  %v6713_v18 = vld [vmem:[#allocation2 + $0x79] sm:$0xff]  ;;  %v6716_v19 = vpack.c.bf16 %v255_v17, %v6711_v16 }
  0x11   :  { %198 = vst.msk [vmem:[#allocation2 + $0x40] sm:$0xff] %vm189_vm0, %v181_v9  ;;  %214 = vst.msk [vmem:[#allocation2 + $0xc0] sm:$0xff] %vm189_vm0, %v181_v9  ;;  %v320_v20 = vld [vmem:[#allocation2 + $0x81] sm:$0xff] }
  0x12   :  { %199 = vst.msk [vmem:[#allocation2 + $0x48] sm:$0xff] %vm189_vm0, %v182_v10  ;;  %215 = vst.msk [vmem:[#allocation2 + $0xc8] sm:$0xff] %vm189_vm0, %v182_v10  ;;  %v256_v21 = vld [vmem:[#allocation2 + $0x88] sm:$0xff]  ;;  %v257_v22 = vld [vmem:[#allocation2 + $0x90] sm:$0xff]  ;;  %v6719_v23 = vpack.c.bf16 %v320_v20, %v6713_v18  ;;  %286 = vrot.lane.b32.xlu0 %v6716_v19, %s6597_s6 }
  0x13   :  { %216 = vst.msk [vmem:[#allocation2 + $0xd0] sm:$0xff] %vm189_vm0, %v183_v11  ;;  %200 = vst.msk [vmem:[#allocation2 + $0x50] sm:$0xff] %vm189_vm0, %v183_v11  ;;  %v321_v24 = vld [vmem:[#allocation2 + $0x89] sm:$0xff]  ;;  %v322_v25 = vld [vmem:[#allocation2 + $0x91] sm:$0xff]  ;;  %v271_v26 = vpack.c.bf16 %v257_v22, %v256_v21 }
  0x14   :  { %217 = vst.msk [vmem:[#allocation2 + $0xd8] sm:$0xff] %vm189_vm0, %v184_v12  ;;  %201 = vst.msk [vmem:[#allocation2 + $0x58] sm:$0xff] %vm189_vm0, %v184_v12  ;;  %v385_v27 = vld [vmem:[#allocation2 + $0x87] sm:$0xff]  ;;  %v386_v28 = vld [vmem:[#allocation2 + $0x8f] sm:$0xff]  ;;  %351 = vrot.lane.b32.xlu1 %v6719_v23, %s6598_s10  ;;  %v336_v29 = vpack.c.bf16 %v322_v25, %v321_v24 }
  0x15   :  { %202 = vst.msk [vmem:[#allocation2 + $0x60] sm:$0xff] %vm189_vm0, %v185_v13  ;;  %218 = vst.msk [vmem:[#allocation2 + $0xe0] sm:$0xff] %vm189_vm0, %v185_v13  ;;  %v6725_v30 = vld [vmem:[#allocation2 + $0x7f] sm:$0xff]  ;;  %v239_v31 = vpack.c.bf16 %v386_v28, %v385_v27  ;;  %v387_v32 = vld [vmem:[#allocation2 + $0x97] sm:$0xff] }
  0x16   :  { %203 = vst.msk [vmem:[#allocation2 + $0x68] sm:$0xff] %vm189_vm0, %v186_v14  ;;  %219 = vst.msk [vmem:[#allocation2 + $0xe8] sm:$0xff] %vm189_vm0, %v186_v14  ;;  %288 = vrot.lane.b32.xlu0 %v271_v26, %s6597_s6  ;;  %v400_v33 = vpack.c.bf16 %v385_v27, %v6725_v30  ;;  %v401_v34 = vpack.c.bf16 %v387_v32, %v386_v28  ;;  %v449_v35 = vld [vmem:[#allocation2] sm:$0xff]  ;;  %v450_v36 = vld [vmem:[#allocation2 + $0x8] sm:$0xff] }
  0x17   :  { %220 = vst.msk [vmem:[#allocation2 + $0xf0] sm:$0xff] %vm189_vm0, %v187_v15  ;;  %204 = vst.msk [vmem:[#allocation2 + $0x70] sm:$0xff] %vm189_vm0, %v187_v15  ;;  %v451_v37 = vld [vmem:[#allocation2 + $0x10] sm:$0xff]  ;;  %v452_v38 = vld [vmem:[#allocation2 + $0x18] sm:$0xff]  ;;  %v465_v39 = vpack.c.bf16 %v450_v36, %v449_v35 }
  0x18   :  { %247 = vst.msk [vmem:[#allocation3 + $0x18] sm:$0xff] %vm189_vm0, %v239_v31  ;;  %353 = vrot.lane.b32.xlu1 %v336_v29, %s6598_s10  ;;  %v514_v40 = vld [vmem:[#allocation2 + $0x1] sm:$0xff]  ;;  %v466_v41 = vpack.c.bf16 %v452_v38, %v451_v37  ;;  %v515_v42 = vld [vmem:[#allocation2 + $0x9] sm:$0xff]  ;;  %v516_v43 = vld [vmem:[#allocation2 + $0x11] sm:$0xff]  ;;  %v660_v59 = vpack.c.bf16 %v451_v37, %v450_v36 }
  0x19   :  { %v517_v44 = vld [vmem:[#allocation2 + $0x19] sm:$0xff]  ;;  %v530_v45 = vpack.c.bf16 %v515_v42, %v514_v40  ;;  %v579_v47 = vld [vmem:[#allocation2 + $0x7] sm:$0xff]  ;;  %v580_v48 = vld [vmem:[#allocation2 + $0xf] sm:$0xff]  ;;  %v725_v63 = vpack.c.bf16 %v516_v43, %v515_v42 }
  0x1a   :  { %416 = vrot.lane.b32.xlu0 %v400_v33, %s6599_s11  ;;  %v6734_v46 = vld [vmem:[#allocation2 + $0x9f] sm:$0xff]  ;;  %v531_v49 = vpack.c.bf16 %v517_v44, %v516_v43  ;;  %v581_v51 = vld [vmem:[#allocation2 + $0x17] sm:$0xff]  ;;  %v595_v53 = vpack.c.bf16 %v580_v48, %v579_v47  ;;  %v6740_v54 = vld [vmem:[#allocation2 + $0xa7] sm:$0xff] }
  0x1b   :  { %v240_v50 = vpack.c.bf16 %v6734_v46, %v387_v32  ;;  %v582_v52 = vld [vmem:[#allocation2 + $0x1f] sm:$0xff]  ;;  %v6742_v55 = vld [vmem:[#allocation2 + $0xaf] sm:$0xff]  ;;  %v391_v20 = vld [vmem:[#allocation2 + $0xb7] sm:$0xff]  ;;  %v402_v24 = vpack.c.bf16 %v6740_v54, %v6734_v46 }
  0x1c   :  { %418 = vrot.lane.b32.xlu1 %v401_v34, %s6599_s11  ;;  %v596_v56 = vpack.c.bf16 %v582_v52, %v581_v51  ;;  %v241_v57 = vpack.c.bf16 %v6742_v55, %v6740_v54  ;;  %v6747_v58 = vld [vmem:[#allocation2 + $0x20] sm:$0xff]  ;;  %v258_v61 = vld [vmem:[#allocation2 + $0x98] sm:$0xff]  ;;  %v260_v2 = vld [vmem:[#allocation2 + $0xa8] sm:$0xff]  ;;  %v403_v27 = vpack.c.bf16 %v391_v20, %v6742_v55 }
  0x1d   :  { %248 = vst.msk [vmem:[#allocation3 + $0x30] sm:$0xff] %vm189_vm0, %v240_v50  ;;  %v661_v60 = vpack.c.bf16 %v6747_v58, %v452_v38  ;;  %v259_v62 = vld [vmem:[#allocation2 + $0xa0] sm:$0xff]  ;;  %v261_v3 = vld [vmem:[#allocation2 + $0xb0] sm:$0xff]  ;;  %v6356_v12 = vld [vmem:[%s6754_s18 + $0x8] sm:$0xff]  }
  0x1e   :  { %481 = vrot.lane.b32.xlu0 %v465_v39, %s6600_s12  ;;  %249 = vst.msk [vmem:[#allocation3 + $0x48] sm:$0xff] %vm189_vm0, %v241_v57  ;;  %v272_v0 = vpack.c.bf16 %v259_v62, %v258_v61  ;;  %v6760_v1 = vld [vmem:[#allocation2 + $0x21] sm:$0xff]  ;;  %v323_v4 = vld [vmem:[#allocation2 + $0x99] sm:$0xff]  ;;  %v325_v8 = vld [vmem:[#allocation2 + $0xa9] sm:$0xff]  ;;  %v273_v11 = vpack.c.bf16 %v261_v3, %v260_v2 }
  0x1f   :  { %v324_v5 = vld [vmem:[#allocation2 + $0xa1] sm:$0xff]  ;;  %v222_v6 = vld [vmem:[#allocation2 + $0x77] sm:$0xff]  ;;  %v726_v7 = vpack.c.bf16 %v6760_v1, %v517_v44  ;;  %v6359_v28 = vld [vmem:[%s6754_s18 + $0x20] ss:$0 sps:$4 sm:$0xff]  }
  0x20   :  { %483 = vrot.lane.b32.xlu1 %v466_v41, %s6600_s12  ;;  %v6770_v9 = vpack.c.bf16 %v6725_v30, %v222_v6  ;;  %v6355_v10 = vld [vmem:[%s6754_s18] sm:$0xff]   ;;  %v326_v13 = vld [vmem:[#allocation2 + $0xb1] sm:$0xff]  ;;  %v337_v14 = vpack.c.bf16 %v324_v5, %v323_v4  ;;  %v454_v22 = vld [vmem:[#allocation2 + $0x28] sm:$0xff]  ;;  %v924_v36 = vsel %vm922_vm1, %v6359_v28, 0 }
  0x21   :  { %6146 = vmatprep.subr.bf16.mxu0 %v6355_v10  ;;  %v6357_v15 = vld [vmem:[%s6754_s18 + $0x10] sm:$0xff]   ;;  %v338_v17 = vpack.c.bf16 %v326_v13, %v325_v8  ;;  %v6358_v21 = vld [vmem:[%s6754_s18 + $0x18] sm:$0xff]   ;;  %v467_v30 = vpack.c.bf16 %v454_v22, %v6747_v58  ;;  %v583_v38 = vld [vmem:[#allocation2 + $0x27] sm:$0xff] }
  0x22   :  { %546 = vrot.lane.b32.xlu0 %v530_v45, %s6601_s13  ;;  %246 = vst.msk [vmem:[#allocation3] sm:$0xff] %vm189_vm0, %v6770_v9  ;;  %6147 = vmatpush3.bf16.msra.mxu0 %v6355_v10  ;;  %v455_v25 = vld [vmem:[#allocation2 + $0x30] sm:$0xff]  ;;  %v456_v26 = vld [vmem:[#allocation2 + $0x38] sm:$0xff]  ;;  %v393_v44 = vld [vmem:[#allocation2 + $0xc7] sm:$0xff] }
  0x23   :  { %6148 = vmatprep.subr.bf16.mxu0 %v6356_v12  ;;  %v519_v29 = vld [vmem:[#allocation2 + $0x29] sm:$0xff]  ;;  %v468_v31 = vpack.c.bf16 %v456_v26, %v455_v25  ;;  %v520_v32 = vld [vmem:[#allocation2 + $0x31] sm:$0xff]  ;;  %v521_v33 = vld [vmem:[#allocation2 + $0x39] sm:$0xff] }
  0x24   :  { %548 = vrot.lane.b32.xlu1 %v531_v49, %s6601_s13  ;;  %v532_v34 = vpack.c.bf16 %v519_v29, %v6760_v1  ;;  %v392_v35 = vld [vmem:[#allocation2 + $0xbf] sm:$0xff]  ;;  %v533_v37 = vpack.c.bf16 %v521_v33, %v520_v32  ;;  %v584_v39 = vld [vmem:[#allocation2 + $0x2f] sm:$0xff]  ;;  %v585_v41 = vld [vmem:[#allocation2 + $0x37] sm:$0xff]  ;;  %v662_v49 = vpack.c.bf16 %v455_v25, %v454_v22 }
  0x25   :  { %v242_v40 = vpack.c.bf16 %v392_v35, %v391_v20  ;;  %v586_v42 = vld [vmem:[#allocation2 + $0x3f] sm:$0xff]  ;;  %v597_v43 = vpack.c.bf16 %v584_v39, %v583_v38  ;;  %v394_v45 = vld [vmem:[#allocation2 + $0xcf] sm:$0xff]  ;;  %v395_v2 = vld [vmem:[#allocation2 + $0xd7] sm:$0xff]  ;;  %v404_v3 = vpack.c.bf16 %v393_v44, %v392_v35 }
  0x26   :  { %611 = vrot.lane.b32.xlu0 %v595_v53, %s6602_s14  ;;  %6149 = vmatpush3.bf16.msra.mxu0 %v6356_v12  ;;  %v598_v46 = vpack.c.bf16 %v586_v42, %v585_v41  ;;  %v243_v47 = vpack.c.bf16 %v394_v45, %v393_v44  ;;  %v651_v48 = vld [vmem:[#allocation2 + $0x40] sm:$0xff]  ;;  %v262_v51 = vld [vmem:[#allocation2 + $0xb8] sm:$0xff]  ;;  %v727_v53 = vpack.c.bf16 %v520_v32, %v519_v29  ;;  %v265_v57 = vld [vmem:[#allocation2 + $0xd0] sm:$0xff] }
  0x27   :  { %6150 = vmatprep.subr.bf16.mxu0 %v6357_v15  ;;  %250 = vst.msk [vmem:[#allocation3 + $0x60] sm:$0xff] %vm189_vm0, %v242_v40  ;;  %v663_v50 = vpack.c.bf16 %v651_v48, %v456_v26  ;;  %v263_v52 = vld [vmem:[#allocation2 + $0xc0] sm:$0xff]  ;;  %v329_v62 = vld [vmem:[#allocation2 + $0xc9] sm:$0xff]  ;;  %v405_v4 = vpack.c.bf16 %v395_v2, %v394_v45  ;;  %v524_v12 = vld [vmem:[#allocation2 + $0x51] sm:$0xff] }
  0x28   :  { %613 = vrot.lane.b32.xlu1 %v596_v56, %s6602_s14  ;;  %251 = vst.msk [vmem:[#allocation3 + $0x78] sm:$0xff] %vm189_vm0, %v243_v47  ;;  %v274_v54 = vpack.c.bf16 %v263_v52, %v262_v51  ;;  %v716_v55 = vld [vmem:[#allocation2 + $0x41] sm:$0xff]  ;;  %v459_v6 = vld [vmem:[#allocation2 + $0x50] sm:$0xff]  ;;  %v525_v13 = vld [vmem:[#allocation2 + $0x59] sm:$0xff] }
  0x29   :  { %v264_v56 = vld [vmem:[#allocation2 + $0xc8] sm:$0xff]  ;;  %v728_v58 = vpack.c.bf16 %v716_v55, %v521_v33  ;;  %v590_v25 = vld [vmem:[#allocation2 + $0x5f] sm:$0xff]  ;;  %v269_v40 = vld [vmem:[#allocation2 + $0xf0] sm:$0xff] }
  0x2a   :  { %676 = vrot.lane.b32.xlu0 %v660_v59, %s6604_s19  ;;  %6151 = vmatpush3.bf16.msra.mxu0 %v6357_v15  ;;  %v275_v59 = vpack.c.bf16 %v265_v57, %v264_v56  ;;  %v328_v61 = vld [vmem:[#allocation2 + $0xc1] sm:$0xff]  ;;  %v333_v45 = vld [vmem:[#allocation2 + $0xe9] sm:$0xff]  ;;  %v528_v57 = vld [vmem:[#allocation2 + $0x71] sm:$0xff] }
  0x2b   :  { %6152 = vmatprep.subr.bf16.mxu0 %v6358_v21  ;;  %v458_v5 = vld [vmem:[#allocation2 + $0x48] sm:$0xff]  ;;  %v396_v15 = vld [vmem:[#allocation2 + $0xdf] sm:$0xff] }
  0x2c   :  { %678 = vrot.lane.b32.xlu1 %v661_v60, %s6604_s19  ;;  %v327_v60 = vld [vmem:[#allocation2 + $0xb9] sm:$0xff]  ;;  %v469_v8 = vpack.c.bf16 %v458_v5, %v651_v48  ;;  %v587_v20 = vld [vmem:[#allocation2 + $0x47] sm:$0xff]  ;;  %v244_v22 = vpack.c.bf16 %v396_v15, %v395_v2  ;;  %v664_v32 = vpack.c.bf16 %v459_v6, %v458_v5 }
  0x2d   :  { %v267_v35 = vld [vmem:[#allocation2 + $0xe0] sm:$0xff]  ;;  %v268_v39 = vld [vmem:[#allocation2 + $0xe8] sm:$0xff] }
  0x2e   :  { %741 = vrot.lane.b32.xlu0 %v725_v63, %s6606_s24  ;;  %6153 = vmatpush3.bf16.msra.mxu0 %v6358_v21  ;;  %v330_v63 = vld [vmem:[#allocation2 + $0xd1] sm:$0xff]  ;;  %252 = vst.msk [vmem:[#allocation3 + $0x90] sm:$0xff] %vm189_vm0, %v244_v22  ;;  %v720_v38 = vld [vmem:[#allocation2 + $0x61] sm:$0xff]  ;;  %v277_v42 = vpack.c.bf16 %v269_v40, %v268_v39  ;;  %v527_v56 = vld [vmem:[#allocation2 + $0x69] sm:$0xff] }
  0x2f   :  { %6304 = vmatprep.subr.msk.bf16.mxu0 %vm922_vm1, %v6359_v28  ;;  %v340_v1 = vpack.c.bf16 %v330_v63, %v329_v62  ;;  %v588_v21 = vld [vmem:[#allocation2 + $0x4f] sm:$0xff]  ;;  %v730_v41 = vpack.c.bf16 %v720_v38, %v525_v13  ;;  %v332_v44 = vld [vmem:[#allocation2 + $0xe1] sm:$0xff]  ;;  %v731_v2 = vpack.c.bf16 %v528_v57, %v527_v56  ;;  %vm1485_vm1 = vcmask 917248  }
  0x30   :  { %290 = vrot.lane.b32.xlu1 %v272_v0, %s6597_s6  ;;  %v339_v0 = vpack.c.bf16 %v328_v61, %v327_v60  ;;  %v599_v26 = vpack.c.bf16 %v588_v21, %v587_v20  ;;  %v398_v28 = vld [vmem:[#allocation2 + $0xef] sm:$0xff]  ;;  %v591_v60 = vld [vmem:[#allocation2 + $0x67] sm:$0xff] }
  0x31   :  { %v462_v52 = vld [vmem:[#allocation2 + $0x68] sm:$0xff] }
  0x32   :  { %743 = vrot.lane.b32.xlu0 %v726_v7, %s6606_s24  ;;  %6155 = vmatpush3.bf16.msra.mxu0 %v924_v36  ;;  %v460_v7 = vld [vmem:[#allocation2 + $0x58] sm:$0xff]  ;;  %v592_v61 = vld [vmem:[#allocation2 + $0x6f] sm:$0xff] }
  0x33   :  { %v470_v10 = vpack.c.bf16 %v460_v7, %v459_v6  ;;  %v601_v62 = vpack.c.bf16 %v592_v61, %v591_v60 }
  0x34   :  { %292 = vrot.lane.b32.xlu1 %v273_v11, %s6597_s6  ;;  %v523_v11 = vld [vmem:[#allocation2 + $0x49] sm:$0xff] }
  0x35   :  { %v729_v36 = vpack.c.bf16 %v524_v12, %v523_v11 }
  0x36   :  { %355 = vrot.lane.b32.xlu0 %v337_v14, %s6598_s10  ;;  %v534_v14 = vpack.c.bf16 %v523_v11, %v716_v55 }
  0x38   :  { %357 = vrot.lane.b32.xlu1 %v338_v17, %s6598_s10  ;;  %v535_v17 = vpack.c.bf16 %v525_v13, %v524_v12 }
  0x3a   :  { %420 = vrot.lane.b32.xlu0 %v402_v24, %s6599_s11  ;;  %v589_v24 = vld [vmem:[#allocation2 + $0x57] sm:$0xff] }
  0x3b   :  { %v600_v29 = vpack.c.bf16 %v590_v25, %v589_v24  ;;  %v6361_v24 = vld [vmem:[%s6765_s23 + $0x8] sm:$0xff]  }
  0x3c   :  { %422 = vrot.lane.b32.xlu1 %v403_v27, %s6599_s11  ;;  %v397_v27 = vld [vmem:[#allocation2 + $0xe7] sm:$0xff] }
  0x3e   :  { %485 = vrot.lane.b32.xlu0 %v467_v30, %s6600_s12  ;;  %v245_v30 = vpack.c.bf16 %v398_v28, %v397_v27 }
  0x40   :  { %487 = vrot.lane.b32.xlu1 %v468_v31, %s6600_s12  ;;  %v655_v31 = vld [vmem:[#allocation2 + $0x60] sm:$0xff]  ;;  %253 = vst.msk [vmem:[#allocation3 + $0xa8] sm:$0xff] %vm189_vm0, %v245_v30  ;;  %vm1420_vm0 = vcmask 786048  }
  0x41   :  { %v665_v33 = vpack.c.bf16 %v655_v31, %v460_v7 }
  0x42   :  { %550 = vrot.lane.b32.xlu0 %v532_v34, %s6601_s13  ;;  %v266_v34 = vld [vmem:[#allocation2 + $0xd8] sm:$0xff] }
  0x44   :  { %552 = vrot.lane.b32.xlu1 %v533_v37, %s6601_s13  ;;  %v276_v37 = vpack.c.bf16 %v267_v35, %v266_v34 }
  0x46   :  { %615 = vrot.lane.b32.xlu0 %v597_v43, %s6602_s14  ;;  %v331_v43 = vld [vmem:[#allocation2 + $0xd9] sm:$0xff] }
  0x47   :  { %v341_v47 = vpack.c.bf16 %v332_v44, %v331_v43 }
  0x48   :  { %617 = vrot.lane.b32.xlu1 %v598_v46, %s6602_s14  ;;  %v334_v46 = vld [vmem:[#allocation2 + $0xf1] sm:$0xff] }
  0x49   :  { %v342_v48 = vpack.c.bf16 %v334_v46, %v333_v45  ;;  %v6363_v46 = vld [vmem:[%s6765_s23 + $0x18] sm:$0xff]  }
  0x4a   :  { %680 = vrot.lane.b32.xlu0 %v662_v49, %s6604_s19  ;;  %v399_v49 = vld [vmem:[#allocation2 + $0xf7] sm:$0xff] }
  0x4b   :  { %v407_v51 = vpack.c.bf16 %v399_v49, %v398_v28 }
  0x4c   :  { %682 = vrot.lane.b32.xlu1 %v663_v50, %s6604_s19  ;;  %v406_v50 = vpack.c.bf16 %v397_v27, %v396_v15  ;;  %v6360_v15 = vld [vmem:[%s6765_s23] sm:$0xff]  }
  0x4e   :  { %745 = vrot.lane.b32.xlu0 %v727_v53, %s6606_s24  ;;  %v463_v53 = vld [vmem:[#allocation2 + $0x70] sm:$0xff] }
  0x4f   :  { %v472_v55 = vpack.c.bf16 %v6711_v16, %v463_v53 }
  0x50   :  { %294 = vrot.lane.b32.xlu1 %v274_v54, %s6597_s6  ;;  %v471_v54 = vpack.c.bf16 %v462_v52, %v655_v31 }
  0x52   :  { %747 = vrot.lane.b32.xlu0 %v728_v58, %s6606_s24  ;;  %v536_v58 = vpack.c.bf16 %v527_v56, %v720_v38 }
  0x54   :  { %296 = vrot.lane.b32.xlu1 %v275_v59, %s6597_s6  ;;  %v537_v59 = vpack.c.bf16 %v6713_v18, %v528_v57 }
  0x56   :  { %359 = vrot.lane.b32.xlu0 %v339_v0, %s6598_s10  ;;  %v666_v0 = vpack.c.bf16 %v463_v53, %v462_v52 }
  0x58   :  { %361 = vrot.lane.b32.xlu1 %v340_v1, %s6598_s10 }
  0x5a   :  { %424 = vrot.lane.b32.xlu0 %v404_v3, %s6599_s11 }
  0x5c   :  { %426 = vrot.lane.b32.xlu1 %v405_v4, %s6599_s11 }
  0x5e   :  { %489 = vrot.lane.b32.xlu0 %v469_v8, %s6600_s12 }
  0x60   :  { %491 = vrot.lane.b32.xlu1 %v470_v10, %s6600_s12 }
  0x62   :  { %554 = vrot.lane.b32.xlu0 %v534_v14, %s6601_s13 }
  0x64   :  { %556 = vrot.lane.b32.xlu1 %v535_v17, %s6601_s13 }
  0x66   :  { %619 = vrot.lane.b32.xlu0 %v599_v26, %s6602_s14 }
  0x68   :  { %621 = vrot.lane.b32.xlu1 %v600_v29, %s6602_s14 }
  0x6a   :  { %684 = vrot.lane.b32.xlu0 %v664_v32, %s6604_s19 }
  0x6c   :  { %686 = vrot.lane.b32.xlu1 %v665_v33, %s6604_s19 }
  0x6e   :  { %749 = vrot.lane.b32.xlu0 %v729_v36, %s6606_s24 }
  0x70   :  { %298 = vrot.lane.b32.xlu1 %v276_v37, %s6597_s6 }
  0x72   :  { %751 = vrot.lane.b32.xlu0 %v730_v41, %s6606_s24  ;;  %v6362_v41 = vld [vmem:[%s6765_s23 + $0x10] sm:$0xff]  }
  0x74   :  { %300 = vrot.lane.b32.xlu1 %v277_v42, %s6597_s6  ;;  %s6613_s6 = smov 5  }
  0x75   :  { %s7006_s15 = sld [smem:[%s8091_s0 + %s6613_s6]]   ;;  %s6619_s6 = smov 11  }
  0x76   :  { %363 = vrot.lane.b32.xlu0 %v341_v47, %s6598_s10 }
  0x78   :  { %365 = vrot.lane.b32.xlu1 %v342_v48, %s6598_s10 }
  0x7a   :  { %428 = vrot.lane.b32.xlu0 %v406_v50, %s6599_s11 }
  0x7c   :  { %430 = vrot.lane.b32.xlu1 %v407_v51, %s6599_s11 }
  0x7e   :  { %493 = vrot.lane.b32.xlu0 %v471_v54, %s6600_s12 }
  0x80   :  { %495 = vrot.lane.b32.xlu1 %v472_v55, %s6600_s12 }
  0x82   :  { %558 = vrot.lane.b32.xlu0 %v536_v58, %s6601_s13 }
  0x84   :  { %560 = vrot.lane.b32.xlu1 %v537_v59, %s6601_s13  ;;  %v287_v63 = vpop.permute.xlu0 %286 }
  0x85   :  { %311 = vst.msk [vmem:[#allocation3] sm:$0xff] %vm310_vm2, %v287_v63  ;;  %v6364_v63 = vld [vmem:[%s6765_s23 + $0x20] sm:$0xff]  }
  0x86   :  { %v352_v16 = vpop.permute.xlu1 %351  ;;  %623 = vrot.lane.b32.xlu0 %v601_v62, %s6602_s14 }
  0x87   :  { %376 = vst.msk [vmem:[#allocation3] sm:$0xff] %vm375_vm3, %v352_v16 }
  0x88   :  { %625 = vrot.lane.b32.xlu1 %v6770_v9, %s6602_s14  ;;  %v289_v18 = vpop.permute.xlu0 %288 }
  0x89   :  { %312 = vst.msk [vmem:[#allocation3 + $0x18] sm:$0xff] %vm310_vm2, %v289_v18 }
  0x8a   :  { %v354_v1 = vpop.permute.xlu1 %353  ;;  %688 = vrot.lane.b32.xlu0 %v666_v0, %s6604_s19 }
  0x8b   :  { %377 = vst.msk [vmem:[#allocation3 + $0x18] sm:$0xff] %vm375_vm3, %v354_v1 }
  0x8c   :  { %690 = vrot.lane.b32.xlu1 %v6716_v19, %s6604_s19  ;;  %v417_v3 = vpop.permute.xlu0 %416  ;;  %s7279_s19 = sld [smem:[%s8091_s0 + %s6614_s16]]   ;;  %s6620_s16 = smov 15  }
  0x8d   :  { %441 = vst.msk [vmem:[#allocation3] sm:$0xff] %vm440_vm4, %v417_v3 }
  0x8e   :  { %v419_v4 = vpop.permute.xlu1 %418  ;;  %753 = vrot.lane.b32.xlu0 %v731_v2, %s6606_s24  ;;  %v6365_v2 = vld [vmem:[%s6765_s23 + $0x28] sm:$0xff]  }
  0x8f   :  { %442 = vst.msk [vmem:[#allocation3 + $0x18] sm:$0xff] %vm440_vm4, %v419_v4 }
  0x90   :  { %755 = vrot.lane.b32.xlu1 %v6719_v23, %s6606_s24  ;;  %v482_v9 = vpop.permute.xlu0 %481 }
  0x91   :  { %506 = vst.msk [vmem:[#allocation3] sm:$0xff] %vm505_vm5, %v482_v9 }
  0x92   :  { %v484_v5 = vpop.permute.xlu1 %483 }
  0x93   :  { %507 = vst.msk [vmem:[#allocation3 + $0x18] sm:$0xff] %vm505_vm5, %v484_v5 }
  0x94   :  { %v547_v19 = vpop.permute.xlu0 %546 }
  0x95   :  { %571 = vst.msk [vmem:[#allocation3] sm:$0xff] %vm570_vm6, %v547_v19 }
  0x96   :  { %v549_v6 = vpop.permute.xlu1 %548 }
  0x97   :  { %572 = vst.msk [vmem:[#allocation3 + $0x18] sm:$0xff] %vm570_vm6, %v549_v6 }
  0x98   :  { %v612_v7 = vpop.permute.xlu0 %611 }
  0x99   :  { %636 = vst.msk [vmem:[#allocation3] sm:$0xff] %vm635_vm7, %v612_v7 }
  0x9a   :  { %v614_v8 = vpop.permute.xlu1 %613 }
  0x9b   :  { %637 = vst.msk [vmem:[#allocation3 + $0x18] sm:$0xff] %vm635_vm7, %v614_v8 }
  0x9c   :  { %v677_v23 = vpop.permute.xlu0 %676 }
  0x9d   :  { %701 = vst.msk [vmem:[#allocation3] sm:$0xff] %vm700_vm8, %v677_v23 }
  0x9e   :  { %v679_v10 = vpop.permute.xlu1 %678 }
  0x9f   :  { %702 = vst.msk [vmem:[#allocation3 + $0x18] sm:$0xff] %vm700_vm8, %v679_v10 }
  0xa0   :  { %v742_v11 = vpop.permute.xlu0 %741 }
  0xa1   :  { %766 = vst.msk [vmem:[#allocation3] sm:$0xff] %vm765_vm9, %v742_v11 }
  0xa2   :  { %v291_v12 = vpop.permute.xlu1 %290 }
  0xa3   :  { %313 = vst.msk [vmem:[#allocation3 + $0x30] sm:$0xff] %vm310_vm2, %v291_v12 }
  0xa4   :  { %v744_v13 = vpop.permute.xlu0 %743 }
  0xa5   :  { %767 = vst.msk [vmem:[#allocation3 + $0x18] sm:$0xff] %vm765_vm9, %v744_v13 }
  0xa6   :  { %v293_v14 = vpop.permute.xlu1 %292 }
  0xa7   :  { %314 = vst.msk [vmem:[#allocation3 + $0x48] sm:$0xff] %vm310_vm2, %v293_v14 }
  0xa8   :  { %v356_v17 = vpop.permute.xlu0 %355  ;;  %v774_v20 = vld [vmem:[#allocation3] sm:$0xff] }
  0xa9   :  { %378 = vst.msk [vmem:[#allocation3 + $0x30] sm:$0xff] %vm375_vm3, %v356_v17  ;;  %v846_v22 = vmul.bf16 %v6360_v15, %v774_v20  ;;  %v6366_v15 = vld [vmem:[%s6765_s23 + $0x30] sm:$0xff]   ;;  %v6367_v17 = vld [vmem:[%s6765_s23 + $0x38] sm:$0xff]   ;;  %s5602_s23 = sld [smem:[%s8091_s0 + %s6615_s20]]   ;;  %s6621_s20 = smov 14  }
  0xaa   :  { %v358_v21 = vpop.permute.xlu1 %357 }
  0xab   :  { %379 = vst.msk [vmem:[#allocation3 + $0x48] sm:$0xff] %vm375_vm3, %v358_v21  ;;  %6156 = vmatprep.mubr.msk.bf16.mxu0 %vm897_vm10, %v846_v22 }
  0xac   :  { %v421_v25 = vpop.permute.xlu0 %420  ;;  %v775_v26 = vld [vmem:[#allocation3 + $0x18] sm:$0xff] }
  0xad   :  { %443 = vst.msk [vmem:[#allocation3 + $0x30] sm:$0xff] %vm440_vm4, %v421_v25  ;;  %v847_v28 = vmul.bf16 %v6361_v24, %v775_v26  ;;  %v6932_v25 = vld [vmem:[%s5599_s2] ss:$0 sm:$0xff]  ;;  %s6632_s2 = smov 25  }
  0xae   :  { %v423_v27 = vpop.permute.xlu1 %422 }
  0xaf   :  { %444 = vst.msk [vmem:[#allocation3 + $0x48] sm:$0xff] %vm440_vm4, %v423_v27  ;;  %6157 = vmatmul.mubr.msk.bf16.vlgmr.msra.gmra.mrb[0].mxu0 %vm897_vm10, %v847_v28 }
  0xb0   :  { %v486_v29 = vpop.permute.xlu0 %485 }
  0xb1   :  { %508 = vst.msk [vmem:[#allocation3 + $0x30] sm:$0xff] %vm505_vm5, %v486_v29 }
  0xb2   :  { %v488_v30 = vpop.permute.xlu1 %487 }
  0xb3   :  { %509 = vst.msk [vmem:[#allocation3 + $0x48] sm:$0xff] %vm505_vm5, %v488_v30 }
  0xb4   :  { %v551_v31 = vpop.permute.xlu0 %550 }
  0xb5   :  { %573 = vst.msk [vmem:[#allocation3 + $0x30] sm:$0xff] %vm570_vm6, %v551_v31 }
  0xb6   :  { %v553_v32 = vpop.permute.xlu1 %552 }
  0xb7   :  { %574 = vst.msk [vmem:[#allocation3 + $0x48] sm:$0xff] %vm570_vm6, %v553_v32 }
  0xb8   :  { %v616_v33 = vpop.permute.xlu0 %615 }
  0xb9   :  { %638 = vst.msk [vmem:[#allocation3 + $0x30] sm:$0xff] %vm635_vm7, %v616_v33 }
  0xba   :  { %v618_v34 = vpop.permute.xlu1 %617 }
  0xbb   :  { %639 = vst.msk [vmem:[#allocation3 + $0x48] sm:$0xff] %vm635_vm7, %v618_v34 }
  0xbc   :  { %v681_v35 = vpop.permute.xlu0 %680 }
  0xbd   :  { %703 = vst.msk [vmem:[#allocation3 + $0x30] sm:$0xff] %vm700_vm8, %v681_v35 }
  0xbe   :  { %v683_v36 = vpop.permute.xlu1 %682 }
  0xbf   :  { %704 = vst.msk [vmem:[#allocation3 + $0x48] sm:$0xff] %vm700_vm8, %v683_v36 }
  0xc0   :  { %v746_v37 = vpop.permute.xlu0 %745 }
  0xc1   :  { %768 = vst.msk [vmem:[#allocation3 + $0x30] sm:$0xff] %vm765_vm9, %v746_v37 }
  0xc2   :  { %v295_v38 = vpop.permute.xlu1 %294 }
  0xc3   :  { %315 = vst.msk [vmem:[#allocation3 + $0x60] sm:$0xff] %vm310_vm2, %v295_v38 }
  0xc4   :  { %v748_v39 = vpop.permute.xlu0 %747 }
  0xc5   :  { %769 = vst.msk [vmem:[#allocation3 + $0x48] sm:$0xff] %vm765_vm9, %v748_v39 }
  0xc6   :  { %v297_v40 = vpop.permute.xlu1 %296 }
  0xc7   :  { %316 = vst.msk [vmem:[#allocation3 + $0x78] sm:$0xff] %vm310_vm2, %v297_v40 }
  0xc8   :  { %v360_v42 = vpop.permute.xlu0 %359  ;;  %v776_v43 = vld [vmem:[#allocation3 + $0x30] sm:$0xff] }
  0xc9   :  { %380 = vst.msk [vmem:[#allocation3 + $0x60] sm:$0xff] %vm375_vm3, %v360_v42  ;;  %v848_v45 = vmul.bf16 %v6362_v41, %v776_v43 }
  0xca   :  { %v362_v44 = vpop.permute.xlu1 %361 }
  0xcb   :  { %381 = vst.msk [vmem:[#allocation3 + $0x78] sm:$0xff] %vm375_vm3, %v362_v44  ;;  %6160 = vmatprep.mubr.msk.bf16.mxu0 %vm897_vm10, %v848_v45 }
  0xcc   :  { %v425_v47 = vpop.permute.xlu0 %424  ;;  %v777_v48 = vld [vmem:[#allocation3 + $0x48] sm:$0xff] }
  0xcd   :  { %445 = vst.msk [vmem:[#allocation3 + $0x60] sm:$0xff] %vm440_vm4, %v425_v47  ;;  %v849_v50 = vmul.bf16 %v6363_v46, %v777_v48 }
  0xce   :  { %v427_v49 = vpop.permute.xlu1 %426 }
  0xcf   :  { %446 = vst.msk [vmem:[#allocation3 + $0x78] sm:$0xff] %vm440_vm4, %v427_v49  ;;  %6161 = vmatmul.mubr.msk.bf16.gmra.mrb[4].mxu0 %vm897_vm10, %v849_v50 }
  0xd0   :  { %v490_v51 = vpop.permute.xlu0 %489 }
  0xd1   :  { %510 = vst.msk [vmem:[#allocation3 + $0x60] sm:$0xff] %vm505_vm5, %v490_v51 }
  0xd2   :  { %v492_v52 = vpop.permute.xlu1 %491 }
  0xd3   :  { %511 = vst.msk [vmem:[#allocation3 + $0x78] sm:$0xff] %vm505_vm5, %v492_v52 }
  0xd4   :  { %v555_v53 = vpop.permute.xlu0 %554 }
  0xd5   :  { %575 = vst.msk [vmem:[#allocation3 + $0x60] sm:$0xff] %vm570_vm6, %v555_v53 }
  0xd6   :  { %v557_v54 = vpop.permute.xlu1 %556 }
  0xd7   :  { %576 = vst.msk [vmem:[#allocation3 + $0x78] sm:$0xff] %vm570_vm6, %v557_v54 }
  0xd8   :  { %v620_v55 = vpop.permute.xlu0 %619 }
  0xd9   :  { %640 = vst.msk [vmem:[#allocation3 + $0x60] sm:$0xff] %vm635_vm7, %v620_v55 }
  0xda   :  { %v622_v56 = vpop.permute.xlu1 %621 }
  0xdb   :  { %641 = vst.msk [vmem:[#allocation3 + $0x78] sm:$0xff] %vm635_vm7, %v622_v56  ;;  %v6370_v56 = vld [vmem:[%s6927_s28 + $0x4] ss:$8 sps:$4 sm:$0xff]  }
  0xdc   :  { %v685_v57 = vpop.permute.xlu0 %684 }
  0xdd   :  { %705 = vst.msk [vmem:[#allocation3 + $0x60] sm:$0xff] %vm700_vm8, %v685_v57 }
  0xde   :  { %v687_v58 = vpop.permute.xlu1 %686 }
  0xdf   :  { %706 = vst.msk [vmem:[#allocation3 + $0x78] sm:$0xff] %vm700_vm8, %v687_v58 }
  0xe0   :  { %v750_v59 = vpop.permute.xlu0 %749 }
  0xe1   :  { %770 = vst.msk [vmem:[#allocation3 + $0x60] sm:$0xff] %vm765_vm9, %v750_v59 }
  0xe2   :  { %v299_v60 = vpop.permute.xlu1 %298 }
  0xe3   :  { %317 = vst.msk [vmem:[#allocation3 + $0x90] sm:$0xff] %vm310_vm2, %v299_v60 }
  0xe4   :  { %v752_v61 = vpop.permute.xlu0 %751 }
  0xe5   :  { %771 = vst.msk [vmem:[#allocation3 + $0x78] sm:$0xff] %vm765_vm9, %v752_v61 }
  0xe6   :  { %v301_v62 = vpop.permute.xlu1 %300 }
  0xe7   :  { %318 = vst.msk [vmem:[#allocation3 + $0xa8] sm:$0xff] %vm310_vm2, %v301_v62  ;;  %vm1550_vm2 = vcmask 1048448  }
  0xe8   :  { %v364_v16 = vpop.permute.xlu0 %363  ;;  %v778_v0 = vld [vmem:[#allocation3 + $0x60] sm:$0xff] }
  0xe9   :  { %382 = vst.msk [vmem:[#allocation3 + $0x90] sm:$0xff] %vm375_vm3, %v364_v16  ;;  %v850_v1 = vmul.bf16 %v6364_v63, %v778_v0 }
  0xea   :  { %v366_v18 = vpop.permute.xlu1 %365 }
  0xeb   :  { %383 = vst.msk [vmem:[#allocation3 + $0xa8] sm:$0xff] %vm375_vm3, %v366_v18  ;;  %6164 = vmatprep.mubr.msk.bf16.mxu0 %vm897_vm10, %v850_v1  ;;  %vm2896_vm3 = vcmask 261120  }
  0xec   :  { %v429_v3 = vpop.permute.xlu0 %428  ;;  %v779_v4 = vld [vmem:[#allocation3 + $0x78] sm:$0xff] }
  0xed   :  { %447 = vst.msk [vmem:[#allocation3 + $0x90] sm:$0xff] %vm440_vm4, %v429_v3  ;;  %v851_v5 = vmul.bf16 %v6365_v2, %v779_v4 }
  0xee   :  { %v431_v9 = vpop.permute.xlu1 %430 }
  0xef   :  { %448 = vst.msk [vmem:[#allocation3 + $0xa8] sm:$0xff] %vm440_vm4, %v431_v9  ;;  %6165 = vmatmul.mubr.msk.bf16.gmra.mrb[8].mxu0 %vm897_vm10, %v851_v5  ;;  %vm2927_vm4 = vcmask 523520  }
  0xf0   :  { %v494_v19 = vpop.permute.xlu0 %493 }
  0xf1   :  { %512 = vst.msk [vmem:[#allocation3 + $0x90] sm:$0xff] %vm505_vm5, %v494_v19 }
  0xf2   :  { %v496_v6 = vpop.permute.xlu1 %495 }
  0xf3   :  { %513 = vst.msk [vmem:[#allocation3 + $0xa8] sm:$0xff] %vm505_vm5, %v496_v6  ;;  %vm2944_vm5 = vcmask 785920  }
  0xf4   :  { %v559_v7 = vpop.permute.xlu0 %558 }
  0xf5   :  { %577 = vst.msk [vmem:[#allocation3 + $0x90] sm:$0xff] %vm570_vm6, %v559_v7 }
  0xf6   :  { %v561_v8 = vpop.permute.xlu1 %560 }
  0xf7   :  { %578 = vst.msk [vmem:[#allocation3 + $0xa8] sm:$0xff] %vm570_vm6, %v561_v8  ;;  %vm2961_vm6 = vcmask 1048320  }
  0xf8   :  { %v624_v23 = vpop.permute.xlu0 %623 }
  0xf9   :  { %642 = vst.msk [vmem:[#allocation3 + $0x90] sm:$0xff] %vm635_vm7, %v624_v23 }
  0xfa   :  { %v626_v10 = vpop.permute.xlu1 %625 }
  0xfb   :  { %643 = vst.msk [vmem:[#allocation3 + $0xa8] sm:$0xff] %vm635_vm7, %v626_v10  ;;  %vm6626_vm7 = vmmov 0  }
  0xfc   :  { %v689_v11 = vpop.permute.xlu0 %688 }
  0xfd   :  { %707 = vst.msk [vmem:[#allocation3 + $0x90] sm:$0xff] %vm700_vm8, %v689_v11 }
  0xfe   :  { %v691_v12 = vpop.permute.xlu1 %690 }
  0xff   :  { %708 = vst.msk [vmem:[#allocation3 + $0xa8] sm:$0xff] %vm700_vm8, %v691_v12  ;;  %vm4322_vm8 = vcmask 523264  }
 0x100   :  { %v754_v13 = vpop.permute.xlu0 %753 }
 0x101   :  { %772 = vst.msk [vmem:[#allocation3 + $0x90] sm:$0xff] %vm765_vm9, %v754_v13 }
 0x102   :  { %v756_v14 = vpop.permute.xlu1 %755 }
 0x103   :  { %773 = vst.msk [vmem:[#allocation3 + $0xa8] sm:$0xff] %vm765_vm9, %v756_v14  ;;  %vm4338_vm9 = vcmask 1048064  }
 0x108   :  { %v780_v20 = vld [vmem:[#allocation3 + $0x90] sm:$0xff] }
 0x109   :  { %v852_v21 = vmul.bf16 %v6366_v15, %v780_v20 }
 0x10a   :  { %v781_v22 = vld [vmem:[#allocation3 + $0xa8] sm:$0xff] }
 0x10b   :  { %v853_v24 = vmul.bf16 %v6367_v17, %v781_v22  ;;  %6168 = vmatprep.mubr.msk.bf16.mxu0 %vm897_vm10, %v852_v21 }
 0x10d   :  { %6169 = vmatmul.mubr.msk.bf16.gmra.mrb[12].mxu0 %vm897_vm10, %v853_v24  ;;  %vm5590_vm10 = vcmask 7168  }
 0x182   :  { %v6158_v26 = vpop.f32.mrb[0].mxu0 }
 0x183   :  { %v969_v27 = vadd.f32 %v6158_v26, %v6932_v25  ;;  %v960_v28 = vpop.f32.mrb[1].mxu0 }
 0x184   :  { %v961_v29 = vadd.f32 %v6932_v25, %v960_v28  ;;  %v6159_v30 = vpop.f32.mrb[2].mxu0 }
 0x185   :  { %v1025_v31 = vmax.f32 %v969_v27, 0.0  ;;  %v972_v32 = vadd.f32 %v6159_v30, %v6932_v25  ;;  %v963_v33 = vpop.f32.mrb[3].mxu0 }
 0x186   :  { %v1023_v34 = vmax.f32 %v961_v29, 0.0  ;;  %v964_v35 = vadd.f32 %v6932_v25, %v963_v33 }
 0x187   :  { %1042 = vst.msk [vmem:[#allocation2 + $0x10] sm:$0xff] %vm1039_vm11, %v1025_v31  ;;  %1058 = vst.msk [vmem:[#allocation2 + $0x90] sm:$0xff] %vm1039_vm11, %v1025_v31  ;;  %v1026_v36 = vmax.f32 %v972_v32, 0.0 }
 0x188   :  { %1040 = vst.msk [vmem:[#allocation2] sm:$0xff] %vm1039_vm11, %v1023_v34  ;;  %1056 = vst.msk [vmem:[#allocation2 + $0x80] sm:$0xff] %vm1039_vm11, %v1023_v34  ;;  %v1024_v37 = vmax.f32 %v964_v35, 0.0 }
 0x189   :  { %1043 = vst.msk [vmem:[#allocation2 + $0x18] sm:$0xff] %vm1039_vm11, %v1026_v36  ;;  %1059 = vst.msk [vmem:[#allocation2 + $0x98] sm:$0xff] %vm1039_vm11, %v1026_v36 }
 0x18a   :  { %1041 = vst.msk [vmem:[#allocation2 + $0x8] sm:$0xff] %vm1039_vm11, %v1024_v37  ;;  %1057 = vst.msk [vmem:[#allocation2 + $0x88] sm:$0xff] %vm1039_vm11, %v1024_v37 }
 0x18e   :  { %v1301_v38 = vld [vmem:[#allocation2 + $0x10] sm:$0xff] }
 0x18f   :  { %v1299_v42 = vld [vmem:[#allocation2] sm:$0xff]  ;;  %v1107_v58 = vld [vmem:[#allocation2 + $0x90] sm:$0xff] }
 0x190   :  { %v6946_v39 = vld [vmem:[#allocation2 + $0x18] sm:$0xff] }
 0x191   :  { %v6948_v40 = vld [vmem:[#allocation2 + $0x11] sm:$0xff]  ;;  %v1316_v41 = vpack.c.bf16 %v6946_v39, %v1301_v38  ;;  %v1300_v43 = vld [vmem:[#allocation2 + $0x8] sm:$0xff] }
 0x192   :  { %v1559_v44 = vld [vmem:[#allocation2 + $0x9] sm:$0xff]  ;;  %v1315_v45 = vpack.c.bf16 %v1300_v43, %v1299_v42  ;;  %v1364_v46 = vld [vmem:[#allocation2 + $0x1] sm:$0xff]  ;;  %v1510_v57 = vpack.c.bf16 %v1301_v38, %v1300_v43  ;;  %v1172_v61 = vld [vmem:[#allocation2 + $0x91] sm:$0xff] }
 0x193   :  { %v1575_v47 = vpack.c.bf16 %v6948_v40, %v1559_v44  ;;  %1333 = vrot.lane.b32.xlu0 %v1316_v41, %s6606_s24  ;;  %v1429_v48 = vld [vmem:[#allocation2 + $0x7] sm:$0xff]  ;;  %v1430_v49 = vld [vmem:[#allocation2 + $0xf] sm:$0xff]  ;;  %v1380_v51 = vpack.c.bf16 %v1559_v44, %v1364_v46  ;;  %v1237_v63 = vld [vmem:[#allocation2 + $0x97] sm:$0xff] }
 0x194   :  { %v1236_v50 = vld [vmem:[#allocation2 + $0x8f] sm:$0xff]  ;;  %1331 = vrot.lane.b32.xlu1 %v1315_v45, %s6606_s24  ;;  %v6955_v52 = vld [vmem:[#allocation2 + $0x87] sm:$0xff]  ;;  %v1445_v53 = vpack.c.bf16 %v1430_v49, %v1429_v48  ;;  %v1431_v11 = vld [vmem:[#allocation2 + $0x17] sm:$0xff]  ;;  %v6612_v49 = vmov 0  }
 0x195   :  { %1583 = vst.msk [vmem:[#allocation3 + $0x8] sm:$0xff] %vm1039_vm11, %v1575_v47  ;;  %v1089_v54 = vpack.c.bf16 %v1236_v50, %v6955_v52  ;;  %v1106_v55 = vld [vmem:[#allocation2 + $0x88] sm:$0xff]  ;;  %v1251_v18 = vpack.c.bf16 %v1237_v63, %v1236_v50  ;;  %v1108_v27 = vld [vmem:[#allocation2 + $0x98] sm:$0xff]  ;;  %1822 = vmatprep.subr.bf16.mxu1 %v6612_v49  ;;  %2710 = vmatprep.subr.bf16.mxu0 %v6612_v49 }
 0x196   :  { %v1121_v59 = vpack.c.bf16 %v1107_v58, %v1106_v55  ;;  %v1171_v60 = vld [vmem:[#allocation2 + $0x89] sm:$0xff] }
 0x197   :  { %1396 = vrot.lane.b32.xlu0 %v1380_v51, %s6609_s3  ;;  %1097 = vst.msk [vmem:[#allocation3 + $0x18] sm:$0xff] %vm1039_vm11, %v1089_v54  ;;  %v1186_v0 = vpack.c.bf16 %v1172_v61, %v1171_v60 }
 0x198   :  { %1461 = vrot.lane.b32.xlu1 %v1445_v53, %s6610_s4 }
 0x19b   :  { %1526 = vrot.lane.b32.xlu0 %v1510_v57, %s6611_s5 }
 0x19c   :  { %v1592_v62 = vld [vmem:[#allocation3 + $0x8] sm:$0xff]  ;;  %1138 = vrot.lane.b32.xlu1 %v1121_v59, %s6598_s10 }
 0x19d   :  { %v1704_v16 = vmul.bf16 %v6370_v56, %v1592_v62 }
 0x19f   :  { %5686 = vmatprep.mubr.msk.bf16.mxu1 %vm1039_vm11, %v1704_v16  ;;  %1203 = vrot.lane.b32.xlu0 %v1186_v0, %s6600_s12 }
 0x1a0   :  { %1268 = vrot.lane.b32.xlu1 %v1251_v18, %s6602_s14 }
 0x1a2   :  { %v6162_v1 = vpop.f32.mrb[4].mxu0 }
 0x1a3   :  { %v985_v2 = vadd.f32 %v6162_v1, %v6932_v25  ;;  %v976_v3 = vpop.f32.mrb[5].mxu0 }
 0x1a4   :  { %v977_v4 = vadd.f32 %v6932_v25, %v976_v3  ;;  %v6163_v9 = vpop.f32.mrb[6].mxu0  ;;  %v6371_v3 = vld [vmem:[%s7006_s15] sm:$0xff]  }
 0x1a5   :  { %v1029_v5 = vmax.f32 %v985_v2, 0.0  ;;  %v988_v19 = vadd.f32 %v6163_v9, %v6932_v25  ;;  %v979_v6 = vpop.f32.mrb[7].mxu0  ;;  %1823 = vmatpush1.bf16.msra.mxu1 %v6371_v3 }
 0x1a6   :  { %v1027_v7 = vmax.f32 %v977_v4, 0.0  ;;  %v980_v8 = vadd.f32 %v6932_v25, %v979_v6  ;;  %1824 = vmatprep.subr.bf16.mxu1 %v6612_v49  ;;  %v6373_v6 = vld [vmem:[%s7006_s15 + $0x10] sm:$0xff]  }
 0x1a7   :  { %1046 = vst.msk [vmem:[#allocation2 + $0x30] sm:$0xff] %vm1039_vm11, %v1029_v5  ;;  %1062 = vst.msk [vmem:[#allocation2 + $0xb0] sm:$0xff] %vm1039_vm11, %v1029_v5  ;;  %v1030_v23 = vmax.f32 %v988_v19, 0.0  ;;  %v6372_v19 = vld [vmem:[%s7006_s15 + $0x8] sm:$0xff]  }
 0x1a8   :  { %1044 = vst.msk [vmem:[#allocation2 + $0x20] sm:$0xff] %vm1039_vm11, %v1027_v7  ;;  %1060 = vst.msk [vmem:[#allocation2 + $0xa0] sm:$0xff] %vm1039_vm11, %v1027_v7  ;;  %v1028_v10 = vmax.f32 %v980_v8, 0.0 }
 0x1a9   :  { %1047 = vst.msk [vmem:[#allocation2 + $0x38] sm:$0xff] %vm1039_vm11, %v1030_v23  ;;  %1063 = vst.msk [vmem:[#allocation2 + $0xb8] sm:$0xff] %vm1039_vm11, %v1030_v23  ;;  %1825 = vmatpush1.bf16.msra.mxu1 %v6372_v19  ;;  %v6374_v23 = vld [vmem:[%s7006_s15 + $0x18] sm:$0xff]  }
 0x1aa   :  { %1045 = vst.msk [vmem:[#allocation2 + $0x28] sm:$0xff] %vm1039_vm11, %v1028_v10  ;;  %1061 = vst.msk [vmem:[#allocation2 + $0xa8] sm:$0xff] %vm1039_vm11, %v1028_v10  ;;  %1826 = vmatprep.subr.bf16.mxu1 %v6612_v49 }
 0x1ad   :  { %1827 = vmatpush1.bf16.msra.mxu1 %v6373_v6 }
 0x1ae   :  { %v1305_v38 = vld [vmem:[#allocation2 + $0x30] sm:$0xff]  ;;  %1828 = vmatprep.subr.bf16.mxu1 %v6612_v49 }
 0x1af   :  { %v1432_v12 = vld [vmem:[#allocation2 + $0x1f] sm:$0xff]  ;;  %v1111_v55 = vld [vmem:[#allocation2 + $0xb0] sm:$0xff] }
 0x1b0   :  { %v1367_v13 = vld [vmem:[#allocation2 + $0x19] sm:$0xff]  ;;  %v1446_v14 = vpack.c.bf16 %v1432_v12, %v1431_v11  ;;  %v6980_v21 = vld [vmem:[#allocation2 + $0x31] sm:$0xff] }
 0x1b1   :  { %v1381_v15 = vpack.c.bf16 %v1367_v13, %v6948_v40  ;;  %v1109_v17 = vld [vmem:[#allocation2 + $0xa0] sm:$0xff]  ;;  %v1563_v29 = vld [vmem:[#allocation2 + $0x29] sm:$0xff]  ;;  %v6987_v34 = vld [vmem:[#allocation2 + $0x38] sm:$0xff]  ;;  %1829 = vmatpush1.bf16.msra.mxu1 %v6374_v23 }
 0x1b2   :  { %v1497_v20 = vld [vmem:[#allocation2 + $0x20] sm:$0xff]  ;;  %1463 = vrot.lane.b32.xlu0 %v1446_v14, %s6610_s4  ;;  %v1122_v31 = vpack.c.bf16 %v1109_v17, %v1108_v27  ;;  %v1577_v33 = vpack.c.bf16 %v6980_v21, %v1563_v29  ;;  %v6989_v36 = vld [vmem:[#allocation2 + $0xaf] sm:$0xff]  ;;  %v1318_v40 = vpack.c.bf16 %v6987_v34, %v1305_v38  ;;  %v1241_v0 = vld [vmem:[#allocation2 + $0xb7] sm:$0xff]  ;;  %1830 = vmatprep.subr.bf16.mxu1 %v6612_v49 }
 0x1b3   :  { %v1238_v22 = vld [vmem:[#allocation2 + $0x9f] sm:$0xff]  ;;  %1398 = vrot.lane.b32.xlu1 %v1381_v15, %s6609_s3  ;;  %v1239_v28 = vld [vmem:[#allocation2 + $0xa7] sm:$0xff]  ;;  %v1511_v32 = vpack.c.bf16 %v1497_v20, %v6946_v39  ;;  %v1434_v46 = vld [vmem:[#allocation2 + $0x2f] sm:$0xff]  ;;  %v1253_v5 = vpack.c.bf16 %v1241_v0, %v6989_v36 }
 0x1b4   :  { %v1562_v24 = vld [vmem:[#allocation2 + $0x21] sm:$0xff]  ;;  %v1090_v26 = vpack.c.bf16 %v1238_v22, %v1237_v63  ;;  %v1091_v37 = vpack.c.bf16 %v6989_v36, %v1239_v28  ;;  %1585 = vst.msk [vmem:[#allocation3 + $0x38] sm:$0xff] %vm1039_vm11, %v1577_v33  ;;  %v1173_v39 = vld [vmem:[#allocation2 + $0x99] sm:$0xff]  ;;  %v1252_v43 = vpack.c.bf16 %v1239_v28, %v1238_v22  ;;  %v1175_v63 = vld [vmem:[#allocation2 + $0xa9] sm:$0xff] }
 0x1b5   :  { %v1576_v30 = vpack.c.bf16 %v1562_v24, %v1367_v13  ;;  %v1174_v35 = vld [vmem:[#allocation2 + $0xa1] sm:$0xff]  ;;  %v1382_v47 = vpack.c.bf16 %v1563_v29, %v1562_v24  ;;  %v1176_v16 = vld [vmem:[#allocation2 + $0xb1] sm:$0xff] }
 0x1b6   :  { %1098 = vst.msk [vmem:[#allocation3 + $0x30] sm:$0xff] %vm1039_vm11, %v1090_v26  ;;  %1140 = vrot.lane.b32.xlu0 %v1122_v31, %s6598_s10  ;;  %v1187_v41 = vpack.c.bf16 %v1174_v35, %v1173_v39  ;;  %1099 = vst.msk [vmem:[#allocation3 + $0x48] sm:$0xff] %vm1039_vm11, %v1091_v37  ;;  %v1304_v42 = vld [vmem:[#allocation2 + $0x28] sm:$0xff]  ;;  %v1188_v9 = vpack.c.bf16 %v1176_v16, %v1175_v63  ;;  %v6375_v22 = vld [vmem:[%s7006_s15 + $0x20] sm:$0xff]  }
 0x1b7   :  { %1584 = vst.msk [vmem:[#allocation3 + $0x20] sm:$0xff] %vm1039_vm11, %v1576_v30  ;;  %1528 = vrot.lane.b32.xlu1 %v1511_v32, %s6611_s5  ;;  %v1317_v44 = vpack.c.bf16 %v1304_v42, %v1497_v20  ;;  %v1433_v45 = vld [vmem:[#allocation2 + $0x27] sm:$0xff]  ;;  %v1512_v58 = vpack.c.bf16 %v1305_v38, %v1304_v42  ;;  %1831 = vmatpush1.bf16.msra.mxu1 %v6375_v22  ;;  %v1112_v19 = vld [vmem:[#allocation2 + $0xb8] sm:$0xff] }
 0x1b8   :  { %v1447_v48 = vpack.c.bf16 %v1434_v46, %v1433_v45  ;;  %v1110_v50 = vld [vmem:[#allocation2 + $0xa8] sm:$0xff]  ;;  %1832 = vmatprep.subr.bf16.mxu1 %v6612_v49 }
 0x1b9   :  { %v1123_v59 = vpack.c.bf16 %v1111_v55, %v1110_v50  ;;  %v6376_v38 = vld [vmem:[%s7006_s15 + $0x28] sm:$0xff]  }
 0x1ba   :  { %1337 = vrot.lane.b32.xlu0 %v1318_v40, %s6606_s24  ;;  %v1105_v40 = vld [vmem:[#allocation2 + $0x80] sm:$0xff] }
 0x1bb   :  { %1205 = vrot.lane.b32.xlu1 %v1187_v41, %s6600_s12  ;;  %1833 = vmatpush1.bf16.msra.mxu1 %v6376_v38  ;;  %v1170_v42 = vld [vmem:[#allocation2 + $0x81] sm:$0xff] }
 0x1bc   :  { %1834 = vmatprep.subr.bf16.mxu1 %v6612_v49 }
 0x1be   :  { %1270 = vrot.lane.b32.xlu0 %v1252_v43, %s6602_s14 }
 0x1bf   :  { %1335 = vrot.lane.b32.xlu1 %v1317_v44, %s6606_s24 }
 0x1c2   :  { %1400 = vrot.lane.b32.xlu0 %v1382_v47, %s6609_s3  ;;  %v6166_v51 = vpop.f32.mrb[8].mxu0 }
 0x1c3   :  { %1465 = vrot.lane.b32.xlu1 %v1447_v48, %s6610_s4  ;;  %v1001_v53 = vadd.f32 %v6166_v51, %v6932_v25  ;;  %v992_v54 = vpop.f32.mrb[9].mxu0 }
 0x1c4   :  { %v993_v56 = vadd.f32 %v6932_v25, %v992_v54  ;;  %v6167_v57 = vpop.f32.mrb[10].mxu0 }
 0x1c5   :  { %v1033_v60 = vmax.f32 %v1001_v53, 0.0  ;;  %v1004_v61 = vadd.f32 %v6167_v57, %v6932_v25  ;;  %v995_v62 = vpop.f32.mrb[11].mxu0 }
 0x1c6   :  { %v1031_v18 = vmax.f32 %v993_v56, 0.0  ;;  %v996_v1 = vadd.f32 %v6932_v25, %v995_v62  ;;  %1530 = vrot.lane.b32.xlu0 %v1512_v58, %s6611_s5 }
 0x1c7   :  { %1142 = vrot.lane.b32.xlu1 %v1123_v59, %s6598_s10  ;;  %1050 = vst.msk [vmem:[#allocation2 + $0x50] sm:$0xff] %vm1039_vm11, %v1033_v60  ;;  %1066 = vst.msk [vmem:[#allocation2 + $0xd0] sm:$0xff] %vm1039_vm11, %v1033_v60  ;;  %v1034_v2 = vmax.f32 %v1004_v61, 0.0 }
 0x1c8   :  { %1048 = vst.msk [vmem:[#allocation2 + $0x40] sm:$0xff] %vm1039_vm11, %v1031_v18  ;;  %1064 = vst.msk [vmem:[#allocation2 + $0xc0] sm:$0xff] %vm1039_vm11, %v1031_v18  ;;  %v1032_v4 = vmax.f32 %v996_v1, 0.0  ;;  %v6379_v1 = vld [vmem:[%s7006_s15 + $0x40] sm:$0xff]  }
 0x1c9   :  { %1051 = vst.msk [vmem:[#allocation2 + $0x58] sm:$0xff] %vm1039_vm11, %v1034_v2  ;;  %1067 = vst.msk [vmem:[#allocation2 + $0xd8] sm:$0xff] %vm1039_vm11, %v1034_v2 }
 0x1ca   :  { %1049 = vst.msk [vmem:[#allocation2 + $0x48] sm:$0xff] %vm1039_vm11, %v1032_v4  ;;  %1065 = vst.msk [vmem:[#allocation2 + $0xc8] sm:$0xff] %vm1039_vm11, %v1032_v4  ;;  %1207 = vrot.lane.b32.xlu0 %v1188_v9, %s6600_s12 }
 0x1cb   :  { %1272 = vrot.lane.b32.xlu1 %v1253_v5, %s6602_s14 }
 0x1cf   :  { %v7033_v7 = vld [vmem:[#allocation2 + $0xbf] sm:$0xff] }
 0x1d0   :  { %v1092_v10 = vpack.c.bf16 %v7033_v7, %v1241_v0  ;;  %v7039_v11 = vld [vmem:[#allocation2 + $0x39] sm:$0xff]  ;;  %v7053_v20 = vld [vmem:[#allocation2 + $0x51] sm:$0xff] }
 0x1d1   :  { %v7035_v8 = vld [vmem:[#allocation2 + $0xc7] sm:$0xff]  ;;  %v7046_v14 = vld [vmem:[#allocation2 + $0xcf] sm:$0xff]  ;;  %v7086_v46 = vld [vmem:[#allocation2 + $0xd7] sm:$0xff]  ;;  %v1383_v58 = vpack.c.bf16 %v7039_v11, %v6980_v21 }
 0x1d2   :  { %v7041_v12 = vld [vmem:[#allocation2 + $0x41] sm:$0xff]  ;;  %v7044_v13 = vld [vmem:[#allocation2 + $0x49] sm:$0xff]  ;;  %1100 = vst.msk [vmem:[#allocation3 + $0x60] sm:$0xff] %vm1039_vm11, %v1092_v10  ;;  %v1093_v17 = vpack.c.bf16 %v7046_v14, %v7035_v8  ;;  %v6378_v0 = vld [vmem:[%s7006_s15 + $0x38] sm:$0xff]  }
 0x1d3   :  { %v1578_v15 = vpack.c.bf16 %v7041_v12, %v7039_v11  ;;  %v1579_v24 = vpack.c.bf16 %v7053_v20, %v7044_v13  ;;  %v1501_v60 = vld [vmem:[#allocation2 + $0x40] sm:$0xff]  ;;  %v1435_v21 = vld [vmem:[#allocation2 + $0x37] sm:$0xff]  ;;  %v1308_v10 = vld [vmem:[#allocation2 + $0x48] sm:$0xff]  ;;  %v1254_v11 = vpack.c.bf16 %v7035_v8, %v7033_v7 }
 0x1d4   :  { %1101 = vst.msk [vmem:[#allocation3 + $0x78] sm:$0xff] %vm1039_vm11, %v1093_v17  ;;  %v1436_v63 = vld [vmem:[#allocation2 + $0x3f] sm:$0xff]  ;;  %v1513_v2 = vpack.c.bf16 %v1501_v60, %v6987_v34  ;;  %v1319_v34 = vpack.c.bf16 %v1308_v10, %v1501_v60  ;;  %v1438_v17 = vld [vmem:[#allocation2 + $0x4f] sm:$0xff] }
 0x1d5   :  { %1586 = vst.msk [vmem:[#allocation3 + $0x50] sm:$0xff] %vm1039_vm11, %v1578_v15  ;;  %1587 = vst.msk [vmem:[#allocation3 + $0x68] sm:$0xff] %vm1039_vm11, %v1579_v24  ;;  %v1448_v3 = vpack.c.bf16 %v1436_v63, %v1435_v21  ;;  %v1178_v4 = vld [vmem:[#allocation2 + $0xc1] sm:$0xff]  ;;  %v1177_v5 = vld [vmem:[#allocation2 + $0xb9] sm:$0xff]  ;;  %v1384_v24 = vpack.c.bf16 %v7044_v13, %v7041_v12  ;;  %v1255_v13 = vpack.c.bf16 %v7086_v46, %v7046_v14 }
 0x1d6   :  { %v1113_v9 = vld [vmem:[#allocation2 + $0xc0] sm:$0xff]  ;;  %v1189_v6 = vpack.c.bf16 %v1178_v4, %v1177_v5 }
 0x1d7   :  { %v1124_v23 = vpack.c.bf16 %v1113_v9, %v1112_v19  ;;  %v1437_v15 = vld [vmem:[#allocation2 + $0x47] sm:$0xff] }
 0x1d8   :  { %v1449_v22 = vpack.c.bf16 %v1438_v17, %v1437_v15 }
 0x1e0   :  { %v6170_v26 = vpop.f32.mrb[12].mxu0 }
 0x1e1   :  { %v1017_v27 = vadd.f32 %v6170_v26, %v6932_v25  ;;  %v1008_v28 = vpop.f32.mrb[13].mxu0  ;;  %v1114_v26 = vld [vmem:[#allocation2 + $0xc8] sm:$0xff] }
 0x1e2   :  { %v1009_v29 = vadd.f32 %v6932_v25, %v1008_v28  ;;  %v6171_v30 = vpop.f32.mrb[14].mxu0  ;;  %v1115_v28 = vld [vmem:[#allocation2 + $0xd0] sm:$0xff] }
 0x1e3   :  { %v1037_v31 = vmax.f32 %v1017_v27, 0.0  ;;  %v1020_v32 = vadd.f32 %v6171_v30, %v6932_v25  ;;  %v1011_v33 = vpop.f32.mrb[15].mxu0  ;;  %v1125_v7 = vpack.c.bf16 %v1115_v28, %v1114_v26 }
 0x1e4   :  { %v1035_v35 = vmax.f32 %v1009_v29, 0.0  ;;  %v1012_v36 = vadd.f32 %v6932_v25, %v1011_v33  ;;  %v6377_v25 = vld [vmem:[%s7006_s15 + $0x30] sm:$0xff]   ;;  %s7606_s15 = sld [smem:[%s8091_s0 + %s6619_s6]]  }
 0x1e5   :  { %1054 = vst.msk [vmem:[#allocation2 + $0x70] sm:$0xff] %vm1039_vm11, %v1037_v31  ;;  %1070 = vst.msk [vmem:[#allocation2 + $0xf0] sm:$0xff] %vm1039_vm11, %v1037_v31  ;;  %v1038_v37 = vmax.f32 %v1020_v32, 0.0  ;;  %1835 = vmatpush1.bf16.msra.mxu1 %v6377_v25  ;;  %v1503_v29 = vld [vmem:[#allocation2 + $0x50] sm:$0xff]  ;;  %s5621_s6 = sld [smem:[%s8091_s0 + %s6632_s2]]   ;;  %s6644_s2 = smov 38  }
 0x1e6   :  { %1052 = vst.msk [vmem:[#allocation2 + $0x60] sm:$0xff] %vm1039_vm11, %v1035_v35  ;;  %1068 = vst.msk [vmem:[#allocation2 + $0xe0] sm:$0xff] %vm1039_vm11, %v1035_v35  ;;  %v1036_v39 = vmax.f32 %v1012_v36, 0.0  ;;  %1836 = vmatprep.subr.bf16.mxu1 %v6612_v49  ;;  %v1514_v8 = vpack.c.bf16 %v1503_v29, %v1308_v10  ;;  %v1179_v31 = vld [vmem:[#allocation2 + $0xc9] sm:$0xff]  ;;  %v1180_v32 = vld [vmem:[#allocation2 + $0xd1] sm:$0xff] }
 0x1e7   :  { %1071 = vst.msk [vmem:[#allocation2 + $0xf8] sm:$0xff] %vm1039_vm11, %v1038_v37  ;;  %1055 = vst.msk [vmem:[#allocation2 + $0x78] sm:$0xff] %vm1039_vm11, %v1038_v37  ;;  %v1190_v35 = vpack.c.bf16 %v1180_v32, %v1179_v31  ;;  %v1310_v36 = vld [vmem:[#allocation2 + $0x58] sm:$0xff] }
 0x1e8   :  { %1053 = vst.msk [vmem:[#allocation2 + $0x68] sm:$0xff] %vm1039_vm11, %v1036_v39  ;;  %1069 = vst.msk [vmem:[#allocation2 + $0xe8] sm:$0xff] %vm1039_vm11, %v1036_v39  ;;  %v1320_v39 = vpack.c.bf16 %v1310_v36, %v1503_v29 }
 0x1e9   :  { %1837 = vmatpush1.bf16.msra.mxu1 %v6378_v0 }
 0x1ea   :  { %1838 = vmatprep.subr.bf16.mxu1 %v6612_v49 }
 0x1ec   :  { %v1313_v60 = vld [vmem:[#allocation2 + $0x70] sm:$0xff] }
 0x1ed   :  { %v7088_v47 = vld [vmem:[#allocation2 + $0x59] sm:$0xff]  ;;  %1839 = vmatpush1.bf16.msra.mxu1 %v6379_v1 }
 0x1ee   :  { %v7078_v41 = vld [vmem:[#allocation2 + $0x79] sm:$0xff]  ;;  %v7091_v50 = vld [vmem:[#allocation2 + $0x71] sm:$0xff]  ;;  %v1385_v25 = vpack.c.bf16 %v7088_v47, %v7053_v20 }
 0x1ef   :  { %v7080_v43 = vld [vmem:[#allocation2 + $0x78] sm:$0xff]  ;;  %v1185_v44 = vpack.c.bf16 %v1170_v42, %v7078_v41  ;;  %v7098_v53 = vld [vmem:[#allocation2 + $0xe7] sm:$0xff]  ;;  %v7112_v61 = vld [vmem:[#allocation2 + $0xef] sm:$0xff] }
 0x1f0   :  { %v7084_v45 = vpack.c.bf16 %v1105_v40, %v7080_v43  ;;  %v1234_v48 = vld [vmem:[#allocation2 + $0x7f] sm:$0xff]  ;;  %v7102_v55 = vld [vmem:[#allocation2 + $0x69] sm:$0xff]  ;;  %v1443_v16 = vld [vmem:[#allocation2 + $0x77] sm:$0xff]  ;;  %v1095_v18 = vpack.c.bf16 %v7112_v61, %v7098_v53  ;;  %v1322_v63 = vpack.c.bf16 %v7080_v43, %v1313_v60 }
 0x1f1   :  { %v7093_v51 = vld [vmem:[#allocation2 + $0xdf] sm:$0xff]  ;;  %1201 = vrot.lane.b32.xlu1 %v1185_v44, %s6600_s12  ;;  %1590 = vst.msk [vmem:[#allocation3 + $0xb0] sm:$0xff] %vm1039_vm11, %v1185_v44  ;;  %v1250_v59 = vpack.c.bf16 %v6955_v52, %v1234_v48  ;;  %v1581_v62 = vpack.c.bf16 %v7091_v50, %v7102_v55  ;;  %v7123_v52 = vpack.c.bf16 %v1234_v48, %v1443_v16  ;;  %v1439_v44 = vld [vmem:[#allocation2 + $0x57] sm:$0xff]  ;;  %v1312_v0 = vld [vmem:[#allocation2 + $0x68] sm:$0xff] }
 0x1f2   :  { %1136 = vrot.lane.b32.xlu0 %v7084_v45, %s6598_s10  ;;  %v7100_v54 = vld [vmem:[#allocation2 + $0x61] sm:$0xff]  ;;  %v1094_v56 = vpack.c.bf16 %v7093_v51, %v7086_v46  ;;  %1103 = vst.msk [vmem:[#allocation3 + $0xa8] sm:$0xff] %vm1039_vm11, %v1095_v18  ;;  %v1256_v18 = vpack.c.bf16 %v7098_v53, %v7093_v51  ;;  %v1119_v53 = vld [vmem:[#allocation2 + $0xf0] sm:$0xff]  ;;  %v1516_v4 = vpack.c.bf16 %v1313_v60, %v1312_v0 }
 0x1f3   :  { %v1580_v57 = vpack.c.bf16 %v7100_v54, %v7088_v47  ;;  %1589 = vst.msk [vmem:[#allocation3 + $0x98] sm:$0xff] %vm1039_vm11, %v1581_v62  ;;  %1096 = vst.msk [vmem:[#allocation3] sm:$0xff] %vm1039_vm11, %v7123_v52  ;;  %v1440_v40 = vld [vmem:[#allocation2 + $0x5f] sm:$0xff]  ;;  %v1386_v43 = vpack.c.bf16 %v7102_v55, %v7100_v54  ;;  %v1183_v5 = vld [vmem:[#allocation2 + $0xe9] sm:$0xff] }
 0x1f4   :  { %1102 = vst.msk [vmem:[#allocation3 + $0x90] sm:$0xff] %vm1039_vm11, %v1094_v56  ;;  %v1505_v42 = vld [vmem:[#allocation2 + $0x60] sm:$0xff]  ;;  %v1450_v48 = vpack.c.bf16 %v1440_v40, %v1439_v44  ;;  %v1116_v47 = vld [vmem:[#allocation2 + $0xd8] sm:$0xff] }
 0x1f5   :  { %1588 = vst.msk [vmem:[#allocation3 + $0x80] sm:$0xff] %vm1039_vm11, %v1580_v57  ;;  %1402 = vrot.lane.b32.xlu1 %v1383_v58, %s6609_s3  ;;  %v1515_v56 = vpack.c.bf16 %v1505_v42, %v1310_v36  ;;  %v1117_v20 = vld [vmem:[#allocation2 + $0xe0] sm:$0xff]  ;;  %v1387_v58 = vpack.c.bf16 %v7078_v41, %v7091_v50  ;;  %v1321_v21 = vpack.c.bf16 %v1312_v0, %v1505_v42  ;;  %v1442_v50 = vld [vmem:[#allocation2 + $0x6f] sm:$0xff]  ;;  %v1249_v54 = vld [vmem:[#allocation2 + $0xf7] sm:$0xff] }
 0x1f6   :  { %1266 = vrot.lane.b32.xlu0 %v1250_v59, %s6602_s14  ;;  %v1126_v57 = vpack.c.bf16 %v1117_v20, %v1116_v47  ;;  %v1182_v59 = vld [vmem:[#allocation2 + $0xe1] sm:$0xff]  ;;  %v1181_v62 = vld [vmem:[#allocation2 + $0xd9] sm:$0xff]  ;;  %v1184_v19 = vld [vmem:[#allocation2 + $0xf1] sm:$0xff]  ;;  %v1257_v10 = vpack.c.bf16 %v1249_v54, %v7112_v61 }
 0x1f7   :  { %v1191_v16 = vpack.c.bf16 %v1182_v59, %v1181_v62  ;;  %v1441_v41 = vld [vmem:[#allocation2 + $0x67] sm:$0xff] }
 0x1f8   :  { %v1451_v1 = vpack.c.bf16 %v1442_v50, %v1441_v41  ;;  %v1612_v59 = vld [vmem:[%s6927_s28 + $0x28] sm:$0xff] }
 0x1f9   :  { %1532 = vrot.lane.b32.xlu1 %v1513_v2, %s6611_s5  ;;  %v1118_v2 = vld [vmem:[#allocation2 + $0xe8] sm:$0xff] }
 0x1fa   :  { %1467 = vrot.lane.b32.xlu0 %v1448_v3, %s6610_s4  ;;  %v1127_v9 = vpack.c.bf16 %v1119_v53, %v1118_v2  ;;  %v1614_v2 = vld [vmem:[%s6927_s28 + $0x38] sm:$0xff] }
 0x1fd   :  { %1209 = vrot.lane.b32.xlu1 %v1189_v6, %s6600_s12 }
 0x1fe   :  { %1144 = vrot.lane.b32.xlu0 %v1124_v23, %s6598_s10  ;;  %v1192_v23 = vpack.c.bf16 %v1184_v19, %v1183_v5  ;;  %v6386_v5 = vld [vmem:[%s6927_s28 + $0x44] ss:$8 sps:$4 sm:$0xff]  }
 0x1ff   :  { %v1600_v19 = vld [vmem:[#allocation3 + $0x68] sm:$0xff] }
 0x201   :  { %1339 = vrot.lane.b32.xlu1 %v1319_v34, %s6606_s24 }
 0x202   :  { %1274 = vrot.lane.b32.xlu0 %v1254_v11, %s6602_s14 }
 0x205   :  { %1469 = vrot.lane.b32.xlu1 %v1449_v22, %s6610_s4  ;;  %v1334_v27 = vpop.permute.xlu0 %1333 }
 0x206   :  { %1404 = vrot.lane.b32.xlu0 %v1384_v24, %s6609_s3  ;;  %v7144_v30 = vpop.permute.xlu1 %1331 }
 0x209   :  { %1146 = vrot.lane.b32.xlu1 %v1125_v7, %s6598_s10  ;;  %v7148_v33 = vpop.permute.xlu0 %1396 }
 0x20a   :  { %1534 = vrot.lane.b32.xlu0 %v1514_v8, %s6611_s5  ;;  %v7150_v12 = vpop.permute.xlu1 %1461 }
 0x20d   :  { %1276 = vrot.lane.b32.xlu1 %v1255_v13, %s6602_s14  ;;  %v7156_v37 = vpop.permute.xlu0 %1526 }
 0x20e   :  { %1211 = vrot.lane.b32.xlu0 %v1190_v35, %s6600_s12  ;;  %v1139_v38 = vpop.permute.xlu1 %1138 }
 0x20f   :  { %1162 = vst.msk [vmem:[#allocation3 + $0x18] sm:$0xff] %vm1160_vm12, %v1139_v38 }
 0x211   :  { %1406 = vrot.lane.b32.xlu1 %v1385_v25, %s6609_s3  ;;  %v1204_v14 = vpop.permute.xlu0 %1203  ;;  %v1610_v25 = vld [vmem:[%s6927_s28 + $0x18] sm:$0xff] }
 0x212   :  { %1341 = vrot.lane.b32.xlu0 %v1320_v39, %s6606_s24  ;;  %1227 = vst.msk [vmem:[#allocation3 + $0x18] sm:$0xff] %vm1225_vm13, %v1204_v14  ;;  %v1269_v46 = vpop.permute.xlu1 %1268  ;;  %v1609_v39 = vld [vmem:[%s6927_s28 + $0x10] sm:$0xff] }
 0x213   :  { %1292 = vst.msk [vmem:[#allocation3 + $0x18] sm:$0xff] %vm1290_vm14, %v1269_v46  ;;  %v5662_v44 = vcombine.low %v1609_v39, %v1610_v25 }
 0x214   :  { %1357 = vst.msk [vmem:[#allocation3 + $0x18] sm:$0xff] %vm1355_vm15, %v1334_v27 }
 0x215   :  { %1536 = vrot.lane.b32.xlu1 %v1515_v56, %s6611_s5  ;;  %v1596_v56 = vld [vmem:[#allocation3 + $0x38] sm:$0xff] }
 0x216   :  { %1471 = vrot.lane.b32.xlu0 %v1450_v48, %s6610_s4  ;;  %v6382_v48 = vld [vmem:[%s6927_s28 + $0x24] ss:$8 sps:$4 sm:$0xff]  }
 0x217   :  { %v1708_v60 = vmul.bf16 %v6382_v48, %v1596_v56 }
 0x219   :  { %1410 = vrot.lane.b32.xlu1 %v1387_v58, %s6609_s3  ;;  %v1611_v58 = vld [vmem:[%s6927_s28 + $0x20] sm:$0xff] }
 0x21a   :  { %1148 = vrot.lane.b32.xlu0 %v1126_v57, %s6598_s10 }
 0x21d   :  { %1213 = vrot.lane.b32.xlu1 %v1191_v16, %s6600_s12  ;;  %v5664_v16 = vcombine.low %v1611_v58, %v1612_v59  ;;  %v6398_v59 = vld [vmem:[%s6661_s9] sm:$0xff]  }
 0x21e   :  { %1345 = vrot.lane.b32.xlu0 %v1322_v63, %s6606_s24  ;;  %2711 = vmatpush1.bf16.msra.mxu0 %v6398_v59 }
 0x21f   :  { %2712 = vmatprep.subr.bf16.mxu0 %v6612_v49 }
 0x221   :  { %1343 = vrot.lane.b32.xlu1 %v1321_v21, %s6606_s24  ;;  %v1598_v21 = vld [vmem:[#allocation3 + $0x50] sm:$0xff] }
 0x222   :  { %1278 = vrot.lane.b32.xlu0 %v1256_v18, %s6602_s14  ;;  %v6384_v18 = vld [vmem:[%s6927_s28 + $0x34] ss:$8 sps:$4 sm:$0xff]  }
 0x224   :  { %v1464_v51 = vpop.permute.xlu0 %1463 }
 0x225   :  { %v1399_v3 = vpop.permute.xlu1 %1398  ;;  %1473 = vrot.lane.b32.xlu1 %v1451_v1, %s6610_s4  ;;  %v1613_v1 = vld [vmem:[%s6927_s28 + $0x30] sm:$0xff] }
 0x226   :  { %1408 = vrot.lane.b32.xlu0 %v1386_v43, %s6609_s3  ;;  %1422 = vst.msk [vmem:[#allocation3 + $0x18] sm:$0xff] %vm1420_vm0, %v1399_v3  ;;  %v1710_v3 = vmul.bf16 %v6384_v18, %v1598_v21 }
 0x227   :  { %1487 = vst.msk [vmem:[#allocation3 + $0x18] sm:$0xff] %vm1485_vm1, %v1464_v51 }
 0x228   :  { %v1141_v6 = vpop.permute.xlu0 %1140 }
 0x229   :  { %v1529_v55 = vpop.permute.xlu1 %1528  ;;  %1150 = vrot.lane.b32.xlu1 %v1127_v9, %s6598_s10  ;;  %1163 = vst.msk [vmem:[#allocation3 + $0x30] sm:$0xff] %vm1160_vm12, %v1141_v6 }
 0x22a   :  { %1538 = vrot.lane.b32.xlu0 %v1516_v4, %s6611_s5  ;;  %1552 = vst.msk [vmem:[#allocation3 + $0x18] sm:$0xff] %vm1550_vm2, %v1529_v55  ;;  %v5666_v4 = vcombine.low %v1613_v1, %v1614_v2  ;;  %v6401_v2 = vld [vmem:[%s6661_s9 + $0x18] sm:$0xff]  }
 0x22c   :  { %v1338_v11 = vpop.permute.xlu0 %1337 }
 0x22d   :  { %v1206_v34 = vpop.permute.xlu1 %1205  ;;  %1280 = vrot.lane.b32.xlu1 %v1257_v10, %s6602_s14  ;;  %v1616_v10 = vld [vmem:[%s6927_s28 + $0x48] sm:$0xff] }
 0x22e   :  { %1215 = vrot.lane.b32.xlu0 %v1192_v23, %s6600_s12  ;;  %1228 = vst.msk [vmem:[#allocation3 + $0x30] sm:$0xff] %vm1225_vm13, %v1206_v34  ;;  %v1615_v23 = vld [vmem:[%s6927_s28 + $0x40] sm:$0xff]  ;;  %v1712_v34 = vmul.bf16 %v6386_v5, %v1600_v19 }
 0x230   :  { %v1271_v17 = vpop.permute.xlu0 %1270 }
 0x231   :  { %v1336_v15 = vpop.permute.xlu1 %1335  ;;  %1540 = vrot.lane.b32.xlu1 %v7084_v45, %s6611_s5  ;;  %1293 = vst.msk [vmem:[#allocation3 + $0x30] sm:$0xff] %vm1290_vm14, %v1271_v17  ;;  %v1593_v46 = vld [vmem:[#allocation3 + $0x18] sm:$0xff]  ;;  %v5668_v17 = vcombine.low %v1615_v23, %v1616_v10 }
 0x232   :  { %1475 = vrot.lane.b32.xlu0 %v7123_v52, %s6610_s4  ;;  %1358 = vst.msk [vmem:[#allocation3 + $0x30] sm:$0xff] %vm1355_vm15, %v1336_v15  ;;  %v1705_v57 = vmul.bf16 %v5662_v44, %v1593_v46 }
 0x234   :  { %v1401_v22 = vpop.permute.xlu0 %1400 }
 0x235   :  { %v1466_v61 = vpop.permute.xlu1 %1465  ;;  %1423 = vst.msk [vmem:[#allocation3 + $0x30] sm:$0xff] %vm1420_vm0, %v1401_v22  ;;  %v6388_v22 = vld [vmem:[%s6927_s28 + $0x54] ss:$8 sps:$4 sm:$0xff]  }
 0x236   :  { %1488 = vst.msk [vmem:[#allocation3 + $0x30] sm:$0xff] %vm1485_vm1, %v1466_v61 }
 0x238   :  { %v1531_v26 = vpop.permute.xlu0 %1530 }
 0x239   :  { %v1143_v24 = vpop.permute.xlu1 %1142  ;;  %1553 = vst.msk [vmem:[#allocation3 + $0x30] sm:$0xff] %vm1550_vm2, %v1531_v26 }
 0x23a   :  { %1164 = vst.msk [vmem:[#allocation3 + $0x48] sm:$0xff] %vm1160_vm12, %v1143_v24  ;;  %v1602_v24 = vld [vmem:[#allocation3 + $0x80] sm:$0xff] }
 0x23c   :  { %v1208_v27 = vpop.permute.xlu0 %1207 }
 0x23d   :  { %v1273_v52 = vpop.permute.xlu1 %1272  ;;  %1229 = vst.msk [vmem:[#allocation3 + $0x48] sm:$0xff] %vm1225_vm13, %v1208_v27 }
 0x23e   :  { %1294 = vst.msk [vmem:[#allocation3 + $0x48] sm:$0xff] %vm1290_vm14, %v1273_v52 }
 0x23f   :  { %1359 = vst.msk [vmem:[#allocation3 + $0x48] sm:$0xff] %vm1355_vm15, %v1338_v11 }
 0x240   :  { %v1595_v0 = vld [vmem:[#allocation3 + $0x30] sm:$0xff] }
 0x241   :  { %v1707_v43 = vmul.bf16 %v5664_v16, %v1595_v0 }
 0x263   :  { %v1202_v45 = vpop.permute.xlu1 %1201 }
 0x264   :  { %v1137_v28 = vpop.permute.xlu0 %1136 }
 0x265   :  { %1161 = vst.msk [vmem:[#allocation3] sm:$0xff] %vm1160_vm12, %v1137_v28  ;;  %v1618_v28 = vld [vmem:[%s6927_s28 + $0x58] sm:$0xff] }
 0x266   :  { %1226 = vst.msk [vmem:[#allocation3] sm:$0xff] %vm1225_vm13, %v1202_v45  ;;  %v1617_v45 = vld [vmem:[%s6927_s28 + $0x50] sm:$0xff] }
 0x267   :  { %v1403_v29 = vpop.permute.xlu1 %1402 }
 0x268   :  { %v1267_v7 = vpop.permute.xlu0 %1266  ;;  %1424 = vst.msk [vmem:[#allocation3 + $0x48] sm:$0xff] %vm1420_vm0, %v1403_v29  ;;  %v1714_v29 = vmul.bf16 %v6388_v22, %v1602_v24 }
 0x269   :  { %1291 = vst.msk [vmem:[#allocation3] sm:$0xff] %vm1290_vm14, %v1267_v7 }
 0x26a   :  { %1356 = vst.msk [vmem:[#allocation3] sm:$0xff] %vm1355_vm15, %v7144_v30  ;;  %v6368_v30 = vld [vmem:[%s6927_s28] ss:$8 sps:$4 sm:$0xff]  }
 0x26b   :  { %1421 = vst.msk [vmem:[#allocation3] sm:$0xff] %vm1420_vm0, %v7148_v33  ;;  %v1533_v8 = vpop.permute.xlu1 %1532  ;;  %v6380_v33 = vld [vmem:[%s6927_s28 + $0x14] ss:$8 sps:$4 sm:$0xff]  }
 0x26c   :  { %1486 = vst.msk [vmem:[#allocation3] sm:$0xff] %vm1485_vm1, %v7150_v12  ;;  %v1468_v31 = vpop.permute.xlu0 %1467  ;;  %v1594_v12 = vld [vmem:[#allocation3 + $0x20] sm:$0xff] }
 0x26d   :  { %1551 = vst.msk [vmem:[#allocation3] sm:$0xff] %vm1550_vm2, %v7156_v37  ;;  %v1706_v40 = vmul.bf16 %v6380_v33, %v1594_v12 }
 0x26e   :  { %1489 = vst.msk [vmem:[#allocation3 + $0x48] sm:$0xff] %vm1485_vm1, %v1468_v31  ;;  %v5670_v31 = vcombine.low %v1617_v45, %v1618_v28 }
 0x26f   :  { %1554 = vst.msk [vmem:[#allocation3 + $0x48] sm:$0xff] %vm1550_vm2, %v1533_v8  ;;  %v1210_v32 = vpop.permute.xlu1 %1209 }
 0x270   :  { %v1145_v13 = vpop.permute.xlu0 %1144 }
 0x271   :  { %1165 = vst.msk [vmem:[#allocation3 + $0x60] sm:$0xff] %vm1160_vm12, %v1145_v13  ;;  %v6390_v13 = vld [vmem:[%s6927_s28 + $0x64] ss:$8 sps:$4 sm:$0xff]  }
 0x272   :  { %1230 = vst.msk [vmem:[#allocation3 + $0x60] sm:$0xff] %vm1225_vm13, %v1210_v32 }
 0x273   :  { %v1340_v35 = vpop.permute.xlu1 %1339 }
 0x274   :  { %v1275_v36 = vpop.permute.xlu0 %1274  ;;  %v1591_v38 = vld [vmem:[#allocation3] sm:$0xff] }
 0x275   :  { %1295 = vst.msk [vmem:[#allocation3 + $0x60] sm:$0xff] %vm1290_vm14, %v1275_v36  ;;  %v1703_v37 = vmul.bf16 %v6368_v30, %v1591_v38  ;;  %v1604_v30 = vld [vmem:[#allocation3 + $0x98] sm:$0xff]  ;;  %v1619_v36 = vld [vmem:[%s6927_s28 + $0x60] sm:$0xff]  ;;  %v1620_v38 = vld [vmem:[%s6927_s28 + $0x68] sm:$0xff] }
 0x276   :  { %1360 = vst.msk [vmem:[#allocation3 + $0x60] sm:$0xff] %vm1355_vm15, %v1340_v35  ;;  %v1597_v9 = vld [vmem:[#allocation3 + $0x48] sm:$0xff] }
 0x277   :  { %1855 = vmatmul.mubr.bf16.vlgmr.msra.gmra.mrb[0].mxu1 %v1703_v37  ;;  %v1470_v42 = vpop.permute.xlu1 %1469  ;;  %v1709_v6 = vmul.bf16 %v5666_v4, %v1597_v9  ;;  %v1716_v37 = vmul.bf16 %v6390_v13, %v1604_v30 }
 0x278   :  { %5687 = vmatprep.mubr.msk.bf16.mxu1 %vm1039_vm11, %v1706_v40  ;;  %v1405_v14 = vpop.permute.xlu0 %1404  ;;  %v5672_v40 = vcombine.low %v1619_v36, %v1620_v38  ;;  %v6405_v38 = vld [vmem:[%s6661_s9 + $0x38] sm:$0xff]  }
 0x279   :  { %1425 = vst.msk [vmem:[#allocation3 + $0x60] sm:$0xff] %vm1420_vm0, %v1405_v14  ;;  %v1606_v14 = vld [vmem:[#allocation3 + $0xb0] sm:$0xff] }
 0x27a   :  { %1490 = vst.msk [vmem:[#allocation3 + $0x60] sm:$0xff] %vm1485_vm1, %v1470_v42  ;;  %v6392_v42 = vld [vmem:[%s6927_s28 + $0x74] ss:$8 sps:$4 sm:$0xff]  }
 0x27b   :  { %v1147_v20 = vpop.permute.xlu1 %1146 }
 0x27c   :  { %v1535_v47 = vpop.permute.xlu0 %1534  ;;  %1166 = vst.msk [vmem:[#allocation3 + $0x78] sm:$0xff] %vm1160_vm12, %v1147_v20  ;;  %v1718_v20 = vmul.bf16 %v6392_v42, %v1606_v14 }
 0x27d   :  { %1555 = vst.msk [vmem:[#allocation3 + $0x60] sm:$0xff] %vm1550_vm2, %v1535_v47  ;;  %v6394_v47 = vld [vmem:[%s6927_s28 + $0x70] ss:$8 sps:$4 sm:$0xff]   ;;  %s6631_s28 = smov 22  }
 0x27f   :  { %1863 = vmatmul.mubr.bf16.gmra.mrb[4].mxu1 %v1705_v57  ;;  %v1277_v62 = vpop.permute.xlu1 %1276 }
 0x280   :  { %5688 = vmatprep.mubr.msk.bf16.mxu1 %vm1039_vm11, %v1708_v60  ;;  %v1212_v63 = vpop.permute.xlu0 %1211  ;;  %v7285_v60 = vld [vmem:[%s5602_s23] ss:$0 sm:$0xff]  ;;  %s7682_s23 = sld [smem:[%s8091_s0 + %s6621_s20]]  }
 0x281   :  { %1231 = vst.msk [vmem:[#allocation3 + $0x78] sm:$0xff] %vm1225_vm13, %v1212_v63  ;;  %s5615_s20 = sld [smem:[%s8091_s0 + %s6628_s17]]   ;;  %s6634_s17 = smov 26  }
 0x282   :  { %1296 = vst.msk [vmem:[#allocation3 + $0x78] sm:$0xff] %vm1290_vm14, %v1277_v62  ;;  %v6399_v62 = vld [vmem:[%s6661_s9 + $0x8] sm:$0xff]  }
 0x283   :  { %v1407_v41 = vpop.permute.xlu1 %1406  ;;  %2713 = vmatpush1.bf16.msra.mxu0 %v6399_v62 }
 0x284   :  { %v1342_v50 = vpop.permute.xlu0 %1341  ;;  %v1599_v61 = vld [vmem:[#allocation3 + $0x60] sm:$0xff]  ;;  %2714 = vmatprep.subr.bf16.mxu0 %v6612_v49 }
 0x285   :  { %1361 = vst.msk [vmem:[#allocation3 + $0x78] sm:$0xff] %vm1355_vm15, %v1342_v50  ;;  %v1711_v27 = vmul.bf16 %v5668_v17, %v1599_v61 }
 0x286   :  { %1426 = vst.msk [vmem:[#allocation3 + $0x78] sm:$0xff] %vm1420_vm0, %v1407_v41 }
 0x287   :  { %1871 = vmatmul.mubr.bf16.gmra.mrb[8].mxu1 %v1707_v43  ;;  %v1537_v51 = vpop.permute.xlu1 %1536  ;;  %v6400_v43 = vld [vmem:[%s6661_s9 + $0x10] sm:$0xff]  }
 0x288   :  { %5689 = vmatprep.mubr.msk.bf16.mxu1 %vm1039_vm11, %v1710_v3  ;;  %v1472_v53 = vpop.permute.xlu0 %1471  ;;  %2715 = vmatpush1.bf16.msra.mxu0 %v6400_v43 }
 0x289   :  { %1491 = vst.msk [vmem:[#allocation3 + $0x78] sm:$0xff] %vm1485_vm1, %v1472_v53  ;;  %2716 = vmatprep.subr.bf16.mxu0 %v6612_v49 }
 0x28a   :  { %1556 = vst.msk [vmem:[#allocation3 + $0x78] sm:$0xff] %vm1550_vm2, %v1537_v51 }
 0x28b   :  { %v1411_v54 = vpop.permute.xlu1 %1410 }
 0x28c   :  { %v1149_v55 = vpop.permute.xlu0 %1148  ;;  %2717 = vmatpush1.bf16.msra.mxu0 %v6401_v2 }
 0x28d   :  { %1167 = vst.msk [vmem:[#allocation3 + $0x90] sm:$0xff] %vm1160_vm12, %v1149_v55  ;;  %2718 = vmatprep.subr.bf16.mxu0 %v6612_v49 }
 0x28f   :  { %1879 = vmatmul.mubr.bf16.gmra.mrb[12].mxu1 %v1709_v6  ;;  %v1214_v11 = vpop.permute.xlu1 %1213 }
 0x290   :  { %5690 = vmatprep.mubr.msk.bf16.mxu1 %vm1039_vm11, %v1712_v34  ;;  %v1346_v15 = vpop.permute.xlu0 %1345  ;;  %1232 = vst.msk [vmem:[#allocation3 + $0x90] sm:$0xff] %vm1225_vm13, %v1214_v11  ;;  %v6403_v11 = vld [vmem:[%s6661_s9 + $0x28] sm:$0xff]  }
 0x291   :  { %v1601_v32 = vld [vmem:[#allocation3 + $0x78] sm:$0xff] }
 0x292   :  { %v1713_v35 = vmul.bf16 %v5670_v31, %v1601_v32 }
 0x293   :  { %v1344_v26 = vpop.permute.xlu1 %1343 }
 0x294   :  { %v1279_v52 = vpop.permute.xlu0 %1278 }
 0x295   :  { %1297 = vst.msk [vmem:[#allocation3 + $0x90] sm:$0xff] %vm1290_vm14, %v1279_v52 }
 0x296   :  { %1362 = vst.msk [vmem:[#allocation3 + $0x90] sm:$0xff] %vm1355_vm15, %v1344_v26 }
 0x297   :  { %1887 = vmatmul.mubr.bf16.gmra.mrb[16].mxu1 %v1711_v27  ;;  %v1474_v7 = vpop.permute.xlu1 %1473  ;;  %v6404_v27 = vld [vmem:[%s6661_s9 + $0x30] sm:$0xff]  }
 0x298   :  { %5691 = vmatprep.mubr.msk.bf16.mxu1 %vm1039_vm11, %v1714_v29  ;;  %v1409_v8 = vpop.permute.xlu0 %1408 }
 0x299   :  { %1427 = vst.msk [vmem:[#allocation3 + $0x90] sm:$0xff] %vm1420_vm0, %v1409_v8 }
 0x29a   :  { %1492 = vst.msk [vmem:[#allocation3 + $0x90] sm:$0xff] %vm1485_vm1, %v1474_v7 }
 0x29b   :  { %v1151_v33 = vpop.permute.xlu1 %1150 }
 0x29c   :  { %v1539_v12 = vpop.permute.xlu0 %1538  ;;  %1168 = vst.msk [vmem:[#allocation3 + $0xa8] sm:$0xff] %vm1160_vm12, %v1151_v33 }
 0x29d   :  { %1557 = vst.msk [vmem:[#allocation3 + $0x90] sm:$0xff] %vm1550_vm2, %v1539_v12 }
 0x29f   :  { %1895 = vmatmul.mubr.bf16.gmra.mrb[20].mxu1 %v1713_v35  ;;  %v1281_v39 = vpop.permute.xlu1 %1280 }
 0x2a0   :  { %5692 = vmatprep.mubr.msk.bf16.mxu1 %vm1039_vm11, %v1716_v37  ;;  %v1216_v25 = vpop.permute.xlu0 %1215 }
 0x2a1   :  { %1233 = vst.msk [vmem:[#allocation3 + $0xa8] sm:$0xff] %vm1225_vm13, %v1216_v25 }
 0x2a2   :  { %1298 = vst.msk [vmem:[#allocation3 + $0xa8] sm:$0xff] %vm1290_vm14, %v1281_v39 }
 0x2a3   :  { %1363 = vst.msk [vmem:[#allocation3 + $0xa8] sm:$0xff] %vm1355_vm15, %v1346_v15  ;;  %v1541_v44 = vpop.permute.xlu1 %1540 }
 0x2a4   :  { %1428 = vst.msk [vmem:[#allocation3 + $0xa8] sm:$0xff] %vm1420_vm0, %v1411_v54  ;;  %v1476_v46 = vpop.permute.xlu0 %1475  ;;  %v1603_v48 = vld [vmem:[#allocation3 + $0x90] sm:$0xff]  ;;  %v6402_v54 = vld [vmem:[%s6661_s9 + $0x20] sm:$0xff]  }
 0x2a5   :  { %1493 = vst.msk [vmem:[#allocation3 + $0xa8] sm:$0xff] %vm1485_vm1, %v1476_v46  ;;  %v1715_v56 = vmul.bf16 %v5672_v40, %v1603_v48  ;;  %2719 = vmatpush1.bf16.msra.mxu0 %v6402_v54 }
 0x2a6   :  { %1558 = vst.msk [vmem:[#allocation3 + $0xa8] sm:$0xff] %vm1550_vm2, %v1541_v44  ;;  %2720 = vmatprep.subr.bf16.mxu0 %v6612_v49 }
 0x2a7   :  { %1903 = vmatmul.mubr.bf16.gmra.mrb[24].mxu1 %v1715_v56 }
 0x2a8   :  { %5693 = vmatprep.mubr.msk.bf16.mxu1 %vm1039_vm11, %v1718_v20  ;;  %v6406_v20 = vld [vmem:[%s6661_s9 + $0x40] sm:$0xff]   ;;  %s6616_s9 = smov 10  }
 0x2a9   :  { %2721 = vmatpush1.bf16.msra.mxu0 %v6403_v11  ;;  %s7573_s26 = sld [smem:[%s8091_s0 + %s6616_s9]]   ;;  %s6622_s9 = smov 13  }
 0x2aa   :  { %2722 = vmatprep.subr.bf16.mxu0 %v6612_v49 }
 0x2ad   :  { %v1605_v57 = vld [vmem:[#allocation3 + $0xa8] sm:$0xff]  ;;  %2723 = vmatpush1.bf16.msra.mxu0 %v6404_v27 }
 0x2ae   :  { %v1717_v58 = vmul.bf16 %v6394_v47, %v1605_v57  ;;  %2724 = vmatprep.subr.bf16.mxu0 %v6612_v49 }
 0x2b0   :  { %1911 = vmatmul.mubr.bf16.gmra.mrb[28].mxu1 %v1717_v58 }
 0x2b1   :  { %2725 = vmatpush1.bf16.msra.mxu0 %v6405_v38 }
 0x2b2   :  { %2726 = vmatprep.subr.bf16.mxu0 %v6612_v49 }
 0x2b5   :  { %2727 = vmatpush1.bf16.msra.mxu0 %v6406_v20 }
 0x34a   :  { %v1856_v63 = vpop.f32.mrb[0].mxu1 }
 0x34b   :  { %v1857_v16 = vadd.f32 %v7285_v60, %v1856_v63  ;;  %v1858_v0 = vpop.f32.mrb[1].mxu1 }
 0x34c   :  { %v1859_v18 = vpop.f32.mrb[2].mxu1 }
 0x34d   :  { %v1919_v21 = vmax.f32 %v1857_v16, 0.0  ;;  %v1860_v41 = vadd.f32 %v7285_v60, %v1859_v18  ;;  %v1861_v50 = vpop.f32.mrb[3].mxu1 }
 0x34f   :  { %1935 = vst.msk [vmem:[#allocation2] sm:$0xff] %vm1039_vm11, %v1919_v21  ;;  %1951 = vst.msk [vmem:[#allocation2 + $0x80] sm:$0xff] %vm1039_vm11, %v1919_v21  ;;  %v1920_v1 = vmax.f32 %v1860_v41, 0.0 }
 0x351   :  { %1936 = vst.msk [vmem:[#allocation2 + $0x8] sm:$0xff] %vm1039_vm11, %v1920_v1  ;;  %1952 = vst.msk [vmem:[#allocation2 + $0x88] sm:$0xff] %vm1039_vm11, %v1920_v1 }
 0x352   :  { %v1864_v3 = vpop.f32.mrb[4].mxu1 }
 0x353   :  { %v1865_v51 = vadd.f32 %v7285_v60, %v1864_v3  ;;  %v1866_v53 = vpop.f32.mrb[5].mxu1  ;;  %v6397_v3 = vld [vmem:[%s7279_s19 + $0x4] ss:$8 sps:$4 sm:$0xff]  }
 0x354   :  { %v1867_v4 = vpop.f32.mrb[6].mxu1 }
 0x355   :  { %v1921_v9 = vmax.f32 %v1865_v51, 0.0  ;;  %v1868_v5 = vadd.f32 %v7285_v60, %v1867_v4  ;;  %v1869_v19 = vpop.f32.mrb[7].mxu1 }
 0x356   :  { %v1967_v23 = vld [vmem:[#allocation2] sm:$0xff] }
 0x357   :  { %1937 = vst.msk [vmem:[#allocation2 + $0x10] sm:$0xff] %vm1039_vm11, %v1921_v9  ;;  %1953 = vst.msk [vmem:[#allocation2 + $0x90] sm:$0xff] %vm1039_vm11, %v1921_v9  ;;  %v1922_v55 = vmax.f32 %v1868_v5, 0.0 }
 0x358   :  { %v2127_v6 = vld [vmem:[#allocation2 + $0x8] sm:$0xff] }
 0x359   :  { %1954 = vst.msk [vmem:[#allocation2 + $0x98] sm:$0xff] %vm1039_vm11, %v1922_v55  ;;  %1938 = vst.msk [vmem:[#allocation2 + $0x18] sm:$0xff] %vm1039_vm11, %v1922_v55  ;;  %v1983_v10 = vpack.c.bf16 %v2127_v6, %v1967_v23  ;;  %v2063_v52 = vld [vmem:[#allocation2 + $0x2] sm:$0xff] }
 0x35a   :  { %v1872_v34 = vpop.f32.mrb[8].mxu1  ;;  %v1999_v28 = vld [vmem:[#allocation2 + $0x1] sm:$0xff] }
 0x35b   :  { %v1873_v15 = vadd.f32 %v7285_v60, %v1872_v34  ;;  %v1874_v17 = vpop.f32.mrb[9].mxu1  ;;  %1991 = vst.msk [vmem:[#allocation3] sm:$0xff] %vm1039_vm11, %v1983_v10  ;;  %v7316_v32 = vld [vmem:[#allocation2 + $0x82] sm:$0xff] }
 0x35c   :  { %v1875_v61 = vpop.f32.mrb[10].mxu1 }
 0x35d   :  { %v1923_v22 = vmax.f32 %v1873_v15, 0.0  ;;  %v1876_v24 = vadd.f32 %v7285_v60, %v1875_v61  ;;  %v1877_v26 = vpop.f32.mrb[11].mxu1 }
 0x35e   :  { %v2064_v45 = vld [vmem:[#allocation2 + $0xa] sm:$0xff] }
 0x35f   :  { %v2000_v29 = vld [vmem:[#allocation2 + $0x9] sm:$0xff]  ;;  %1955 = vst.msk [vmem:[#allocation2 + $0xa0] sm:$0xff] %vm1039_vm11, %v1923_v22  ;;  %1939 = vst.msk [vmem:[#allocation2 + $0x20] sm:$0xff] %vm1039_vm11, %v1923_v22  ;;  %v1924_v7 = vmax.f32 %v1876_v24, 0.0  ;;  %v2079_v8 = vpack.c.bf16 %v2064_v45, %v2063_v52 }
 0x360   :  { %v2015_v31 = vpack.c.bf16 %v2000_v29, %v1999_v28  ;;  %v2462_v13 = vld [vmem:[#allocation2 + $0x8a] sm:$0xff]  ;;  %v7318_v12 = vld [vmem:[#allocation2 + $0x18] sm:$0xff] }
 0x361   :  { %v2192_v30 = vld [vmem:[#allocation2 + $0x11] sm:$0xff]  ;;  %v2470_v35 = vpack.c.bf16 %v2462_v13, %v7316_v32  ;;  %1956 = vst.msk [vmem:[#allocation2 + $0xa8] sm:$0xff] %vm1039_vm11, %v1924_v7  ;;  %1940 = vst.msk [vmem:[#allocation2 + $0x28] sm:$0xff] %vm1039_vm11, %v1924_v7  ;;  %2095 = vrot.lane.b32.xlu1 %v2079_v8, %s6600_s12 }
 0x362   :  { %v2128_v33 = vld [vmem:[#allocation2 + $0x10] sm:$0xff]  ;;  %2031 = vrot.lane.b32.xlu0 %v2015_v31, %s6598_s10  ;;  %v1880_v37 = vpop.f32.mrb[12].mxu1  ;;  %v2207_v40 = vpack.c.bf16 %v2192_v30, %v2000_v29 }
 0x363   :  { %v2335_v36 = vpack.c.bf16 %v7318_v12, %v2128_v33  ;;  %2478 = vst.msk [vmem:[#allocation3 + $0xb0] sm:$0xff] %vm1039_vm11, %v2470_v35  ;;  %v1881_v39 = vadd.f32 %v7285_v60, %v1880_v37  ;;  %v1882_v25 = vpop.f32.mrb[13].mxu1  ;;  %v2143_v42 = vpack.c.bf16 %v2128_v33, %v2127_v6  ;;  %v2256_v44 = vld [vmem:[#allocation2 + $0x12] sm:$0xff] }
 0x364   :  { %v1883_v14 = vpop.f32.mrb[14].mxu1  ;;  %v2271_v58 = vpack.c.bf16 %v2256_v44, %v2064_v45 }
 0x365   :  { %1992 = vst.msk [vmem:[#allocation3 + $0x18] sm:$0xff] %vm1039_vm11, %v2335_v36  ;;  %v1925_v46 = vmax.f32 %v1881_v39, 0.0  ;;  %v1884_v48 = vadd.f32 %v7285_v60, %v1883_v14  ;;  %2223 = vrot.lane.b32.xlu1 %v2207_v40, %s6606_s24  ;;  %v1885_v56 = vpop.f32.mrb[15].mxu1 }
 0x366   :  { %2159 = vrot.lane.b32.xlu0 %v2143_v42, %s6602_s14  ;;  %v2066_v47 = vld [vmem:[#allocation2 + $0x1a] sm:$0xff] }
 0x367   :  { %1957 = vst.msk [vmem:[#allocation2 + $0xb0] sm:$0xff] %vm1039_vm11, %v1925_v46  ;;  %1941 = vst.msk [vmem:[#allocation2 + $0x30] sm:$0xff] %vm1039_vm11, %v1925_v46  ;;  %v1926_v57 = vmax.f32 %v1884_v48, 0.0  ;;  %v2080_v59 = vpack.c.bf16 %v2066_v47, %v2256_v44  ;;  %v2002_v62 = vld [vmem:[#allocation2 + $0x19] sm:$0xff] }
 0x368   :  { %v2130_v63 = vld [vmem:[#allocation2 + $0x20] sm:$0xff]  ;;  %v7338_v16 = vld [vmem:[#allocation2 + $0x28] sm:$0xff]  ;;  %v2016_v41 = vpack.c.bf16 %v2002_v62, %v2192_v30 }
 0x369   :  { %1958 = vst.msk [vmem:[#allocation2 + $0xb8] sm:$0xff] %vm1039_vm11, %v1926_v57  ;;  %1942 = vst.msk [vmem:[#allocation2 + $0x38] sm:$0xff] %vm1039_vm11, %v1926_v57  ;;  %2351 = vrot.lane.b32.xlu1 %v2335_v36, %s6610_s4  ;;  %v2336_v49 = vpack.c.bf16 %v7338_v16, %v2130_v63  ;;  %v2258_v51 = vld [vmem:[#allocation2 + $0x22] sm:$0xff]  ;;  %v2144_v9 = vpack.c.bf16 %v2130_v63, %v7318_v12 }
 0x36a   :  { %2287 = vrot.lane.b32.xlu0 %v2271_v58, %s6609_s3  ;;  %2471 = vst.msk [vmem:[#allocation3 + $0x8] sm:$0xff] %vm1039_vm11, %v2080_v59  ;;  %v1888_v0 = vpop.f32.mrb[16].mxu1  ;;  %v2194_v5 = vld [vmem:[#allocation2 + $0x21] sm:$0xff]  ;;  %v2272_v17 = vpack.c.bf16 %v2258_v51, %v2066_v47 }
 0x36b   :  { %v1889_v18 = vadd.f32 %v7285_v60, %v1888_v0  ;;  %v1890_v21 = vpop.f32.mrb[17].mxu1  ;;  %1993 = vst.msk [vmem:[#allocation3 + $0x30] sm:$0xff] %vm1039_vm11, %v2336_v49  ;;  %v2208_v61 = vpack.c.bf16 %v2194_v5, %v2002_v62 }
 0x36c   :  { %v1891_v50 = vpop.f32.mrb[18].mxu1 }
 0x36d   :  { %v1927_v43 = vmax.f32 %v1889_v18, 0.0  ;;  %v1892_v1 = vadd.f32 %v7285_v60, %v1891_v50  ;;  %2033 = vrot.lane.b32.xlu1 %v2016_v41, %s6598_s10  ;;  %v1893_v2 = vpop.f32.mrb[19].mxu1 }
 0x36e   :  { %2415 = vrot.lane.b32.xlu0 %v2016_v41, %s6611_s5  ;;  %v7352_v53 = vld [vmem:[#allocation2 + $0x2a] sm:$0xff] }
 0x36f   :  { %1959 = vst.msk [vmem:[#allocation2 + $0xc0] sm:$0xff] %vm1039_vm11, %v1927_v43  ;;  %1943 = vst.msk [vmem:[#allocation2 + $0x40] sm:$0xff] %vm1039_vm11, %v1927_v43  ;;  %v1928_v4 = vmax.f32 %v1892_v1, 0.0  ;;  %v2081_v19 = vpack.c.bf16 %v7352_v53, %v2258_v51  ;;  %v2132_v55 = vld [vmem:[#allocation2 + $0x30] sm:$0xff] }
 0x370   :  { %v7358_v6 = vld [vmem:[#allocation2 + $0x38] sm:$0xff]  ;;  %v2386_v24 = vld [vmem:[#allocation2 + $0x29] sm:$0xff]  ;;  %v2145_v46 = vpack.c.bf16 %v2132_v55, %v7338_v16 }
 0x371   :  { %v2480_v54 = vld [vmem:[#allocation3 + $0x8] sm:$0xff]  ;;  %1960 = vst.msk [vmem:[#allocation2 + $0xc8] sm:$0xff] %vm1039_vm11, %v1928_v4  ;;  %1944 = vst.msk [vmem:[#allocation2 + $0x48] sm:$0xff] %vm1039_vm11, %v1928_v4  ;;  %2161 = vrot.lane.b32.xlu1 %v2144_v9, %s6602_s14  ;;  %v7365_v10 = vpack.c.bf16 %v7358_v6, %v2132_v55  ;;  %v2260_v45 = vld [vmem:[#allocation2 + $0x32] sm:$0xff]  ;;  %v2400_v7 = vpack.c.bf16 %v2386_v24, %v2194_v5 }
 0x372   :  { %2097 = vrot.lane.b32.xlu0 %v2080_v59, %s6600_s12  ;;  %v2592_v23 = vmul.bf16 %v6397_v3, %v2480_v54  ;;  %2472 = vst.msk [vmem:[#allocation3 + $0x20] sm:$0xff] %vm1039_vm11, %v2081_v19  ;;  %v1896_v34 = vpop.f32.mrb[20].mxu1  ;;  %v2196_v38 = vld [vmem:[#allocation2 + $0x31] sm:$0xff]  ;;  %v2273_v58 = vpack.c.bf16 %v2260_v45, %v7352_v53 }
 0x373   :  { %v1897_v11 = vadd.f32 %v7285_v60, %v1896_v34  ;;  %v1898_v15 = vpop.f32.mrb[21].mxu1  ;;  %1994 = vst.msk [vmem:[#allocation3 + $0x48] sm:$0xff] %vm1039_vm11, %v7365_v10  ;;  %v2209_v44 = vpack.c.bf16 %v2196_v38, %v2386_v24 }
 0x374   :  { %5720 = vmatprep.mubr.msk.bf16.mxu0 %vm1039_vm11, %v2592_v23  ;;  %v1899_v22 = vpop.f32.mrb[22].mxu1 }
 0x375   :  { %v1929_v26 = vmax.f32 %v1897_v11, 0.0  ;;  %v1900_v52 = vadd.f32 %v7285_v60, %v1899_v22  ;;  %2289 = vrot.lane.b32.xlu1 %v2272_v17, %s6609_s3  ;;  %v1901_v27 = vpop.f32.mrb[23].mxu1 }
 0x376   :  { %2225 = vrot.lane.b32.xlu0 %v2208_v61, %s6606_s24  ;;  %v7375_v28 = vld [vmem:[#allocation2 + $0x3a] sm:$0xff] }
 0x377   :  { %1961 = vst.msk [vmem:[#allocation2 + $0xd0] sm:$0xff] %vm1039_vm11, %v1929_v26  ;;  %1945 = vst.msk [vmem:[#allocation2 + $0x50] sm:$0xff] %vm1039_vm11, %v1929_v26  ;;  %v1930_v29 = vmax.f32 %v1900_v52, 0.0  ;;  %v7380_v8 = vpack.c.bf16 %v7375_v28, %v2260_v45  ;;  %v7382_v31 = vld [vmem:[#allocation2 + $0x40] sm:$0xff] }
 0x378   :  { %v7384_v13 = vld [vmem:[#allocation2 + $0x48] sm:$0xff]  ;;  %v2388_v63 = vld [vmem:[#allocation2 + $0x39] sm:$0xff] }
 0x379   :  { %1962 = vst.msk [vmem:[#allocation2 + $0xd8] sm:$0xff] %vm1039_vm11, %v1930_v29  ;;  %1946 = vst.msk [vmem:[#allocation2 + $0x58] sm:$0xff] %vm1039_vm11, %v1930_v29  ;;  %2417 = vrot.lane.b32.xlu1 %v2400_v7, %s6611_s5  ;;  %v7392_v30 = vpack.c.bf16 %v7384_v13, %v7382_v31  ;;  %v2262_v40 = vld [vmem:[#allocation2 + $0x42] sm:$0xff]  ;;  %v2401_v50 = vpack.c.bf16 %v2388_v63, %v2196_v38 }
 0x37a   :  { %2353 = vrot.lane.b32.xlu0 %v2336_v49, %s6610_s4  ;;  %2473 = vst.msk [vmem:[#allocation3 + $0x38] sm:$0xff] %vm1039_vm11, %v7380_v8  ;;  %v1904_v33 = vpop.f32.mrb[24].mxu1  ;;  %v2198_v53 = vld [vmem:[#allocation2 + $0x41] sm:$0xff]  ;;  %v2274_v9 = vpack.c.bf16 %v2262_v40, %v7375_v28 }
 0x37b   :  { %v1905_v12 = vadd.f32 %v7285_v60, %v1904_v33  ;;  %v1906_v35 = vpop.f32.mrb[25].mxu1  ;;  %1995 = vst.msk [vmem:[#allocation3 + $0x60] sm:$0xff] %vm1039_vm11, %v7392_v30  ;;  %v2210_v4 = vpack.c.bf16 %v2198_v53, %v2388_v63  ;;  %v2142_v38 = vld [vmem:[#allocation2 + $0x80] sm:$0xff] }
 0x37c   :  { %v1907_v36 = vpop.f32.mrb[26].mxu1 }
 0x37d   :  { %v1931_v37 = vmax.f32 %v1905_v12, 0.0  ;;  %v1908_v39 = vadd.f32 %v7285_v60, %v1907_v36  ;;  %2099 = vrot.lane.b32.xlu1 %v2081_v19, %s6600_s12  ;;  %v1909_v25 = vpop.f32.mrb[27].mxu1 }
 0x37e   :  { %2035 = vrot.lane.b32.xlu0 %v2400_v7, %s6598_s10  ;;  %v7402_v42 = vld [vmem:[#allocation2 + $0x4a] sm:$0xff] }
 0x37f   :  { %1963 = vst.msk [vmem:[#allocation2 + $0xe0] sm:$0xff] %vm1039_vm11, %v1931_v37  ;;  %1947 = vst.msk [vmem:[#allocation2 + $0x60] sm:$0xff] %vm1039_vm11, %v1931_v37  ;;  %v1932_v14 = vmax.f32 %v1908_v39, 0.0  ;;  %v2083_v48 = vpack.c.bf16 %v7402_v42, %v2262_v40  ;;  %v7408_v56 = vld [vmem:[#allocation2 + $0x50] sm:$0xff]  ;;  %v2206_v39 = vld [vmem:[#allocation2 + $0x81] sm:$0xff] }
 0x380   :  { %v7410_v20 = vld [vmem:[#allocation2 + $0x58] sm:$0xff]  ;;  %v2390_v54 = vld [vmem:[#allocation2 + $0x49] sm:$0xff]  ;;  %v2147_v24 = vpack.c.bf16 %v7408_v56, %v7384_v13 }
 0x381   :  { %1964 = vst.msk [vmem:[#allocation2 + $0xe8] sm:$0xff] %vm1039_vm11, %v1932_v14  ;;  %1948 = vst.msk [vmem:[#allocation2 + $0x68] sm:$0xff] %vm1039_vm11, %v1932_v14  ;;  %2227 = vrot.lane.b32.xlu1 %v2209_v44, %s6606_s24  ;;  %v2339_v47 = vpack.c.bf16 %v7410_v20, %v7408_v56  ;;  %v2264_v21 = vld [vmem:[#allocation2 + $0x52] sm:$0xff]  ;;  %v2402_v15 = vpack.c.bf16 %v2390_v54, %v2198_v53  ;;  %v2334_v14 = vld [vmem:[#allocation2 + $0x88] sm:$0xff] }
 0x382   :  { %2163 = vrot.lane.b32.xlu0 %v2145_v46, %s6602_s14  ;;  %2474 = vst.msk [vmem:[#allocation3 + $0x50] sm:$0xff] %vm1039_vm11, %v2083_v48  ;;  %v2200_v61 = vld [vmem:[#allocation2 + $0x51] sm:$0xff]  ;;  %v2275_v26 = vpack.c.bf16 %v2264_v21, %v7402_v42  ;;  %v2398_v42 = vld [vmem:[#allocation2 + $0x89] sm:$0xff]  ;;  %v2342_v46 = vpack.c.bf16 %v2334_v14, %v2142_v38 }
 0x383   :  { %v1912_v57 = vpop.f32.mrb[28].mxu1  ;;  %1996 = vst.msk [vmem:[#allocation3 + $0x78] sm:$0xff] %vm1039_vm11, %v2339_v47  ;;  %v2211_v22 = vpack.c.bf16 %v2200_v61, %v2390_v54  ;;  %v2406_v44 = vpack.c.bf16 %v2398_v42, %v2206_v39  ;;  %v2484_v54 = vld [vmem:[#allocation3 + $0x38] sm:$0xff] }
 0x384   :  { %v1913_v59 = vadd.f32 %v7285_v60, %v1912_v57  ;;  %v1914_v62 = vpop.f32.mrb[29].mxu1 }
 0x385   :  { %2355 = vrot.lane.b32.xlu1 %v7365_v10, %s6610_s4  ;;  %v1915_v16 = vpop.f32.mrb[30].mxu1 }
 0x386   :  { %2291 = vrot.lane.b32.xlu0 %v2273_v58, %s6609_s3  ;;  %v1933_v49 = vmax.f32 %v1913_v59, 0.0  ;;  %v1916_v0 = vadd.f32 %v7285_v60, %v1915_v16  ;;  %v1917_v18 = vpop.f32.mrb[31].mxu1  ;;  %v2074_v41 = vld [vmem:[#allocation2 + $0x5a] sm:$0xff]  ;;  %v2146_v60 = vpack.c.bf16 %v7382_v31, %v7358_v6 }
 0x387   :  { %v2084_v43 = vpack.c.bf16 %v2074_v41, %v2264_v21  ;;  %v2138_v2 = vld [vmem:[#allocation2 + $0x60] sm:$0xff] }
 0x388   :  { %1965 = vst.msk [vmem:[#allocation2 + $0xf0] sm:$0xff] %vm1039_vm11, %v1933_v49  ;;  %1949 = vst.msk [vmem:[#allocation2 + $0x70] sm:$0xff] %vm1039_vm11, %v1933_v49  ;;  %v1934_v1 = vmax.f32 %v1916_v0, 0.0  ;;  %v7428_v3 = vld [vmem:[#allocation2 + $0x68] sm:$0xff]  ;;  %v2392_v52 = vld [vmem:[#allocation2 + $0x59] sm:$0xff]  ;;  %v2148_v45 = vpack.c.bf16 %v2138_v2, %v7410_v20 }
 0x389   :  { %2037 = vrot.lane.b32.xlu1 %v2401_v50, %s6598_s10  ;;  %v2340_v51 = vpack.c.bf16 %v7428_v3, %v2138_v2  ;;  %2475 = vst.msk [vmem:[#allocation3 + $0x68] sm:$0xff] %vm1039_vm11, %v2084_v43  ;;  %v2266_v5 = vld [vmem:[#allocation2 + $0x62] sm:$0xff]  ;;  %v2403_v27 = vpack.c.bf16 %v2392_v52, %v2200_v61  ;;  %v6407_v49 = vld [vmem:[%s7279_s19 + $0x14] ss:$8 sps:$4 sm:$0xff]  }
 0x38a   :  { %2419 = vrot.lane.b32.xlu0 %v2401_v50, %s6611_s5  ;;  %1966 = vst.msk [vmem:[#allocation2 + $0xf8] sm:$0xff] %vm1039_vm11, %v1934_v1  ;;  %1950 = vst.msk [vmem:[#allocation2 + $0x78] sm:$0xff] %vm1039_vm11, %v1934_v1  ;;  %v2202_v28 = vld [vmem:[#allocation2 + $0x61] sm:$0xff]  ;;  %v2276_v7 = vpack.c.bf16 %v2266_v5, %v2074_v41 }
 0x38b   :  { %1997 = vst.msk [vmem:[#allocation3 + $0x90] sm:$0xff] %vm1039_vm11, %v2340_v51  ;;  %v2212_v29 = vpack.c.bf16 %v2202_v28, %v2392_v52  ;;  %v6395_v16 = vld [vmem:[%s7279_s19] ss:$8 sps:$4 sm:$0xff]   ;;  %v6411_v52 = vld [vmem:[%s7279_s19 + $0x34] ss:$8 sps:$4 sm:$0xff]  }
 0x38c   :  { %v2482_v0 = vld [vmem:[#allocation3 + $0x20] sm:$0xff]  ;;  %v2500_v61 = vld [vmem:[%s7279_s19 + $0x28] sm:$0xff] }
 0x38d   :  { %2165 = vrot.lane.b32.xlu1 %v2146_v60, %s6602_s14 }
 0x38e   :  { %2101 = vrot.lane.b32.xlu0 %v7380_v8, %s6600_s12 }
 0x38f   :  { %v2076_v19 = vld [vmem:[#allocation2 + $0x6a] sm:$0xff] }
 0x390   :  { %v2085_v55 = vpack.c.bf16 %v2076_v19, %v2266_v5  ;;  %v2140_v6 = vld [vmem:[#allocation2 + $0x70] sm:$0xff] }
 0x391   :  { %2293 = vrot.lane.b32.xlu1 %v2274_v9, %s6609_s3  ;;  %v2332_v23 = vld [vmem:[#allocation2 + $0x78] sm:$0xff]  ;;  %v2394_v8 = vld [vmem:[#allocation2 + $0x69] sm:$0xff]  ;;  %v2149_v33 = vpack.c.bf16 %v2140_v6, %v7428_v3 }
 0x392   :  { %2229 = vrot.lane.b32.xlu0 %v2210_v4, %s6606_s24  ;;  %v2268_v10 = vld [vmem:[#allocation2 + $0x72] sm:$0xff]  ;;  %v2341_v34 = vpack.c.bf16 %v2332_v23, %v2140_v6  ;;  %v2078_v11 = vld [vmem:[#allocation2 + $0x7a] sm:$0xff]  ;;  %2476 = vst.msk [vmem:[#allocation3 + $0x80] sm:$0xff] %vm1039_vm11, %v2085_v55  ;;  %v2404_v31 = vpack.c.bf16 %v2394_v8, %v2202_v28  ;;  %v2150_v37 = vpack.c.bf16 %v2142_v38, %v2332_v23  ;;  %v6409_v9 = vld [vmem:[%s7279_s19 + $0x24] ss:$8 sps:$4 sm:$0xff]  }
 0x393   :  { %v2086_v17 = vpack.c.bf16 %v2078_v11, %v2268_v10  ;;  %v2204_v13 = vld [vmem:[#allocation2 + $0x71] sm:$0xff]  ;;  %v2277_v12 = vpack.c.bf16 %v2268_v10, %v2076_v19  ;;  %v2014_v35 = vld [vmem:[#allocation2 + $0x79] sm:$0xff]  ;;  %v2278_v25 = vpack.c.bf16 %v7316_v32, %v2078_v11  ;;  %v2596_v23 = vmul.bf16 %v6409_v9, %v2484_v54  ;;  %v6413_v38 = vld [vmem:[%s7279_s19 + $0x44] ss:$8 sps:$4 sm:$0xff]  }
 0x394   :  { %1998 = vst.msk [vmem:[#allocation3 + $0xa8] sm:$0xff] %vm1039_vm11, %v2341_v34  ;;  %v2022_v36 = vpack.c.bf16 %v2014_v35, %v2204_v13  ;;  %v2214_v40 = vpack.c.bf16 %v2206_v39, %v2014_v35  ;;  %v2497_v3 = vld [vmem:[%s7279_s19 + $0x10] sm:$0xff] }
 0x395   :  { %2421 = vrot.lane.b32.xlu1 %v2402_v15, %s6611_s5  ;;  %2477 = vst.msk [vmem:[#allocation3 + $0x98] sm:$0xff] %vm1039_vm11, %v2086_v17 }
 0x396   :  { %2357 = vrot.lane.b32.xlu0 %v7392_v30, %s6610_s4  ;;  %v2213_v30 = vpack.c.bf16 %v2204_v13, %v2394_v8 }
 0x399   :  { %2103 = vrot.lane.b32.xlu1 %v2083_v48, %s6600_s12 }
 0x39a   :  { %2039 = vrot.lane.b32.xlu0 %v2402_v15, %s6598_s10 }
 0x39d   :  { %2231 = vrot.lane.b32.xlu1 %v2211_v22, %s6606_s24 }
 0x39e   :  { %2167 = vrot.lane.b32.xlu0 %v2147_v24, %s6602_s14 }
 0x3a1   :  { %2359 = vrot.lane.b32.xlu1 %v2339_v47, %s6610_s4 }
 0x3a2   :  { %2295 = vrot.lane.b32.xlu0 %v2275_v26, %s6609_s3 }
 0x3a5   :  { %2041 = vrot.lane.b32.xlu1 %v2403_v27, %s6598_s10 }
 0x3a6   :  { %2423 = vrot.lane.b32.xlu0 %v2403_v27, %s6611_s5  ;;  %v2486_v27 = vld [vmem:[#allocation3 + $0x50] sm:$0xff] }
 0x3a7   :  { %v2598_v8 = vmul.bf16 %v6411_v52, %v2486_v27 }
 0x3a9   :  { %2169 = vrot.lane.b32.xlu1 %v2148_v45, %s6602_s14 }
 0x3aa   :  { %2105 = vrot.lane.b32.xlu0 %v2084_v43, %s6600_s12  ;;  %v2594_v43 = vmul.bf16 %v6407_v49, %v2482_v0 }
 0x3ad   :  { %2297 = vrot.lane.b32.xlu1 %v2276_v7, %s6609_s3 }
 0x3ae   :  { %2233 = vrot.lane.b32.xlu0 %v2212_v29, %s6606_s24 }
 0x3b1   :  { %2425 = vrot.lane.b32.xlu1 %v2404_v31, %s6611_s5 }
 0x3b2   :  { %2361 = vrot.lane.b32.xlu0 %v2340_v51, %s6610_s4  ;;  %v2498_v51 = vld [vmem:[%s7279_s19 + $0x18] sm:$0xff] }
 0x3b3   :  { %v5696_v4 = vcombine.low %v2497_v3, %v2498_v51  ;;  %v6417_v51 = vld [vmem:[%s7279_s19 + $0x64] ss:$8 sps:$4 sm:$0xff]  }
 0x3b5   :  { %2107 = vrot.lane.b32.xlu1 %v2085_v55, %s6600_s12 }
 0x3b6   :  { %2043 = vrot.lane.b32.xlu0 %v2404_v31, %s6598_s10 }
 0x3b9   :  { %2235 = vrot.lane.b32.xlu1 %v2213_v30, %s6606_s24  ;;  %v2501_v30 = vld [vmem:[%s7279_s19 + $0x30] sm:$0xff] }
 0x3ba   :  { %2171 = vrot.lane.b32.xlu0 %v2149_v33, %s6602_s14  ;;  %v2502_v33 = vld [vmem:[%s7279_s19 + $0x38] sm:$0xff] }
 0x3bd   :  { %2363 = vrot.lane.b32.xlu1 %v2341_v34, %s6610_s4 }
 0x3be   :  { %2299 = vrot.lane.b32.xlu0 %v2277_v12, %s6609_s3 }
 0x3c1   :  { %2045 = vrot.lane.b32.xlu1 %v2022_v36, %s6598_s10  ;;  %s6627_s10 = smov 20  }
 0x3c2   :  { %2427 = vrot.lane.b32.xlu0 %v2022_v36, %s6611_s5  ;;  %v5700_v36 = vcombine.low %v2501_v30, %v2502_v33  ;;  %v6421_v33 = vld [vmem:[%s7573_s26] sm:$0xff]  }
 0x3c3   :  { %6188 = vmatprep.mubr.bf16.mxu1 %v6421_v33 }
 0x3c5   :  { %2173 = vrot.lane.b32.xlu1 %v2150_v37, %s6602_s14  ;;  %s6630_s14 = smov 23  }
 0x3c6   :  { %2109 = vrot.lane.b32.xlu0 %v2086_v17, %s6600_s12  ;;  %v2499_v17 = vld [vmem:[%s7279_s19 + $0x20] sm:$0xff] }
 0x3c7   :  { %v5698_v26 = vcombine.low %v2499_v17, %v2500_v61  ;;  %v6419_v61 = vld [vmem:[%s7279_s19 + $0x74] ss:$8 sps:$4 sm:$0xff]  }
 0x3c9   :  { %2301 = vrot.lane.b32.xlu1 %v2278_v25, %s6609_s3  ;;  %v2488_v25 = vld [vmem:[#allocation3 + $0x68] sm:$0xff]  ;;  %s8008_s3 = sld [smem:[%s8091_s0 + %s6600_s12]]  }
 0x3ca   :  { %2237 = vrot.lane.b32.xlu0 %v2214_v40, %s6606_s24  ;;  %v2600_v14 = vmul.bf16 %v6413_v38, %v2488_v25 }
 0x3cd   :  { %2429 = vrot.lane.b32.xlu1 %v2406_v44, %s6611_s5  ;;  %s7601_s5 = sld [smem:[%s8091_s0 + %s6618_s1]]   ;;  %s6624_s1 = smov 17  }
 0x3ce   :  { %2365 = vrot.lane.b32.xlu0 %v2342_v46, %s6610_s4 }
 0x3d3   :  { %v2096_v48 = vpop.permute.xlu1 %2095 }
 0x3d4   :  { %v2032_v56 = vpop.permute.xlu0 %2031 }
 0x3d5   :  { %2055 = vst.msk [vmem:[#allocation3] sm:$0xff] %vm1160_vm12, %v2032_v56 }
 0x3d6   :  { %2119 = vst.msk [vmem:[#allocation3] sm:$0xff] %vm1225_vm13, %v2096_v48 }
 0x3d7   :  { %v2224_v32 = vpop.permute.xlu1 %2223 }
 0x3d8   :  { %v2160_v20 = vpop.permute.xlu0 %2159 }
 0x3d9   :  { %2183 = vst.msk [vmem:[#allocation3] sm:$0xff] %vm1290_vm14, %v2160_v20  ;;  %v2504_v20 = vld [vmem:[%s7279_s19 + $0x48] sm:$0xff] }
 0x3da   :  { %2247 = vst.msk [vmem:[#allocation3] sm:$0xff] %vm1355_vm15, %v2224_v32  ;;  %v2503_v32 = vld [vmem:[%s7279_s19 + $0x40] sm:$0xff] }
 0x3db   :  { %v2352_v47 = vpop.permute.xlu1 %2351 }
 0x3dc   :  { %v2288_v57 = vpop.permute.xlu0 %2287 }
 0x3dd   :  { %2311 = vst.msk [vmem:[#allocation3] sm:$0xff] %vm1420_vm0, %v2288_v57 }
 0x3de   :  { %2375 = vst.msk [vmem:[#allocation3] sm:$0xff] %vm1485_vm1, %v2352_v47 }
 0x3df   :  { %v2034_v58 = vpop.permute.xlu1 %2033 }
 0x3e0   :  { %v2416_v59 = vpop.permute.xlu0 %2415  ;;  %2056 = vst.msk [vmem:[#allocation3 + $0x18] sm:$0xff] %vm1160_vm12, %v2034_v58  ;;  %v5702_v58 = vcombine.low %v2503_v32, %v2504_v20 }
 0x3e1   :  { %2439 = vst.msk [vmem:[#allocation3] sm:$0xff] %vm1550_vm2, %v2416_v59  ;;  %v6415_v59 = vld [vmem:[%s7279_s19 + $0x54] ss:$8 sps:$4 sm:$0xff]  }
 0x3e3   :  { %v2162_v62 = vpop.permute.xlu1 %2161 }
 0x3e4   :  { %v2098_v63 = vpop.permute.xlu0 %2097 }
 0x3e5   :  { %2120 = vst.msk [vmem:[#allocation3 + $0x18] sm:$0xff] %vm1225_vm13, %v2098_v63 }
 0x3e6   :  { %2184 = vst.msk [vmem:[#allocation3 + $0x18] sm:$0xff] %vm1290_vm14, %v2162_v62  ;;  %v2490_v62 = vld [vmem:[#allocation3 + $0x80] sm:$0xff] }
 0x3e7   :  { %v2290_v18 = vpop.permute.xlu1 %2289 }
 0x3e8   :  { %v2226_v21 = vpop.permute.xlu0 %2225  ;;  %v2479_v41 = vld [vmem:[#allocation3] sm:$0xff] }
 0x3e9   :  { %2248 = vst.msk [vmem:[#allocation3 + $0x18] sm:$0xff] %vm1355_vm15, %v2226_v21  ;;  %v2591_v50 = vmul.bf16 %v6395_v16, %v2479_v41 }
 0x3ea   :  { %2312 = vst.msk [vmem:[#allocation3 + $0x18] sm:$0xff] %vm1420_vm0, %v2290_v18  ;;  %v2602_v18 = vmul.bf16 %v6415_v59, %v2490_v62 }
 0x3eb   :  { %2743 = vmatmul.mubr.bf16.vlgmr.msra.gmra.mrb[16].mxu0 %v2591_v50  ;;  %v2418_v1 = vpop.permute.xlu1 %2417  ;;  %v2505_v50 = vld [vmem:[%s7279_s19 + $0x50] sm:$0xff] }
 0x3ec   :  { %5721 = vmatprep.mubr.msk.bf16.mxu0 %vm1039_vm11, %v2594_v43  ;;  %v2354_v2 = vpop.permute.xlu0 %2353  ;;  %v2506_v43 = vld [vmem:[%s7279_s19 + $0x58] sm:$0xff] }
 0x3ed   :  { %2376 = vst.msk [vmem:[#allocation3 + $0x18] sm:$0xff] %vm1485_vm1, %v2354_v2  ;;  %v5704_v3 = vcombine.low %v2505_v50, %v2506_v43 }
 0x3ee   :  { %2440 = vst.msk [vmem:[#allocation3 + $0x18] sm:$0xff] %vm1550_vm2, %v2418_v1 }
 0x3ef   :  { %v2100_v60 = vpop.permute.xlu1 %2099 }
 0x3f0   :  { %v2036_v53 = vpop.permute.xlu0 %2035 }
 0x3f1   :  { %2057 = vst.msk [vmem:[#allocation3 + $0x30] sm:$0xff] %vm1160_vm12, %v2036_v53 }
 0x3f2   :  { %2121 = vst.msk [vmem:[#allocation3 + $0x30] sm:$0xff] %vm1225_vm13, %v2100_v60 }
 0x3f3   :  { %v2228_v5 = vpop.permute.xlu1 %2227 }
 0x3f4   :  { %v2164_v19 = vpop.permute.xlu0 %2163 }
 0x3f5   :  { %2185 = vst.msk [vmem:[#allocation3 + $0x30] sm:$0xff] %vm1290_vm14, %v2164_v19  ;;  %v2481_v55 = vld [vmem:[#allocation3 + $0x18] sm:$0xff] }
 0x3f6   :  { %2249 = vst.msk [vmem:[#allocation3 + $0x30] sm:$0xff] %vm1355_vm15, %v2228_v5  ;;  %v2593_v6 = vmul.bf16 %v5696_v4, %v2481_v55  ;;  %v2492_v4 = vld [vmem:[#allocation3 + $0x98] sm:$0xff] }
 0x3f7   :  { %v2356_v10 = vpop.permute.xlu1 %2355  ;;  %v2604_v19 = vmul.bf16 %v6417_v51, %v2492_v4 }
 0x3f8   :  { %2751 = vmatmul.mubr.bf16.gmra.mrb[20].mxu0 %v2593_v6  ;;  %v2292_v34 = vpop.permute.xlu0 %2291 }
 0x3f9   :  { %2313 = vst.msk [vmem:[#allocation3 + $0x30] sm:$0xff] %vm1420_vm0, %v2292_v34  ;;  %5722 = vmatprep.mubr.msk.bf16.mxu0 %vm1039_vm11, %v2596_v23  ;;  %v2508_v34 = vld [vmem:[%s7279_s19 + $0x68] sm:$0xff] }
 0x3fa   :  { %2377 = vst.msk [vmem:[#allocation3 + $0x30] sm:$0xff] %vm1485_vm1, %v2356_v10  ;;  %v2507_v10 = vld [vmem:[%s7279_s19 + $0x60] sm:$0xff] }
 0x3fb   :  { %v2038_v11 = vpop.permute.xlu1 %2037  ;;  %v5706_v17 = vcombine.low %v2507_v10, %v2508_v34 }
 0x3fc   :  { %v2420_v15 = vpop.permute.xlu0 %2419  ;;  %2058 = vst.msk [vmem:[#allocation3 + $0x48] sm:$0xff] %vm1160_vm12, %v2038_v11 }
 0x3fd   :  { %2441 = vst.msk [vmem:[#allocation3 + $0x30] sm:$0xff] %vm1550_vm2, %v2420_v15 }
 0x3ff   :  { %v2166_v22 = vpop.permute.xlu1 %2165 }
 0x400   :  { %v2102_v24 = vpop.permute.xlu0 %2101 }
 0x401   :  { %2122 = vst.msk [vmem:[#allocation3 + $0x48] sm:$0xff] %vm1225_vm13, %v2102_v24 }
 0x402   :  { %2186 = vst.msk [vmem:[#allocation3 + $0x48] sm:$0xff] %vm1290_vm14, %v2166_v22  ;;  %v2494_v22 = vld [vmem:[#allocation3 + $0xb0] sm:$0xff] }
 0x403   :  { %v2294_v45 = vpop.permute.xlu1 %2293 }
 0x404   :  { %v2230_v28 = vpop.permute.xlu0 %2229  ;;  %v2483_v29 = vld [vmem:[#allocation3 + $0x30] sm:$0xff] }
 0x405   :  { %2250 = vst.msk [vmem:[#allocation3 + $0x48] sm:$0xff] %vm1355_vm15, %v2230_v28  ;;  %v2595_v7 = vmul.bf16 %v5698_v26, %v2483_v29 }
 0x406   :  { %2314 = vst.msk [vmem:[#allocation3 + $0x48] sm:$0xff] %vm1420_vm0, %v2294_v45  ;;  %v2606_v45 = vmul.bf16 %v6419_v61, %v2494_v22 }
 0x407   :  { %2759 = vmatmul.mubr.bf16.gmra.mrb[24].mxu0 %v2595_v7  ;;  %v2422_v31 = vpop.permute.xlu1 %2421  ;;  %v2509_v7 = vld [vmem:[%s7279_s19 + $0x70] sm:$0xff] }
 0x408   :  { %5723 = vmatprep.mubr.msk.bf16.mxu0 %vm1039_vm11, %v2598_v8  ;;  %v2358_v13 = vpop.permute.xlu0 %2357  ;;  %v2510_v8 = vld [vmem:[%s7279_s19 + $0x78] sm:$0xff]  ;;  %s7675_s19 = sld [smem:[%s8091_s0 + %s6620_s16]]  }
 0x409   :  { %2378 = vst.msk [vmem:[#allocation3 + $0x48] sm:$0xff] %vm1485_vm1, %v2358_v13  ;;  %s7833_s16 = sld [smem:[%s8091_s0 + %s6627_s10]]  }
 0x40a   :  { %2442 = vst.msk [vmem:[#allocation3 + $0x48] sm:$0xff] %vm1550_vm2, %v2422_v31  ;;  %v5708_v31 = vcombine.low %v2509_v7, %v2510_v8  ;;  %s5620_s10 = sld [smem:[%s8091_s0 + %s6599_s11]]   ;;  %s6640_s11 = smov 35  }
 0x40b   :  { %v2104_v12 = vpop.permute.xlu1 %2103  ;;  %s5631_s18 = sld [smem:[%s8091_s0 + %s6640_s11]]  }
 0x40c   :  { %v2040_v35 = vpop.permute.xlu0 %2039 }
 0x40d   :  { %2059 = vst.msk [vmem:[#allocation3 + $0x60] sm:$0xff] %vm1160_vm12, %v2040_v35 }
 0x40e   :  { %2123 = vst.msk [vmem:[#allocation3 + $0x60] sm:$0xff] %vm1225_vm13, %v2104_v12  ;;  %v7579_v12 = vld [vmem:[%s5605_s30] ss:$0 sm:$0xff]  ;;  %s7752_s30 = sld [smem:[%s8091_s0 + %s6623_s27]]  }
 0x40f   :  { %v2232_v37 = vpop.permute.xlu1 %2231  ;;  %s7851_s27 = sld [smem:[%s8091_s0 + %s6630_s14]]   ;;  %s6636_s14 = smov 28  }
 0x410   :  { %v2168_v39 = vpop.permute.xlu0 %2167 }
 0x411   :  { %2187 = vst.msk [vmem:[#allocation3 + $0x60] sm:$0xff] %vm1290_vm14, %v2168_v39  ;;  %v2485_v40 = vld [vmem:[#allocation3 + $0x48] sm:$0xff] }
 0x412   :  { %2251 = vst.msk [vmem:[#allocation3 + $0x60] sm:$0xff] %vm1355_vm15, %v2232_v37  ;;  %v2597_v42 = vmul.bf16 %v5700_v36, %v2485_v40 }
 0x413   :  { %v2360_v44 = vpop.permute.xlu1 %2359 }
 0x414   :  { %2767 = vmatmul.mubr.bf16.gmra.mrb[28].mxu0 %v2597_v42  ;;  %v2296_v46 = vpop.permute.xlu0 %2295 }
 0x415   :  { %2315 = vst.msk [vmem:[#allocation3 + $0x60] sm:$0xff] %vm1420_vm0, %v2296_v46  ;;  %5724 = vmatprep.mubr.msk.bf16.mxu0 %vm1039_vm11, %v2600_v14 }
 0x416   :  { %2379 = vst.msk [vmem:[#allocation3 + $0x60] sm:$0xff] %vm1485_vm1, %v2360_v44 }
 0x417   :  { %v2042_v48 = vpop.permute.xlu1 %2041 }
 0x418   :  { %v2424_v56 = vpop.permute.xlu0 %2423  ;;  %2060 = vst.msk [vmem:[#allocation3 + $0x78] sm:$0xff] %vm1160_vm12, %v2042_v48 }
 0x419   :  { %2443 = vst.msk [vmem:[#allocation3 + $0x60] sm:$0xff] %vm1550_vm2, %v2424_v56 }
 0x41b   :  { %v2170_v47 = vpop.permute.xlu1 %2169 }
 0x41c   :  { %v2106_v57 = vpop.permute.xlu0 %2105 }
 0x41d   :  { %2124 = vst.msk [vmem:[#allocation3 + $0x78] sm:$0xff] %vm1225_vm13, %v2106_v57 }
 0x41e   :  { %2188 = vst.msk [vmem:[#allocation3 + $0x78] sm:$0xff] %vm1290_vm14, %v2170_v47 }
 0x41f   :  { %v2298_v63 = vpop.permute.xlu1 %2297 }
 0x420   :  { %v2234_v16 = vpop.permute.xlu0 %2233  ;;  %v2487_v49 = vld [vmem:[#allocation3 + $0x60] sm:$0xff] }
 0x421   :  { %2252 = vst.msk [vmem:[#allocation3 + $0x78] sm:$0xff] %vm1355_vm15, %v2234_v16  ;;  %v2599_v0 = vmul.bf16 %v5702_v58, %v2487_v49 }
 0x422   :  { %2316 = vst.msk [vmem:[#allocation3 + $0x78] sm:$0xff] %vm1420_vm0, %v2298_v63 }
 0x423   :  { %2775 = vmatmul.mubr.bf16.gmra.mrb[32].mxu0 %v2599_v0  ;;  %v2426_v21 = vpop.permute.xlu1 %2425 }
 0x424   :  { %5725 = vmatprep.mubr.msk.bf16.mxu0 %vm1039_vm11, %v2602_v18  ;;  %v2362_v41 = vpop.permute.xlu0 %2361 }
 0x425   :  { %2380 = vst.msk [vmem:[#allocation3 + $0x78] sm:$0xff] %vm1485_vm1, %v2362_v41 }
 0x426   :  { %2444 = vst.msk [vmem:[#allocation3 + $0x78] sm:$0xff] %vm1550_vm2, %v2426_v21 }
 0x427   :  { %v2108_v1 = vpop.permute.xlu1 %2107 }
 0x428   :  { %v2044_v2 = vpop.permute.xlu0 %2043 }
 0x429   :  { %2061 = vst.msk [vmem:[#allocation3 + $0x90] sm:$0xff] %vm1160_vm12, %v2044_v2 }
 0x42a   :  { %2125 = vst.msk [vmem:[#allocation3 + $0x90] sm:$0xff] %vm1225_vm13, %v2108_v1 }
 0x42b   :  { %v2236_v60 = vpop.permute.xlu1 %2235 }
 0x42c   :  { %v2172_v53 = vpop.permute.xlu0 %2171 }
 0x42d   :  { %2189 = vst.msk [vmem:[#allocation3 + $0x90] sm:$0xff] %vm1290_vm14, %v2172_v53  ;;  %v2489_v9 = vld [vmem:[#allocation3 + $0x78] sm:$0xff] }
 0x42e   :  { %2253 = vst.msk [vmem:[#allocation3 + $0x90] sm:$0xff] %vm1355_vm15, %v2236_v60  ;;  %v2601_v5 = vmul.bf16 %v5704_v3, %v2489_v9 }
 0x42f   :  { %v2364_v54 = vpop.permute.xlu1 %2363 }
 0x430   :  { %2783 = vmatmul.mubr.bf16.gmra.mrb[36].mxu0 %v2601_v5  ;;  %v2300_v55 = vpop.permute.xlu0 %2299 }
 0x431   :  { %2317 = vst.msk [vmem:[#allocation3 + $0x90] sm:$0xff] %vm1420_vm0, %v2300_v55  ;;  %5726 = vmatprep.mubr.msk.bf16.mxu0 %vm1039_vm11, %v2604_v19 }
 0x432   :  { %2381 = vst.msk [vmem:[#allocation3 + $0x90] sm:$0xff] %vm1485_vm1, %v2364_v54 }
 0x433   :  { %v2046_v6 = vpop.permute.xlu1 %2045 }
 0x434   :  { %v2428_v23 = vpop.permute.xlu0 %2427  ;;  %2062 = vst.msk [vmem:[#allocation3 + $0xa8] sm:$0xff] %vm1160_vm12, %v2046_v6 }
 0x435   :  { %2445 = vst.msk [vmem:[#allocation3 + $0x90] sm:$0xff] %vm1550_vm2, %v2428_v23 }
 0x437   :  { %v2174_v11 = vpop.permute.xlu1 %2173 }
 0x438   :  { %v2110_v15 = vpop.permute.xlu0 %2109 }
 0x439   :  { %2126 = vst.msk [vmem:[#allocation3 + $0xa8] sm:$0xff] %vm1225_vm13, %v2110_v15 }
 0x43a   :  { %2190 = vst.msk [vmem:[#allocation3 + $0xa8] sm:$0xff] %vm1290_vm14, %v2174_v11 }
 0x43b   :  { %v2302_v24 = vpop.permute.xlu1 %2301 }
 0x43c   :  { %v2238_v26 = vpop.permute.xlu0 %2237  ;;  %v2491_v52 = vld [vmem:[#allocation3 + $0x90] sm:$0xff] }
 0x43d   :  { %2254 = vst.msk [vmem:[#allocation3 + $0xa8] sm:$0xff] %vm1355_vm15, %v2238_v26  ;;  %v2603_v27 = vmul.bf16 %v5706_v17, %v2491_v52 }
 0x43e   :  { %2318 = vst.msk [vmem:[#allocation3 + $0xa8] sm:$0xff] %vm1420_vm0, %v2302_v24 }
 0x43f   :  { %2791 = vmatmul.mubr.bf16.gmra.mrb[40].mxu0 %v2603_v27  ;;  %v2430_v28 = vpop.permute.xlu1 %2429 }
 0x440   :  { %5727 = vmatprep.mubr.msk.bf16.mxu0 %vm1039_vm11, %v2606_v45  ;;  %v2366_v29 = vpop.permute.xlu0 %2365 }
 0x441   :  { %2382 = vst.msk [vmem:[#allocation3 + $0xa8] sm:$0xff] %vm1485_vm1, %v2366_v29 }
 0x442   :  { %2446 = vst.msk [vmem:[#allocation3 + $0xa8] sm:$0xff] %vm1550_vm2, %v2430_v28 }
 0x449   :  { %v2493_v13 = vld [vmem:[#allocation3 + $0xa8] sm:$0xff] }
 0x44a   :  { %v2605_v30 = vmul.bf16 %v5708_v31, %v2493_v13 }
 0x44c   :  { %2799 = vmatmul.mubr.bf16.gmra.mrb[44].mxu0 %v2605_v30 }
 0x4be   :  { %v2744_v35 = vpop.f32.mrb[16].mxu0 }
 0x4bf   :  { %v2745_v36 = vadd.f32 %v7579_v12, %v2744_v35  ;;  %v2746_v38 = vpop.f32.mrb[17].mxu0 }
 0x4c0   :  { %v2747_v37 = vpop.f32.mrb[18].mxu0 }
 0x4c1   :  { %v2748_v39 = vadd.f32 %v7579_v12, %v2747_v37  ;;  %v2749_v25 = vpop.f32.mrb[19].mxu0  ;;  %v2807_v40 = vmax.f32 %v2745_v36, 0.0 }
 0x4c3   :  { %v2808_v42 = vmax.f32 %v2748_v39, 0.0 }
 0x4c5   :  { %v2827_v14 = vpack.c.bf16 %v2808_v42, %v2807_v40 }
 0x4c7   :  { %6172 = vmatprep.subr.bf16.mxu1 %v2827_v14 }
 0x4c8   :  { %6173 = vmatpush3.bf16.msra.mxu1 %v2827_v14 }
 0x4cb   :  { %v2752_v44 = vpop.f32.mrb[20].mxu0 }
 0x4cc   :  { %v2753_v46 = vadd.f32 %v7579_v12, %v2752_v44  ;;  %v2754_v48 = vpop.f32.mrb[21].mxu0  ;;  %v6422_v44 = vld [vmem:[%s7573_s26 + $0x8] sm:$0xff]   ;;  %s5609_s26 = sld [smem:[%s8091_s0 + %s6622_s9]]  }
 0x4cd   :  { %v2755_v56 = vpop.f32.mrb[22].mxu0  ;;  %v6427_v48 = vld [vmem:[%s7601_s5 + $0x40] sm:$0xff]   ;;  %s5617_s9 = sld [smem:[%s8091_s0 + %s6629_s21]]   ;;  %s6635_s21 = smov 30  }
 0x4ce   :  { %v2756_v32 = vadd.f32 %v7579_v12, %v2755_v56  ;;  %v2757_v20 = vpop.f32.mrb[23].mxu0  ;;  %v2809_v47 = vmax.f32 %v2753_v46, 0.0  ;;  %v6424_v46 = vld [vmem:[%s7601_s5 + $0x88] sm:$0xff]   ;;  %v6428_v56 = vld [vmem:[%s7601_s5] sm:$0xff]   ;;  %5934 = vmatprep.subr.bf16.mxu0 %v6427_v48 }
 0x4cf   :  { %v6430_v20 = vld [vmem:[%s7601_s5 + $0x8] sm:$0xff]   ;;  %5935 = vmatpush3.bf16.msra.mxu0 %v6428_v56 }
 0x4d0   :  { %v2810_v57 = vmax.f32 %v2756_v32, 0.0  ;;  %v6429_v32 = vld [vmem:[%s7601_s5 + $0x48] sm:$0xff]  }
 0x4d1   :  { %5936 = vmatprep.subr.bf16.mxu0 %v6429_v32 }
 0x4d2   :  { %v2828_v58 = vpack.c.bf16 %v2810_v57, %v2809_v47  ;;  %v6431_v47 = vld [vmem:[%s7601_s5 + $0x50] sm:$0xff]  }
 0x4d3   :  { %5937 = vmatpush3.bf16.msra.mxu0 %v6430_v20  ;;  %v6432_v57 = vld [vmem:[%s7601_s5 + $0x10] sm:$0xff]  }
 0x4d4   :  { %6174 = vmatprep.subr.bf16.mxu1 %v2828_v58  ;;  %5938 = vmatprep.subr.bf16.mxu0 %v6431_v47 }
 0x4d5   :  { %6175 = vmatpush3.bf16.msra.mxu1 %v2828_v58  ;;  %v6433_v58 = vld [vmem:[%s7601_s5 + $0x58] sm:$0xff]  }
 0x4d7   :  { %5939 = vmatpush3.bf16.msra.mxu0 %v6432_v57 }
 0x4d8   :  { %5940 = vmatprep.subr.bf16.mxu0 %v6433_v58 }
 0x4da   :  { %v2760_v59 = vpop.f32.mrb[24].mxu0 }
 0x4db   :  { %v2761_v62 = vadd.f32 %v7579_v12, %v2760_v59  ;;  %v2762_v63 = vpop.f32.mrb[25].mxu0  ;;  %v6434_v59 = vld [vmem:[%s7601_s5 + $0x18] sm:$0xff]  }
 0x4dc   :  { %v2763_v16 = vpop.f32.mrb[26].mxu0  ;;  %5941 = vmatpush3.bf16.msra.mxu0 %v6434_v59  ;;  %v6436_v63 = vld [vmem:[%s7601_s5 + $0x20] sm:$0xff]  }
 0x4dd   :  { %v2764_v49 = vadd.f32 %v7579_v12, %v2763_v16  ;;  %v2765_v0 = vpop.f32.mrb[27].mxu0  ;;  %v2811_v18 = vmax.f32 %v2761_v62, 0.0  ;;  %v6435_v62 = vld [vmem:[%s7601_s5 + $0x60] sm:$0xff]  }
 0x4de   :  { %5942 = vmatprep.subr.bf16.mxu0 %v6435_v62  ;;  %v6437_v0 = vld [vmem:[%s7601_s5 + $0x68] sm:$0xff]  }
 0x4df   :  { %v2812_v21 = vmax.f32 %v2764_v49, 0.0 }
 0x4e0   :  { %5943 = vmatpush3.bf16.msra.mxu0 %v6436_v63 }
 0x4e1   :  { %v2829_v41 = vpack.c.bf16 %v2812_v21, %v2811_v18  ;;  %5944 = vmatprep.subr.bf16.mxu0 %v6437_v0 }
 0x4e3   :  { %6176 = vmatprep.subr.bf16.mxu1 %v2829_v41 }
 0x4e4   :  { %6177 = vmatpush3.bf16.msra.mxu1 %v2829_v41  ;;  %v6438_v41 = vld [vmem:[%s7601_s5 + $0x28] sm:$0xff]  }
 0x4e5   :  { %5945 = vmatpush3.bf16.msra.mxu0 %v6438_v41 }
 0x4e7   :  { %v2768_v50 = vpop.f32.mrb[28].mxu0 }
 0x4e8   :  { %v2769_v43 = vadd.f32 %v7579_v12, %v2768_v50  ;;  %v2770_v1 = vpop.f32.mrb[29].mxu0  ;;  %v6439_v50 = vld [vmem:[%s7601_s5 + $0x70] sm:$0xff]  }
 0x4e9   :  { %v2771_v2 = vpop.f32.mrb[30].mxu0  ;;  %5946 = vmatprep.subr.bf16.mxu0 %v6439_v50 }
 0x4ea   :  { %v2772_v3 = vadd.f32 %v7579_v12, %v2771_v2  ;;  %v2773_v51 = vpop.f32.mrb[31].mxu0  ;;  %v2813_v60 = vmax.f32 %v2769_v43, 0.0 }
 0x4ec   :  { %v2814_v53 = vmax.f32 %v2772_v3, 0.0 }
 0x4ee   :  { %v2830_v4 = vpack.c.bf16 %v2814_v53, %v2813_v60 }
 0x4f0   :  { %6178 = vmatprep.subr.bf16.mxu1 %v2830_v4 }
 0x4f1   :  { %6179 = vmatpush3.bf16.msra.mxu1 %v2830_v4 }
 0x4f6   :  { %v2776_v9 = vpop.f32.mrb[32].mxu0 }
 0x4f7   :  { %v2777_v5 = vadd.f32 %v7579_v12, %v2776_v9  ;;  %v2778_v19 = vpop.f32.mrb[33].mxu0 }
 0x4f8   :  { %v2779_v54 = vpop.f32.mrb[34].mxu0 }
 0x4f9   :  { %v2780_v55 = vadd.f32 %v7579_v12, %v2779_v54  ;;  %v2781_v6 = vpop.f32.mrb[35].mxu0  ;;  %v2815_v23 = vmax.f32 %v2777_v5, 0.0 }
 0x4fb   :  { %v2816_v10 = vmax.f32 %v2780_v55, 0.0 }
 0x4fd   :  { %v2831_v34 = vpack.c.bf16 %v2816_v10, %v2815_v23 }
 0x4ff   :  { %6180 = vmatprep.subr.bf16.mxu1 %v2831_v34 }
 0x500   :  { %6181 = vmatpush3.bf16.msra.mxu1 %v2831_v34 }
 0x503   :  { %v2784_v11 = vpop.f32.mrb[36].mxu0 }
 0x504   :  { %v2785_v15 = vadd.f32 %v7579_v12, %v2784_v11  ;;  %v2786_v17 = vpop.f32.mrb[37].mxu0 }
 0x505   :  { %v2787_v61 = vpop.f32.mrb[38].mxu0 }
 0x506   :  { %v2788_v22 = vadd.f32 %v7579_v12, %v2787_v61  ;;  %v2789_v24 = vpop.f32.mrb[39].mxu0  ;;  %v2817_v26 = vmax.f32 %v2785_v15, 0.0 }
 0x508   :  { %v2818_v52 = vmax.f32 %v2788_v22, 0.0 }
 0x50a   :  { %v2832_v27 = vpack.c.bf16 %v2818_v52, %v2817_v26 }
 0x50c   :  { %6182 = vmatprep.subr.bf16.mxu1 %v2832_v27 }
 0x50d   :  { %6183 = vmatpush3.bf16.msra.mxu1 %v2832_v27 }
 0x512   :  { %v2792_v45 = vpop.f32.mrb[40].mxu0 }
 0x513   :  { %v2793_v28 = vadd.f32 %v7579_v12, %v2792_v45  ;;  %v2794_v29 = vpop.f32.mrb[41].mxu0 }
 0x514   :  { %v2795_v7 = vpop.f32.mrb[42].mxu0 }
 0x515   :  { %v2796_v8 = vadd.f32 %v7579_v12, %v2795_v7  ;;  %v2797_v31 = vpop.f32.mrb[43].mxu0  ;;  %v2819_v13 = vmax.f32 %v2793_v28, 0.0  ;;  %v6425_v28 = vld [vmem:[%s7606_s15 + $0x8] ss:$12 sps:$4 sm:$0xff]  }
 0x517   :  { %v2820_v30 = vmax.f32 %v2796_v8, 0.0 }
 0x519   :  { %v2833_v33 = vpack.c.bf16 %v2820_v30, %v2819_v13 }
 0x51b   :  { %6184 = vmatprep.subr.bf16.mxu1 %v2833_v33 }
 0x51c   :  { %6185 = vmatpush3.bf16.msra.mxu1 %v2833_v33 }
 0x51f   :  { %v2800_v35 = vpop.f32.mrb[44].mxu0 }
 0x520   :  { %v2801_v36 = vadd.f32 %v7579_v12, %v2800_v35  ;;  %v2802_v38 = vpop.f32.mrb[45].mxu0  ;;  %v6440_v35 = vld [vmem:[%s7601_s5 + $0x30] sm:$0xff]  }
 0x521   :  { %v2803_v37 = vpop.f32.mrb[46].mxu0  ;;  %5947 = vmatpush3.bf16.msra.mxu0 %v6440_v35  ;;  %v5736_v35 = vld [vmem:[%s5609_s26] ss:$0 sm:$0xff]  ;;  %s6643_s26 = smov 36  }
 0x522   :  { %v2804_v39 = vadd.f32 %v7579_v12, %v2803_v37  ;;  %v2805_v25 = vpop.f32.mrb[47].mxu0  ;;  %v2821_v40 = vmax.f32 %v2801_v36, 0.0  ;;  %v6423_v12 = vld [vmem:[%s7601_s5 + $0x80] sm:$0xff]   ;;  %s5632_s29 = sld [smem:[%s8091_s0 + %s6643_s26]]  }
 0x523   :  { %v6441_v25 = vld [vmem:[%s7601_s5 + $0x78] sm:$0xff]  }
 0x524   :  { %v2822_v42 = vmax.f32 %v2804_v39, 0.0  ;;  %5948 = vmatprep.subr.bf16.mxu0 %v6441_v25 }
 0x526   :  { %v2834_v14 = vpack.c.bf16 %v2822_v42, %v2821_v40  ;;  %v6426_v40 = vld [vmem:[%s7606_s15 + $0x20] ss:$12 sps:$4 sm:$0xff]  }
 0x528   :  { %6186 = vmatprep.subr.bf16.mxu1 %v2834_v14 }
 0x529   :  { %6187 = vmatpush3.bf16.msra.mxu1 %v2834_v14  ;;  %v6442_v14 = vld [vmem:[%s7601_s5 + $0x38] sm:$0xff]   ;;  %s7759_s5 = sld [smem:[%s8091_s0 + %s6624_s1]]  }
 0x52a   :  { %6192 = vmatprep.subr.bf16.mxu1 %v6423_v12  ;;  %5949 = vmatpush3.bf16.msra.mxu0 %v6442_v14  ;;  %s7871_s1 = sld [smem:[%s8091_s0 + %s6631_s28]]   ;;  %s6637_s28 = smov 29  }
 0x52c   :  { %6189 = vmatmul.mubr.bf16.vlgmr.msra.gmra.mrb[32].mxu1 %v6422_v44 }
 0x52d   :  { %6193 = vmatpush3.bf16.msra.mxu1 %v6423_v12 }
 0x52e   :  { %6194 = vmatprep.subr.bf16.mxu1 %v6424_v46 }
 0x531   :  { %6195 = vmatpush3.bf16.msra.mxu1 %v6424_v46 }
 0x5ff   :  { %v6190_v16 = vpop.f32.mrb[32].mxu1 }
 0x600   :  { %v2881_v49 = vpop.f32.mrb[33].mxu1  ;;  %2899 = vst.msk [vmem:[#allocation2 + $0x10] sm:$0xff] %vm2896_vm3, %v6190_v16  ;;  %2903 = vst.msk [vmem:[#allocation2 + $0x30] sm:$0xff] %vm2896_vm3, %v6190_v16 }
 0x601   :  { %2897 = vst.msk [vmem:[#allocation2] sm:$0xff] %vm2896_vm3, %v2881_v49  ;;  %2901 = vst.msk [vmem:[#allocation2 + $0x20] sm:$0xff] %vm2896_vm3, %v2881_v49  ;;  %v6191_v18 = vpop.f32.mrb[34].mxu1 }
 0x602   :  { %2900 = vst.msk [vmem:[#allocation2 + $0x18] sm:$0xff] %vm2896_vm3, %v6191_v18  ;;  %2904 = vst.msk [vmem:[#allocation2 + $0x38] sm:$0xff] %vm2896_vm3, %v6191_v18  ;;  %v2884_v21 = vpop.f32.mrb[35].mxu1 }
 0x603   :  { %2898 = vst.msk [vmem:[#allocation2 + $0x8] sm:$0xff] %vm2896_vm3, %v2884_v21  ;;  %2902 = vst.msk [vmem:[#allocation2 + $0x28] sm:$0xff] %vm2896_vm3, %v2884_v21 }
 0x607   :  { %v2966_v24 = vld [vmem:[#allocation2 + $0x10] sm:$0xff] }
 0x608   :  { %v2964_v27 = vld [vmem:[#allocation2] sm:$0xff] }
 0x609   :  { %v2974_v43 = vld [vmem:[#allocation2 + $0x11] sm:$0xff]  ;;  %v2975_v1 = vld [vmem:[#allocation2 + $0x19] sm:$0xff] }
 0x60a   :  { %v2913_v2 = vld [vmem:[#allocation2 + $0x1d] sm:$0xff]  ;;  %v2977_v3 = vpack.c.bf16 %v2975_v1, %v2974_v43  ;;  %v2914_v51 = vld [vmem:[#allocation2 + $0x25] sm:$0xff]  ;;  %v3022_v55 = vld [vmem:[#allocation2 + $0x14] sm:$0xff] }
 0x60b   :  { %v2917_v60 = vpack.c.bf16 %v2914_v51, %v2913_v2  ;;  %v2972_v53 = vld [vmem:[#allocation2 + $0x1] sm:$0xff]  ;;  %v2973_v4 = vld [vmem:[#allocation2 + $0x9] sm:$0xff]  ;;  %v2967_v7 = vld [vmem:[#allocation2 + $0x18] sm:$0xff] }
 0x60c   :  { %2982 = vrot.lane.b32.xlu0 %v2977_v3, %s6600_s12  ;;  %v2930_v9 = vld [vmem:[#allocation2 + $0x1e] sm:$0xff]  ;;  %v2931_v5 = vld [vmem:[#allocation2 + $0x26] sm:$0xff]  ;;  %v2976_v6 = vpack.c.bf16 %v2973_v4, %v2972_v53  ;;  %v2969_v13 = vpack.c.bf16 %v2967_v7, %v2966_v24  ;;  %v2908_v36 = vld [vmem:[#allocation2 + $0x34] sm:$0xff] }
 0x60d   :  { %2921 = vrot.lane.b32.xlu1 %v2917_v60, %s6600_s12  ;;  %v3020_v19 = vld [vmem:[#allocation2 + $0x4] sm:$0xff]  ;;  %v3021_v54 = vld [vmem:[#allocation2 + $0xc] sm:$0xff]  ;;  %v3023_v10 = vld [vmem:[#allocation2 + $0x1c] sm:$0xff]  ;;  %v2934_v34 = vpack.c.bf16 %v2931_v5, %v2930_v9 }
 0x60e   :  { %v3024_v23 = vpack.c.bf16 %v3021_v54, %v3020_v19  ;;  %v2988_v11 = vld [vmem:[#allocation2 + $0x2] sm:$0xff]  ;;  %v2989_v15 = vld [vmem:[#allocation2 + $0xa] sm:$0xff]  ;;  %v3025_v17 = vpack.c.bf16 %v3023_v10, %v3022_v55  ;;  %v2916_v38 = vld [vmem:[#allocation2 + $0x35] sm:$0xff]  ;;  %2971 = vst.msk [vmem:[#allocation3 + $0x20] sm:$0xff] %vm2896_vm3, %v2969_v13 }
 0x60f   :  { %v2947_v61 = vld [vmem:[#allocation2 + $0x1f] sm:$0xff]  ;;  %v2948_v22 = vld [vmem:[#allocation2 + $0x27] sm:$0xff]  ;;  %v2992_v45 = vpack.c.bf16 %v2989_v15, %v2988_v11  ;;  %v2990_v48 = vld [vmem:[#allocation2 + $0x12] sm:$0xff] }
 0x610   :  { %2980 = vrot.lane.b32.xlu0 %v2976_v6, %s6600_s12  ;;  %3026 = vst.msk [vmem:[#allocation3 + $0x10] sm:$0xff] %vm2896_vm3, %v3024_v23  ;;  %3027 = vst.msk [vmem:[#allocation3 + $0x28] sm:$0xff] %vm2896_vm3, %v3025_v17  ;;  %v3004_v26 = vld [vmem:[#allocation2 + $0x3] sm:$0xff]  ;;  %v3005_v52 = vld [vmem:[#allocation2 + $0xb] sm:$0xff]  ;;  %v2951_v31 = vpack.c.bf16 %v2948_v22, %v2947_v61 }
 0x611   :  { %2938 = vrot.lane.b32.xlu1 %v2934_v34, %s6606_s24  ;;  %v2915_v29 = vld [vmem:[#allocation2 + $0x2d] sm:$0xff]  ;;  %v2906_v8 = vld [vmem:[#allocation2 + $0x24] sm:$0xff]  ;;  %v3008_v44 = vpack.c.bf16 %v3005_v52, %v3004_v26  ;;  %v2991_v56 = vld [vmem:[#allocation2 + $0x1a] sm:$0xff] }
 0x612   :  { %v2909_v30 = vpack.c.bf16 %v2906_v8, %v3023_v10  ;;  %v2965_v33 = vld [vmem:[#allocation2 + $0x8] sm:$0xff]  ;;  %v2918_v46 = vpack.c.bf16 %v2916_v38, %v2915_v29  ;;  %v2933_v57 = vld [vmem:[#allocation2 + $0x36] sm:$0xff]  ;;  %v2993_v59 = vpack.c.bf16 %v2991_v56, %v2990_v48  ;;  %v6445_v9 = vld [vmem:[%s7606_s15 + $0x4] ss:$12 sps:$4 sm:$0xff]  }
 0x613   :  { %v2968_v37 = vpack.c.bf16 %v2965_v33, %v2964_v27  ;;  %v2907_v39 = vld [vmem:[#allocation2 + $0x2c] sm:$0xff]  ;;  %v3007_v16 = vld [vmem:[#allocation2 + $0x1b] sm:$0xff] }
 0x614   :  { %2996 = vrot.lane.b32.xlu0 %v2992_v45, %s6606_s24  ;;  %2911 = vst.msk [vmem:[#allocation3] sm:$0xff] %vm2896_vm3, %v2909_v30  ;;  %v2910_v42 = vpack.c.bf16 %v2908_v36, %v2907_v39  ;;  %v2932_v47 = vld [vmem:[#allocation2 + $0x2e] sm:$0xff]  ;;  %v2950_v0 = vld [vmem:[#allocation2 + $0x37] sm:$0xff]  ;;  %v6449_v45 = vld [vmem:[%s7675_s19 + $0x80] sm:$0xff]  }
 0x615   :  { %2955 = vrot.lane.b32.xlu1 %v2951_v31, %s6610_s4  ;;  %2970 = vst.msk [vmem:[#allocation3 + $0x8] sm:$0xff] %vm2896_vm3, %v2968_v37  ;;  %v2935_v62 = vpack.c.bf16 %v2933_v57, %v2932_v47  ;;  %v3006_v63 = vld [vmem:[#allocation2 + $0x13] sm:$0xff]  ;;  %v6443_v5 = vld [vmem:[%s7606_s15] ss:$12 sps:$4 sm:$0xff]   ;;  %v6446_v34 = vld [vmem:[%s7606_s15 + $0x1c] ss:$12 sps:$4 sm:$0xff]   ;;  %6200 = vmatprep.subr.bf16.mxu0 %v6449_v45 }
 0x616   :  { %2912 = vst.msk [vmem:[#allocation3 + $0x18] sm:$0xff] %vm2896_vm3, %v2910_v42  ;;  %v2949_v49 = vld [vmem:[#allocation2 + $0x2f] sm:$0xff]  ;;  %v3009_v18 = vpack.c.bf16 %v3007_v16, %v3006_v63  ;;  %v6448_v11 = vld [vmem:[%s7606_s15 + $0x18] ss:$12 sps:$4 sm:$0xff]  }
 0x617   :  { %v3030_v12 = vld [vmem:[#allocation3 + $0x10] sm:$0xff]  ;;  %v3033_v20 = vld [vmem:[#allocation3 + $0x28] sm:$0xff]  ;;  %v2952_v21 = vpack.c.bf16 %v2950_v0, %v2949_v49  ;;  %v6453_v29 = vld [vmem:[%s7675_s19 + $0x40] sm:$0xff]  }
 0x618   :  { %v3076_v32 = vmul.bf16 %v6425_v28, %v3030_v12  ;;  %3012 = vrot.lane.b32.xlu0 %v3008_v44, %s6610_s4  ;;  %v3079_v58 = vmul.bf16 %v6426_v40, %v3033_v20  ;;  %v6450_v28 = vld [vmem:[%s7675_s19 + $0x88] sm:$0xff]   ;;  %v6454_v7 = vld [vmem:[%s7675_s19] sm:$0xff]   ;;  %5966 = vmatprep.subr.bf16.mxu1 %v6453_v29  ;;  %v6457_v13 = vld [vmem:[%s7675_s19 + $0x50] sm:$0xff]  }
 0x619   :  { %2923 = vrot.lane.b32.xlu1 %v2918_v46, %s6600_s12  ;;  %v6455_v8 = vld [vmem:[%s7675_s19 + $0x48] sm:$0xff]   ;;  %v6458_v30 = vld [vmem:[%s7675_s19 + $0x10] sm:$0xff]   ;;  %v6459_v63 = vld [vmem:[%s7675_s19 + $0x58] sm:$0xff]  }
 0x61a   :  { %6196 = vmatprep.mubr.msk.bf16.mxu1 %vm2896_vm3, %v3076_v32  ;;  %v6456_v31 = vld [vmem:[%s7675_s19 + $0x8] sm:$0xff]   ;;  %v6460_v16 = vld [vmem:[%s7675_s19 + $0x18] sm:$0xff]  }
 0x61b   :  { %6197 = vmatmul.mubr.msk.bf16.vlgmr.msra.gmra.mrb[36].mxu1 %vm2896_vm3, %v3079_v58 }
 0x61c   :  { %2998 = vrot.lane.b32.xlu0 %v2993_v59, %s6606_s24  ;;  %5967 = vmatpush3.bf16.msra.mxu1 %v6454_v7 }
 0x61d   :  { %2940 = vrot.lane.b32.xlu1 %v2935_v62, %s6606_s24  ;;  %5968 = vmatprep.subr.bf16.mxu1 %v6455_v8  ;;  %v6465_v8 = vld [vmem:[%s7675_s19 + $0x70] sm:$0xff]  }
 0x620   :  { %3014 = vrot.lane.b32.xlu0 %v3009_v18, %s6610_s4  ;;  %5969 = vmatpush3.bf16.msra.mxu1 %v6456_v31 }
 0x621   :  { %2957 = vrot.lane.b32.xlu1 %v2952_v21, %s6610_s4  ;;  %5970 = vmatprep.subr.bf16.mxu1 %v6457_v13  ;;  %v6466_v13 = vld [vmem:[%s7675_s19 + $0x30] sm:$0xff]  }
 0x624   :  { %5971 = vmatpush3.bf16.msra.mxu1 %v6458_v30 }
 0x625   :  { %5972 = vmatprep.subr.bf16.mxu1 %v6459_v63 }
 0x628   :  { %5973 = vmatpush3.bf16.msra.mxu1 %v6460_v16 }
 0x67e   :  { %v2983_v41 = vpop.permute.xlu0 %2982 }
 0x67f   :  { %2987 = vst.msk [vmem:[#allocation3 + $0x20] sm:$0xff] %vm2927_vm4, %v2983_v41  ;;  %v2922_v50 = vpop.permute.xlu1 %2921 }
 0x680   :  { %2928 = vst.msk [vmem:[#allocation3] sm:$0xff] %vm2927_vm4, %v2922_v50 }
 0x682   :  { %v2981_v43 = vpop.permute.xlu0 %2980 }
 0x683   :  { %2986 = vst.msk [vmem:[#allocation3 + $0x8] sm:$0xff] %vm2927_vm4, %v2981_v43  ;;  %v2939_v1 = vpop.permute.xlu1 %2938  ;;  %v6461_v43 = vld [vmem:[%s7675_s19 + $0x60] sm:$0xff]  }
 0x684   :  { %2945 = vst.msk [vmem:[#allocation3] sm:$0xff] %vm2944_vm5, %v2939_v1  ;;  %v6462_v1 = vld [vmem:[%s7675_s19 + $0x20] sm:$0xff]   ;;  %5974 = vmatprep.subr.bf16.mxu1 %v6461_v43 }
 0x685   :  { %5975 = vmatpush3.bf16.msra.mxu1 %v6462_v1 }
 0x686   :  { %v2997_v2 = vpop.permute.xlu0 %2996 }
 0x687   :  { %3002 = vst.msk [vmem:[#allocation3 + $0x8] sm:$0xff] %vm2944_vm5, %v2997_v2  ;;  %v2956_v3 = vpop.permute.xlu1 %2955  ;;  %v6463_v2 = vld [vmem:[%s7675_s19 + $0x68] sm:$0xff]  }
 0x688   :  { %2962 = vst.msk [vmem:[#allocation3] sm:$0xff] %vm2961_vm6, %v2956_v3  ;;  %5976 = vmatprep.subr.bf16.mxu1 %v6463_v2 }
 0x68a   :  { %v3013_v51 = vpop.permute.xlu0 %3012 }
 0x68b   :  { %3018 = vst.msk [vmem:[#allocation3 + $0x8] sm:$0xff] %vm2961_vm6, %v3013_v51  ;;  %v2924_v60 = vpop.permute.xlu1 %2923 }
 0x68c   :  { %2929 = vst.msk [vmem:[#allocation3 + $0x18] sm:$0xff] %vm2927_vm4, %v2924_v60  ;;  %v6464_v60 = vld [vmem:[%s7675_s19 + $0x28] sm:$0xff]  }
 0x68d   :  { %5977 = vmatpush3.bf16.msra.mxu1 %v6464_v60 }
 0x68e   :  { %v2999_v53 = vpop.permute.xlu0 %2998  ;;  %5978 = vmatprep.subr.bf16.mxu1 %v6465_v8  ;;  %v6479_v8 = vld [vmem:[%s7752_s30 + $0x40] sm:$0xff]  }
 0x68f   :  { %3003 = vst.msk [vmem:[#allocation3 + $0x20] sm:$0xff] %vm2944_vm5, %v2999_v53  ;;  %v2941_v4 = vpop.permute.xlu1 %2940  ;;  %v3028_v19 = vld [vmem:[#allocation3] sm:$0xff] }
 0x690   :  { %2946 = vst.msk [vmem:[#allocation3 + $0x18] sm:$0xff] %vm2944_vm5, %v2941_v4  ;;  %v3074_v10 = vmul.bf16 %v6443_v5, %v3028_v19 }
 0x691   :  { %5979 = vmatpush3.bf16.msra.mxu1 %v6466_v13  ;;  %v6481_v13 = vld [vmem:[%s7752_s30 + $0x48] sm:$0xff]  }
 0x692   :  { %v3015_v54 = vpop.permute.xlu0 %3014  ;;  %v3029_v55 = vld [vmem:[#allocation3 + $0x8] sm:$0xff] }
 0x693   :  { %3019 = vst.msk [vmem:[#allocation3 + $0x20] sm:$0xff] %vm2961_vm6, %v3015_v54  ;;  %v2958_v6 = vpop.permute.xlu1 %2957  ;;  %v3075_v23 = vmul.bf16 %v6445_v9, %v3029_v55 }
 0x694   :  { %2963 = vst.msk [vmem:[#allocation3 + $0x18] sm:$0xff] %vm2961_vm6, %v2958_v6 }
 0x695   :  { %3269 = vmatprep.mubr.bf16.mxu0 %v3075_v23 }
 0x696   :  { %3270 = vmatmul.mubr.bf16.vlgmr.msra.gmra.mrb[48].mxu0 %v3074_v10 }
 0x697   :  { %6201 = vmatpush3.bf16.msra.mxu0 %v6449_v45  ;;  %v6451_v45 = vld [vmem:[%s7682_s23 + $0x8] ss:$12 sps:$4 sm:$0xff]  }
 0x698   :  { %6202 = vmatprep.subr.bf16.mxu0 %v6450_v28 }
 0x69a   :  { %v3032_v15 = vld [vmem:[#allocation3 + $0x20] sm:$0xff] }
 0x69b   :  { %v3078_v17 = vmul.bf16 %v6446_v34, %v3032_v15  ;;  %v3031_v61 = vld [vmem:[#allocation3 + $0x18] sm:$0xff]  ;;  %6203 = vmatpush3.bf16.msra.mxu0 %v6450_v28 }
 0x69c   :  { %v3077_v22 = vmul.bf16 %v6448_v11, %v3031_v61  ;;  %5998 = vmatprep.subr.bf16.mxu0 %v6479_v8 }
 0x69d   :  { %3277 = vmatprep.mubr.bf16.mxu0 %v3078_v17 }
 0x69e   :  { %3278 = vmatmul.mubr.bf16.gmra.mrb[52].mxu0 %v3077_v22 }
 0x6ee   :  { %v6198_v24 = vpop.f32.mrb[36].mxu1 }
 0x6ef   :  { %v3320_v26 = vpop.f32.mrb[37].mxu1 }
 0x6f0   :  { %v6199_v52 = vpop.f32.mrb[38].mxu1 }
 0x6f1   :  { %v3323_v27 = vpop.f32.mrb[39].mxu1 }
 0x769   :  { %v5950_v33 = vpop.f32.mrb[48].mxu0 }
 0x76a   :  { %v5951_v36 = vpop.f32.mrb[49].mxu0 }
 0x76b   :  { %v5952_v38 = vadd.f32 %v5951_v36, %v5950_v33  ;;  %v5953_v37 = vpop.f32.mrb[50].mxu0 }
 0x76c   :  { %v5954_v39 = vpop.f32.mrb[51].mxu0 }
 0x76d   :  { %v3272_v25 = vadd.f32 %v5952_v38, %v5736_v35  ;;  %v5955_v40 = vadd.f32 %v5954_v39, %v5953_v37  ;;  %v6452_v38 = vld [vmem:[%s7682_s23 + $0x20] ss:$12 sps:$4 sm:$0xff]   ;;  %v6467_v39 = vld [vmem:[%s7675_s19 + $0x78] sm:$0xff]  }
 0x76e   :  { %5980 = vmatprep.subr.bf16.mxu1 %v6467_v39 }
 0x76f   :  { %v3321_v42 = vadd.f32 %v3320_v26, %v3272_v25  ;;  %v3275_v14 = vadd.f32 %v5955_v40, %v5736_v35 }
 0x771   :  { %v3335_v44 = vmax.f32 %v3321_v42, 0.0  ;;  %v3324_v12 = vadd.f32 %v3323_v27, %v3275_v14  ;;  %v5956_v46 = vpop.f32.mrb[52].mxu0  ;;  %v6468_v42 = vld [vmem:[%s7675_s19 + $0x38] sm:$0xff]   ;;  %s6641_s19 = smov 37  }
 0x772   :  { %v5957_v48 = vpop.f32.mrb[53].mxu0  ;;  %5981 = vmatpush3.bf16.msra.mxu1 %v6468_v42  ;;  %s8055_s22 = sld [smem:[%s8091_s0 + %s6641_s19]]  }
 0x773   :  { %3339 = vst.msk [vmem:[#allocation2] sm:$0xff] %vm2896_vm3, %v3335_v44  ;;  %3343 = vst.msk [vmem:[#allocation2 + $0x20] sm:$0xff] %vm2896_vm3, %v3335_v44  ;;  %v3336_v56 = vmax.f32 %v3324_v12, 0.0  ;;  %v5958_v32 = vadd.f32 %v5957_v48, %v5956_v46  ;;  %v5959_v20 = vpop.f32.mrb[54].mxu0 }
 0x774   :  { %v5960_v47 = vpop.f32.mrb[55].mxu0 }
 0x775   :  { %3340 = vst.msk [vmem:[#allocation2 + $0x8] sm:$0xff] %vm2896_vm3, %v3336_v56  ;;  %3344 = vst.msk [vmem:[#allocation2 + $0x28] sm:$0xff] %vm2896_vm3, %v3336_v56  ;;  %v3280_v57 = vadd.f32 %v5958_v32, %v5736_v35  ;;  %v5961_v58 = vadd.f32 %v5960_v47, %v5959_v20 }
 0x777   :  { %v3329_v59 = vadd.f32 %v6198_v24, %v3280_v57  ;;  %v3283_v62 = vadd.f32 %v5961_v58, %v5736_v35 }
 0x779   :  { %v3337_v49 = vmax.f32 %v3329_v59, 0.0  ;;  %v3332_v0 = vadd.f32 %v6199_v52, %v3283_v62 }
 0x77a   :  { %v3403_v41 = vld [vmem:[#allocation2] sm:$0xff] }
 0x77b   :  { %3341 = vst.msk [vmem:[#allocation2 + $0x10] sm:$0xff] %vm2896_vm3, %v3337_v49  ;;  %3345 = vst.msk [vmem:[#allocation2 + $0x30] sm:$0xff] %vm2896_vm3, %v3337_v49  ;;  %v3338_v18 = vmax.f32 %v3332_v0, 0.0 }
 0x77c   :  { %v3404_v21 = vld [vmem:[#allocation2 + $0x8] sm:$0xff] }
 0x77d   :  { %3342 = vst.msk [vmem:[#allocation2 + $0x18] sm:$0xff] %vm2896_vm3, %v3338_v18  ;;  %3346 = vst.msk [vmem:[#allocation2 + $0x38] sm:$0xff] %vm2896_vm3, %v3338_v18  ;;  %v3407_v50 = vpack.c.bf16 %v3404_v21, %v3403_v41  ;;  %v3411_v3 = vld [vmem:[#allocation2 + $0x1] sm:$0xff] }
 0x77e   :  { %v3459_v4 = vld [vmem:[#allocation2 + $0x4] sm:$0xff] }
 0x77f   :  { %3409 = vst.msk [vmem:[#allocation3 + $0x8] sm:$0xff] %vm2896_vm3, %v3407_v50  ;;  %v3356_v19 = vld [vmem:[#allocation2 + $0x25] sm:$0xff] }
 0x780   :  { %v3348_v34 = vld [vmem:[#allocation2 + $0x24] sm:$0xff] }
 0x781   :  { %v3427_v11 = vld [vmem:[#allocation2 + $0x2] sm:$0xff] }
 0x782   :  { %v3412_v51 = vld [vmem:[#allocation2 + $0x9] sm:$0xff] }
 0x783   :  { %v3415_v53 = vpack.c.bf16 %v3412_v51, %v3411_v3  ;;  %v3460_v9 = vld [vmem:[#allocation2 + $0xc] sm:$0xff]  ;;  %v3443_v26 = vld [vmem:[#allocation2 + $0x3] sm:$0xff] }
 0x784   :  { %v3355_v5 = vld [vmem:[#allocation2 + $0x1d] sm:$0xff]  ;;  %v3428_v54 = vld [vmem:[#allocation2 + $0xa] sm:$0xff]  ;;  %v3463_v55 = vpack.c.bf16 %v3460_v9, %v3459_v4  ;;  %v3461_v23 = vld [vmem:[#allocation2 + $0x14] sm:$0xff] }
 0x785   :  { %3419 = vrot.lane.b32.xlu0 %v3415_v53, %s6600_s12  ;;  %v3359_v6 = vpack.c.bf16 %v3356_v19, %v3355_v5  ;;  %v3462_v10 = vld [vmem:[#allocation2 + $0x1c] sm:$0xff]  ;;  %v3431_v22 = vpack.c.bf16 %v3428_v54, %v3427_v11  ;;  %v3372_v24 = vld [vmem:[#allocation2 + $0x26] sm:$0xff]  ;;  %v3405_v29 = vld [vmem:[#allocation2 + $0x10] sm:$0xff] }
 0x786   :  { %v3371_v15 = vld [vmem:[#allocation2 + $0x1e] sm:$0xff]  ;;  %3465 = vst.msk [vmem:[#allocation3 + $0x10] sm:$0xff] %vm2896_vm3, %v3463_v55  ;;  %v3464_v17 = vpack.c.bf16 %v3462_v10, %v3461_v23  ;;  %v3351_v61 = vpack.c.bf16 %v3348_v34, %v3462_v10  ;;  %v3444_v52 = vld [vmem:[#allocation2 + $0xb] sm:$0xff]  ;;  %v3350_v33 = vld [vmem:[#allocation2 + $0x34] sm:$0xff] }
 0x787   :  { %3363 = vrot.lane.b32.xlu1 %v3359_v6, %s6600_s12  ;;  %v3387_v27 = vld [vmem:[#allocation2 + $0x1f] sm:$0xff]  ;;  %v3375_v28 = vpack.c.bf16 %v3372_v24, %v3371_v15  ;;  %v3349_v30 = vld [vmem:[#allocation2 + $0x2c] sm:$0xff]  ;;  %v3447_v35 = vpack.c.bf16 %v3444_v52, %v3443_v26  ;;  %v3358_v46 = vld [vmem:[#allocation2 + $0x35] sm:$0xff] }
 0x788   :  { %3466 = vst.msk [vmem:[#allocation3 + $0x28] sm:$0xff] %vm2896_vm3, %v3464_v17  ;;  %3353 = vst.msk [vmem:[#allocation3] sm:$0xff] %vm2896_vm3, %v3351_v61  ;;  %v3406_v7 = vld [vmem:[#allocation2 + $0x18] sm:$0xff]  ;;  %v3388_v36 = vld [vmem:[#allocation2 + $0x27] sm:$0xff]  ;;  %v3352_v37 = vpack.c.bf16 %v3350_v33, %v3349_v30 }
 0x789   :  { %3435 = vrot.lane.b32.xlu0 %v3431_v22, %s6606_s24  ;;  %v3408_v31 = vpack.c.bf16 %v3406_v7, %v3405_v29  ;;  %v3413_v25 = vld [vmem:[#allocation2 + $0x11] sm:$0xff]  ;;  %v3414_v40 = vld [vmem:[#allocation2 + $0x19] sm:$0xff]  ;;  %v3391_v14 = vpack.c.bf16 %v3388_v36, %v3387_v27  ;;  %v6476_v7 = vld [vmem:[%s7752_s30 + $0x88] sm:$0xff]  }
 0x78a   :  { %3354 = vst.msk [vmem:[#allocation3 + $0x18] sm:$0xff] %vm2896_vm3, %v3352_v37  ;;  %v3416_v56 = vpack.c.bf16 %v3414_v40, %v3413_v25  ;;  %v3357_v20 = vld [vmem:[#allocation2 + $0x2d] sm:$0xff]  ;;  %v3430_v57 = vld [vmem:[#allocation2 + $0x1a] sm:$0xff] }
 0x78b   :  { %3379 = vrot.lane.b32.xlu1 %v3375_v28, %s6606_s24  ;;  %3410 = vst.msk [vmem:[#allocation3 + $0x20] sm:$0xff] %vm2896_vm3, %v3408_v31  ;;  %v3429_v47 = vld [vmem:[#allocation2 + $0x12] sm:$0xff]  ;;  %v3360_v58 = vpack.c.bf16 %v3358_v46, %v3357_v20  ;;  %v3446_v49 = vld [vmem:[#allocation2 + $0x1b] sm:$0xff]  ;;  %v6482_v30 = vld [vmem:[%s7752_s30 + $0x8] sm:$0xff]  }
 0x78c   :  { %v3374_v59 = vld [vmem:[#allocation2 + $0x36] sm:$0xff]  ;;  %v3432_v62 = vpack.c.bf16 %v3430_v57, %v3429_v47  ;;  %v3373_v63 = vld [vmem:[#allocation2 + $0x2e] sm:$0xff]  ;;  %v6475_v29 = vld [vmem:[%s7752_s30 + $0x80] sm:$0xff]  }
 0x78d   :  { %3451 = vrot.lane.b32.xlu0 %v3447_v35, %s6610_s4  ;;  %v3469_v44 = vld [vmem:[#allocation3 + $0x10] sm:$0xff]  ;;  %v3376_v0 = vpack.c.bf16 %v3374_v59, %v3373_v63  ;;  %v6469_v5 = vld [vmem:[%s7682_s23] ss:$12 sps:$4 sm:$0xff]   ;;  %v6472_v15 = vld [vmem:[%s7682_s23 + $0x1c] ss:$12 sps:$4 sm:$0xff]   ;;  %6208 = vmatprep.subr.bf16.mxu1 %v6475_v29 }
 0x78e   :  { %v3515_v12 = vmul.bf16 %v6451_v45, %v3469_v44  ;;  %v3445_v16 = vld [vmem:[#allocation2 + $0x13] sm:$0xff]  ;;  %v6480_v31 = vld [vmem:[%s7752_s30] sm:$0xff]  }
 0x78f   :  { %3395 = vrot.lane.b32.xlu1 %v3391_v14, %s6610_s4  ;;  %v3472_v48 = vld [vmem:[#allocation3 + $0x28] sm:$0xff]  ;;  %v3390_v18 = vld [vmem:[#allocation2 + $0x37] sm:$0xff]  ;;  %v3448_v21 = vpack.c.bf16 %v3446_v49, %v3445_v16  ;;  %v6471_v4 = vld [vmem:[%s7682_s23 + $0x4] ss:$12 sps:$4 sm:$0xff]  }
 0x790   :  { %6204 = vmatprep.mubr.msk.bf16.mxu0 %vm2896_vm3, %v3515_v12  ;;  %v3518_v32 = vmul.bf16 %v6452_v38, %v3472_v48  ;;  %v3389_v41 = vld [vmem:[#allocation2 + $0x2f] sm:$0xff]  ;;  %v6474_v17 = vld [vmem:[%s7682_s23 + $0x18] ss:$12 sps:$4 sm:$0xff]   ;;  %v5763_v37 = vld [vmem:[%s5612_s8] ss:$0 sm:$0xff]  ;;  %s6642_s23 = smov 34  }
 0x791   :  { %3421 = vrot.lane.b32.xlu0 %v3416_v56, %s6600_s12  ;;  %v3392_v50 = vpack.c.bf16 %v3390_v18, %v3389_v41  ;;  %v6483_v33 = vld [vmem:[%s7752_s30 + $0x50] sm:$0xff]   ;;  %v6485_v36 = vld [vmem:[%s7752_s30 + $0x58] sm:$0xff]   ;;  %s5630_s25 = sld [smem:[%s8091_s0 + %s6642_s23]]  }
 0x792   :  { %6205 = vmatmul.mubr.msk.bf16.vlgmr.msra.gmra.mrb[56].mxu0 %vm2896_vm3, %v3518_v32  ;;  %v6484_v35 = vld [vmem:[%s7752_s30 + $0x10] sm:$0xff]  }
 0x793   :  { %3365 = vrot.lane.b32.xlu1 %v3360_v58, %s6600_s12  ;;  %5999 = vmatpush3.bf16.msra.mxu0 %v6480_v31 }
 0x794   :  { %6000 = vmatprep.subr.bf16.mxu0 %v6481_v13  ;;  %v6492_v13 = vld [vmem:[%s7752_s30 + $0x30] sm:$0xff]  }
 0x795   :  { %3437 = vrot.lane.b32.xlu0 %v3432_v62, %s6606_s24 }
 0x797   :  { %3381 = vrot.lane.b32.xlu1 %v3376_v0, %s6606_s24  ;;  %6001 = vmatpush3.bf16.msra.mxu0 %v6482_v30 }
 0x798   :  { %6002 = vmatprep.subr.bf16.mxu0 %v6483_v33 }
 0x799   :  { %3453 = vrot.lane.b32.xlu0 %v3448_v21, %s6610_s4 }
 0x79b   :  { %3397 = vrot.lane.b32.xlu1 %v3392_v50, %s6610_s4  ;;  %6003 = vmatpush3.bf16.msra.mxu0 %v6484_v35  ;;  %v6486_v50 = vld [vmem:[%s7752_s30 + $0x18] sm:$0xff]  }
 0x79c   :  { %6004 = vmatprep.subr.bf16.mxu0 %v6485_v36  ;;  %v6493_v36 = vld [vmem:[%s7752_s30 + $0x78] sm:$0xff]  }
 0x79f   :  { %6005 = vmatpush3.bf16.msra.mxu0 %v6486_v50 }
 0x7f7   :  { %v3420_v43 = vpop.permute.xlu0 %3419 }
 0x7f8   :  { %3425 = vst.msk [vmem:[#allocation3 + $0x8] sm:$0xff] %vm2927_vm4, %v3420_v43 }
 0x7f9   :  { %v3364_v1 = vpop.permute.xlu1 %3363 }
 0x7fa   :  { %3369 = vst.msk [vmem:[#allocation3] sm:$0xff] %vm2927_vm4, %v3364_v1 }
 0x7fb   :  { %v3436_v2 = vpop.permute.xlu0 %3435 }
 0x7fc   :  { %3441 = vst.msk [vmem:[#allocation3 + $0x8] sm:$0xff] %vm2944_vm5, %v3436_v2  ;;  %v6487_v2 = vld [vmem:[%s7752_s30 + $0x60] sm:$0xff]  }
 0x7fd   :  { %v3380_v3 = vpop.permute.xlu1 %3379  ;;  %6006 = vmatprep.subr.bf16.mxu0 %v6487_v2 }
 0x7fe   :  { %3385 = vst.msk [vmem:[#allocation3] sm:$0xff] %vm2944_vm5, %v3380_v3  ;;  %v6488_v3 = vld [vmem:[%s7752_s30 + $0x20] sm:$0xff]  }
 0x7ff   :  { %v3452_v51 = vpop.permute.xlu0 %3451  ;;  %6007 = vmatpush3.bf16.msra.mxu0 %v6488_v3 }
 0x800   :  { %3457 = vst.msk [vmem:[#allocation3 + $0x8] sm:$0xff] %vm2961_vm6, %v3452_v51  ;;  %v6489_v51 = vld [vmem:[%s7752_s30 + $0x68] sm:$0xff]  }
 0x801   :  { %v3396_v60 = vpop.permute.xlu1 %3395  ;;  %6008 = vmatprep.subr.bf16.mxu0 %v6489_v51 }
 0x802   :  { %3401 = vst.msk [vmem:[#allocation3] sm:$0xff] %vm2961_vm6, %v3396_v60  ;;  %v6490_v60 = vld [vmem:[%s7752_s30 + $0x28] sm:$0xff]  }
 0x803   :  { %v3422_v53 = vpop.permute.xlu0 %3421  ;;  %6009 = vmatpush3.bf16.msra.mxu0 %v6490_v60 }
 0x804   :  { %3426 = vst.msk [vmem:[#allocation3 + $0x20] sm:$0xff] %vm2927_vm4, %v3422_v53 }
 0x805   :  { %v3366_v9 = vpop.permute.xlu1 %3365 }
 0x806   :  { %3370 = vst.msk [vmem:[#allocation3 + $0x18] sm:$0xff] %vm2927_vm4, %v3366_v9 }
 0x807   :  { %v3438_v19 = vpop.permute.xlu0 %3437  ;;  %v3468_v54 = vld [vmem:[#allocation3 + $0x8] sm:$0xff] }
 0x808   :  { %3442 = vst.msk [vmem:[#allocation3 + $0x20] sm:$0xff] %vm2944_vm5, %v3438_v19  ;;  %v3514_v55 = vmul.bf16 %v6471_v4, %v3468_v54  ;;  %v6491_v19 = vld [vmem:[%s7752_s30 + $0x70] sm:$0xff]  }
 0x809   :  { %v3382_v6 = vpop.permute.xlu1 %3381  ;;  %v3467_v23 = vld [vmem:[#allocation3] sm:$0xff]  ;;  %6010 = vmatprep.subr.bf16.mxu0 %v6491_v19 }
 0x80a   :  { %3386 = vst.msk [vmem:[#allocation3 + $0x18] sm:$0xff] %vm2944_vm5, %v3382_v6  ;;  %3708 = vmatprep.mubr.bf16.mxu1 %v3514_v55  ;;  %v3513_v10 = vmul.bf16 %v6469_v5, %v3467_v23  ;;  %6011 = vmatpush3.bf16.msra.mxu0 %v6492_v13 }
 0x80b   :  { %v3454_v34 = vpop.permute.xlu0 %3453  ;;  %6012 = vmatprep.subr.bf16.mxu0 %v6493_v36 }
 0x80c   :  { %3458 = vst.msk [vmem:[#allocation3 + $0x20] sm:$0xff] %vm2961_vm6, %v3454_v34  ;;  %3709 = vmatmul.mubr.bf16.vlgmr.msra.gmra.mrb[40].mxu1 %v3513_v10 }
 0x80d   :  { %v3398_v11 = vpop.permute.xlu1 %3397  ;;  %6209 = vmatpush3.bf16.msra.mxu1 %v6475_v29 }
 0x80e   :  { %3402 = vst.msk [vmem:[#allocation3 + $0x18] sm:$0xff] %vm2961_vm6, %v3398_v11  ;;  %6210 = vmatprep.subr.bf16.mxu1 %v6476_v7 }
 0x811   :  { %6211 = vmatpush3.bf16.msra.mxu1 %v6476_v7 }
 0x813   :  { %v3471_v61 = vld [vmem:[#allocation3 + $0x20] sm:$0xff] }
 0x814   :  { %v3517_v22 = vmul.bf16 %v6472_v15, %v3471_v61 }
 0x815   :  { %v3470_v24 = vld [vmem:[#allocation3 + $0x18] sm:$0xff] }
 0x816   :  { %3716 = vmatprep.mubr.bf16.mxu1 %v3517_v22  ;;  %v3516_v26 = vmul.bf16 %v6474_v17, %v3470_v24 }
 0x818   :  { %3717 = vmatmul.mubr.bf16.gmra.mrb[44].mxu1 %v3516_v26 }
 0x865   :  { %v6206_v52 = vpop.f32.mrb[56].mxu0 }
 0x866   :  { %v3759_v27 = vpop.f32.mrb[57].mxu0 }
 0x867   :  { %v6207_v45 = vpop.f32.mrb[58].mxu0 }
 0x868   :  { %v3762_v28 = vpop.f32.mrb[59].mxu0 }
 0x8df   :  { %v5982_v38 = vpop.f32.mrb[40].mxu1 }
 0x8e0   :  { %v5983_v39 = vpop.f32.mrb[41].mxu1 }
 0x8e1   :  { %v5984_v25 = vadd.f32 %v5983_v39, %v5982_v38  ;;  %v5985_v40 = vpop.f32.mrb[42].mxu1  ;;  %v6477_v39 = vld [vmem:[%s7759_s5 + $0x8] ss:$12 sps:$4 sm:$0xff]  }
 0x8e2   :  { %v5986_v42 = vpop.f32.mrb[43].mxu1 }
 0x8e3   :  { %v3711_v14 = vadd.f32 %v5984_v25, %v5763_v37  ;;  %v5987_v44 = vadd.f32 %v5986_v42, %v5985_v40  ;;  %v6478_v25 = vld [vmem:[%s7759_s5 + $0x20] ss:$12 sps:$4 sm:$0xff]   ;;  %v6494_v40 = vld [vmem:[%s7752_s30 + $0x38] sm:$0xff]  }
 0x8e4   :  { %6013 = vmatpush3.bf16.msra.mxu0 %v6494_v40 }
 0x8e5   :  { %v3760_v12 = vadd.f32 %v3759_v27, %v3711_v14  ;;  %v3714_v46 = vadd.f32 %v5987_v44, %v5763_v37 }
 0x8e7   :  { %v3774_v48 = vmax.f32 %v3760_v12, 0.0  ;;  %v3763_v56 = vadd.f32 %v3762_v28, %v3714_v46 }
 0x8e9   :  { %3778 = vst.msk [vmem:[#allocation2] sm:$0xff] %vm2896_vm3, %v3774_v48  ;;  %3782 = vst.msk [vmem:[#allocation2 + $0x20] sm:$0xff] %vm2896_vm3, %v3774_v48  ;;  %v3775_v32 = vmax.f32 %v3763_v56, 0.0 }
 0x8eb   :  { %3783 = vst.msk [vmem:[#allocation2 + $0x28] sm:$0xff] %vm2896_vm3, %v3775_v32  ;;  %3779 = vst.msk [vmem:[#allocation2 + $0x8] sm:$0xff] %vm2896_vm3, %v3775_v32  ;;  %v5988_v20 = vpop.f32.mrb[44].mxu1 }
 0x8ec   :  { %v5989_v47 = vpop.f32.mrb[45].mxu1 }
 0x8ed   :  { %v5990_v57 = vadd.f32 %v5989_v47, %v5988_v20  ;;  %v5991_v58 = vpop.f32.mrb[46].mxu1 }
 0x8ee   :  { %v5992_v59 = vpop.f32.mrb[47].mxu1 }
 0x8ef   :  { %v3719_v62 = vadd.f32 %v5990_v57, %v5763_v37  ;;  %v5993_v63 = vadd.f32 %v5992_v59, %v5991_v58 }
 0x8f0   :  { %v3786_v41 = vld [vmem:[#allocation2] sm:$0xff] }
 0x8f1   :  { %v3768_v16 = vadd.f32 %v6206_v52, %v3719_v62  ;;  %v3722_v49 = vadd.f32 %v5993_v63, %v5763_v37  ;;  %v3901_v23 = vld [vmem:[#allocation2 + $0x20] sm:$0xff] }
 0x8f2   :  { %v3898_v21 = vld [vmem:[#allocation2 + $0x8] sm:$0xff] }
 0x8f3   :  { %v3776_v0 = vmax.f32 %v3768_v16, 0.0  ;;  %v3771_v18 = vadd.f32 %v6207_v45, %v3722_v49  ;;  %v3790_v1 = vpack.c.bf16 %v3898_v21, %v3786_v41  ;;  %v3850_v53 = vld [vmem:[#allocation2 + $0x5] sm:$0xff] }
 0x8f4   :  { %v3794_v4 = vld [vmem:[#allocation2 + $0x1] sm:$0xff] }
 0x8f5   :  { %3784 = vst.msk [vmem:[#allocation2 + $0x30] sm:$0xff] %vm2896_vm3, %v3776_v0  ;;  %3780 = vst.msk [vmem:[#allocation2 + $0x10] sm:$0xff] %vm2896_vm3, %v3776_v0  ;;  %v3777_v43 = vmax.f32 %v3771_v18, 0.0  ;;  %v3866_v22 = vld [vmem:[#allocation2 + $0x6] sm:$0xff] }
 0x8f6   :  { %3792 = vst.msk [vmem:[#allocation3] sm:$0xff] %vm2896_vm3, %v3790_v1  ;;  %v3810_v24 = vld [vmem:[#allocation2 + $0x2] sm:$0xff] }
 0x8f7   :  { %3785 = vst.msk [vmem:[#allocation2 + $0x38] sm:$0xff] %vm2896_vm3, %v3777_v43  ;;  %3781 = vst.msk [vmem:[#allocation2 + $0x18] sm:$0xff] %vm2896_vm3, %v3777_v43  ;;  %v3842_v27 = vld [vmem:[#allocation2 + $0x4] sm:$0xff] }
 0x8f8   :  { %v3882_v30 = vld [vmem:[#allocation2 + $0x7] sm:$0xff] }
 0x8f9   :  { %v3826_v33 = vld [vmem:[#allocation2 + $0x3] sm:$0xff] }
 0x8fc   :  { %v3851_v9 = vld [vmem:[#allocation2 + $0xd] sm:$0xff] }
 0x8fd   :  { %v3795_v5 = vld [vmem:[#allocation2 + $0x9] sm:$0xff]  ;;  %v3854_v54 = vpack.c.bf16 %v3851_v9, %v3850_v53 }
 0x8fe   :  { %v3798_v55 = vpack.c.bf16 %v3795_v5, %v3794_v4  ;;  %v3867_v6 = vld [vmem:[#allocation2 + $0xe] sm:$0xff]  ;;  %v3900_v11 = vld [vmem:[#allocation2 + $0x18] sm:$0xff] }
 0x8ff   :  { %v3811_v10 = vld [vmem:[#allocation2 + $0xa] sm:$0xff]  ;;  %3858 = vrot.lane.b32.xlu0 %v3854_v54, %s6600_s12  ;;  %v3903_v17 = vpack.c.bf16 %v3901_v23, %v3900_v11  ;;  %v3870_v26 = vpack.c.bf16 %v3867_v6, %v3866_v22  ;;  %v3844_v8 = vld [vmem:[#allocation2 + $0x14] sm:$0xff]  ;;  %v3845_v31 = vld [vmem:[#allocation2 + $0x1c] sm:$0xff] }
 0x900   :  { %v3899_v34 = vld [vmem:[#allocation2 + $0x10] sm:$0xff]  ;;  %3802 = vrot.lane.b32.xlu1 %v3798_v55, %s6600_s12  ;;  %v3814_v52 = vpack.c.bf16 %v3811_v10, %v3810_v24  ;;  %v3847_v35 = vpack.c.bf16 %v3845_v31, %v3844_v8  ;;  %v3853_v14 = vld [vmem:[#allocation2 + $0x1d] sm:$0xff] }
 0x901   :  { %v3902_v15 = vpack.c.bf16 %v3899_v34, %v3898_v21  ;;  %v3791_v61 = vpack.c.bf16 %v3900_v11, %v3899_v34  ;;  %3905 = vst.msk [vmem:[#allocation3 + $0x28] sm:$0xff] %vm2896_vm3, %v3903_v17  ;;  %v3883_v45 = vld [vmem:[#allocation2 + $0xf] sm:$0xff]  ;;  %v3797_v12 = vld [vmem:[#allocation2 + $0x19] sm:$0xff] }
 0x902   :  { %v3827_v28 = vld [vmem:[#allocation2 + $0xb] sm:$0xff]  ;;  %v3886_v38 = vpack.c.bf16 %v3883_v45, %v3882_v30  ;;  %v3852_v42 = vld [vmem:[#allocation2 + $0x15] sm:$0xff]  ;;  %3849 = vst.msk [vmem:[#allocation3 + $0x20] sm:$0xff] %vm2896_vm3, %v3847_v35  ;;  %v3869_v58 = vld [vmem:[#allocation2 + $0x1e] sm:$0xff] }
 0x903   :  { %3904 = vst.msk [vmem:[#allocation3 + $0x10] sm:$0xff] %vm2896_vm3, %v3902_v15  ;;  %3793 = vst.msk [vmem:[#allocation3 + $0x18] sm:$0xff] %vm2896_vm3, %v3791_v61  ;;  %v3843_v29 = vld [vmem:[#allocation2 + $0xc] sm:$0xff]  ;;  %3874 = vrot.lane.b32.xlu0 %v3870_v26, %s6606_s24  ;;  %v3830_v37 = vpack.c.bf16 %v3827_v28, %v3826_v33  ;;  %v3855_v20 = vpack.c.bf16 %v3853_v14, %v3852_v42  ;;  %v3868_v57 = vld [vmem:[#allocation2 + $0x16] sm:$0xff] }
 0x904   :  { %3818 = vrot.lane.b32.xlu1 %v3814_v52, %s6606_s24  ;;  %v3846_v7 = vpack.c.bf16 %v3843_v29, %v3842_v27  ;;  %v3796_v44 = vld [vmem:[#allocation2 + $0x11] sm:$0xff]  ;;  %v3813_v62 = vld [vmem:[#allocation2 + $0x1a] sm:$0xff]  ;;  %v3871_v63 = vpack.c.bf16 %v3869_v58, %v3868_v57  ;;  %v6625_v29 = vmov 0.0  }
 0x905   :  { %v3799_v47 = vpack.c.bf16 %v3797_v12, %v3796_v44  ;;  %v3812_v59 = vld [vmem:[#allocation2 + $0x12] sm:$0xff]  ;;  %v3885_v0 = vld [vmem:[#allocation2 + $0x1f] sm:$0xff]  ;;  %6216 = vmatprep.subr.bf16.mxu1 %v6625_v29 }
 0x906   :  { %3848 = vst.msk [vmem:[#allocation3 + $0x8] sm:$0xff] %vm2896_vm3, %v3846_v7  ;;  %v3815_v16 = vpack.c.bf16 %v3813_v62, %v3812_v59  ;;  %v3884_v49 = vld [vmem:[#allocation2 + $0x17] sm:$0xff]  ;;  %v6495_v9 = vld [vmem:[%s7759_s5] ss:$12 sps:$4 sm:$0xff]   ;;  %v6497_v5 = vld [vmem:[%s7759_s5 + $0x4] ss:$12 sps:$4 sm:$0xff]  }
 0x907   :  { %3890 = vrot.lane.b32.xlu0 %v3886_v38, %s6610_s4  ;;  %v3828_v18 = vld [vmem:[#allocation2 + $0x13] sm:$0xff]  ;;  %v3829_v21 = vld [vmem:[#allocation2 + $0x1b] sm:$0xff]  ;;  %v3887_v41 = vpack.c.bf16 %v3885_v0, %v3884_v49 }
 0x908   :  { %3834 = vrot.lane.b32.xlu1 %v3830_v37, %s6610_s4  ;;  %v3911_v48 = vld [vmem:[#allocation3 + $0x28] sm:$0xff]  ;;  %v3831_v50 = vpack.c.bf16 %v3829_v21, %v3828_v18  ;;  %v6500_v17 = vld [vmem:[%s7759_s5 + $0x18] ss:$12 sps:$4 sm:$0xff]   ;;  %v5790_v8 = vld [vmem:[%s5615_s20] ss:$0 sm:$0xff]  ;;  %s7927_s20 = sld [smem:[%s8091_s0 + %s6634_s17]]  }
 0x909   :  { %v3957_v32 = vmul.bf16 %v6478_v25, %v3911_v48  ;;  %v6498_v15 = vld [vmem:[%s7759_s5 + $0x1c] ss:$12 sps:$4 sm:$0xff]   ;;  %s6638_s5 = smov 33  }
 0x90a   :  { %v3908_v46 = vld [vmem:[#allocation3 + $0x10] sm:$0xff]  ;;  %s8013_s8 = sld [smem:[%s8091_s0 + %s6638_s5]]  }
 0x90b   :  { %v3954_v56 = vmul.bf16 %v6477_v39, %v3908_v46  ;;  %3860 = vrot.lane.b32.xlu0 %v3855_v20, %s6600_s12 }
 0x90c   :  { %3804 = vrot.lane.b32.xlu1 %v3799_v47, %s6600_s12  ;;  %s6639_s12 = smov 31  }
 0x90d   :  { %6212 = vmatprep.mubr.msk.bf16.mxu1 %vm2896_vm3, %v3954_v56  ;;  %s5627_s15 = sld [smem:[%s8091_s0 + %s6639_s12]]  }
 0x90e   :  { %6213 = vmatmul.mubr.msk.bf16.vlgmr.msra.gmra.mrb[48].mxu1 %vm2896_vm3, %v3957_v32 }
 0x90f   :  { %3876 = vrot.lane.b32.xlu0 %v3871_v63, %s6606_s24  ;;  %6220 = vmatprep.mubr.msk.bf16.mxu1 %vm6626_vm7, %v6625_v29  ;;  %v6501_v63 = vld [vmem:[%s7833_s16] sm:$0xff]  }
 0x910   :  { %3820 = vrot.lane.b32.xlu1 %v3815_v16, %s6606_s24 }
 0x913   :  { %3892 = vrot.lane.b32.xlu0 %v3887_v41, %s6610_s4  ;;  %v6502_v41 = vld [vmem:[%s5617_s9] sm:$0xff]   ;;  %s7951_s9 = sld [smem:[%s8091_s0 + %s6635_s21]]  }
 0x914   :  { %3836 = vrot.lane.b32.xlu1 %v3831_v50, %s6610_s4  ;;  %v6503_v50 = vld [vmem:[%s7851_s27 + $0x40] sm:$0xff]   ;;  %s6633_s4 = smov 27  }
 0x915   :  { %6035 = vmatprep.subr.bf16.mxu0 %v6503_v50  ;;  %s7898_s16 = sld [smem:[%s8091_s0 + %s6633_s4]]  }
 0x91b   :  { %v6533_v50 = vld [vmem:[%s7898_s16 + $0x20] sm:$0xff]  }
 0x971   :  { %v3859_v43 = vpop.permute.xlu0 %3858 }
 0x972   :  { %v3803_v1 = vpop.permute.xlu1 %3802  ;;  %3864 = vst.msk [vmem:[#allocation3 + $0x8] sm:$0xff] %vm2927_vm4, %v3859_v43  ;;  %v6504_v43 = vld [vmem:[%s7851_s27] sm:$0xff]  }
 0x973   :  { %3808 = vst.msk [vmem:[#allocation3] sm:$0xff] %vm2927_vm4, %v3803_v1  ;;  %v6505_v1 = vld [vmem:[%s7851_s27 + $0x48] sm:$0xff]  }
 0x975   :  { %v3875_v2 = vpop.permute.xlu0 %3874 }
 0x976   :  { %v3819_v3 = vpop.permute.xlu1 %3818  ;;  %3880 = vst.msk [vmem:[#allocation3 + $0x8] sm:$0xff] %vm2944_vm5, %v3875_v2  ;;  %v6506_v2 = vld [vmem:[%s7851_s27 + $0x8] sm:$0xff]  }
 0x977   :  { %3824 = vst.msk [vmem:[#allocation3] sm:$0xff] %vm2944_vm5, %v3819_v3  ;;  %v6507_v3 = vld [vmem:[%s7851_s27 + $0x50] sm:$0xff]  }
 0x979   :  { %v3891_v51 = vpop.permute.xlu0 %3890 }
 0x97a   :  { %v3835_v60 = vpop.permute.xlu1 %3834  ;;  %3896 = vst.msk [vmem:[#allocation3 + $0x8] sm:$0xff] %vm2961_vm6, %v3891_v51  ;;  %v6508_v51 = vld [vmem:[%s7851_s27 + $0x10] sm:$0xff]  }
 0x97b   :  { %3840 = vst.msk [vmem:[#allocation3] sm:$0xff] %vm2961_vm6, %v3835_v60  ;;  %v6509_v60 = vld [vmem:[%s7851_s27 + $0x58] sm:$0xff]  }
 0x97d   :  { %v3861_v53 = vpop.permute.xlu0 %3860 }
 0x97e   :  { %3865 = vst.msk [vmem:[#allocation3 + $0x20] sm:$0xff] %vm2927_vm4, %v3861_v53  ;;  %v3805_v4 = vpop.permute.xlu1 %3804  ;;  %v6510_v53 = vld [vmem:[%s7851_s27 + $0x18] sm:$0xff]  }
 0x97f   :  { %3809 = vst.msk [vmem:[#allocation3 + $0x18] sm:$0xff] %vm2927_vm4, %v3805_v4  ;;  %v6511_v4 = vld [vmem:[%s7851_s27 + $0x60] sm:$0xff]  }
 0x981   :  { %v3877_v19 = vpop.permute.xlu0 %3876  ;;  %v3907_v54 = vld [vmem:[#allocation3 + $0x8] sm:$0xff] }
 0x982   :  { %v3906_v55 = vld [vmem:[#allocation3] sm:$0xff]  ;;  %3881 = vst.msk [vmem:[#allocation3 + $0x20] sm:$0xff] %vm2944_vm5, %v3877_v19  ;;  %v3821_v6 = vpop.permute.xlu1 %3820  ;;  %v3953_v23 = vmul.bf16 %v6497_v5, %v3907_v54  ;;  %v6513_v5 = vld [vmem:[%s7851_s27 + $0x68] sm:$0xff]  }
 0x983   :  { %v3952_v10 = vmul.bf16 %v6495_v9, %v3906_v55  ;;  %3825 = vst.msk [vmem:[#allocation3 + $0x18] sm:$0xff] %vm2944_vm5, %v3821_v6  ;;  %v6512_v9 = vld [vmem:[%s7851_s27 + $0x20] sm:$0xff]   ;;  %v6514_v55 = vld [vmem:[%s7851_s27 + $0x28] sm:$0xff]   ;;  %v6515_v6 = vld [vmem:[%s7851_s27 + $0x70] sm:$0xff]  }
 0x984   :  { %4147 = vmatprep.mubr.bf16.mxu0 %v3953_v23 }
 0x985   :  { %v3893_v34 = vpop.permute.xlu0 %3892  ;;  %4148 = vmatmul.mubr.bf16.vlgmr.msra.gmra.mrb[60].mxu0 %v3952_v10 }
 0x986   :  { %3897 = vst.msk [vmem:[#allocation3 + $0x20] sm:$0xff] %vm2961_vm6, %v3893_v34  ;;  %v3837_v11 = vpop.permute.xlu1 %3836  ;;  %6036 = vmatpush3.bf16.msra.mxu0 %v6504_v43  ;;  %v6516_v34 = vld [vmem:[%s7851_s27 + $0x30] sm:$0xff]   ;;  %v6534_v43 = vld [vmem:[%s7898_s16 + $0x68] sm:$0xff]  }
 0x987   :  { %3841 = vst.msk [vmem:[#allocation3 + $0x18] sm:$0xff] %vm2961_vm6, %v3837_v11  ;;  %6037 = vmatprep.subr.bf16.mxu0 %v6505_v1  ;;  %v6517_v11 = vld [vmem:[%s7851_s27 + $0x78] sm:$0xff]  }
 0x98a   :  { %6038 = vmatpush3.bf16.msra.mxu0 %v6506_v2 }
 0x98b   :  { %6039 = vmatprep.subr.bf16.mxu0 %v6507_v3 }
 0x98d   :  { %v3910_v61 = vld [vmem:[#allocation3 + $0x20] sm:$0xff] }
 0x98e   :  { %v3956_v22 = vmul.bf16 %v6498_v15, %v3910_v61  ;;  %v3909_v24 = vld [vmem:[#allocation3 + $0x18] sm:$0xff]  ;;  %6040 = vmatpush3.bf16.msra.mxu0 %v6508_v51  ;;  %v6535_v51 = vld [vmem:[%s7898_s16 + $0x28] sm:$0xff]  }
 0x98f   :  { %v3955_v26 = vmul.bf16 %v6500_v17, %v3909_v24  ;;  %6041 = vmatprep.subr.bf16.mxu0 %v6509_v60  ;;  %v6518_v15 = vld [vmem:[%s7851_s27 + $0x38] sm:$0xff]   ;;  %v6536_v60 = vld [vmem:[%s7898_s16 + $0x70] sm:$0xff]   ;;  %s5624_s27 = sld [smem:[%s8091_s0 + %s6636_s14]]  }
 0x990   :  { %4155 = vmatprep.mubr.bf16.mxu0 %v3956_v22 }
 0x991   :  { %4156 = vmatmul.mubr.bf16.gmra.mrb[64].mxu0 %v3955_v26 }
 0x992   :  { %6042 = vmatpush3.bf16.msra.mxu0 %v6510_v53 }
 0x993   :  { %6043 = vmatprep.subr.bf16.mxu0 %v6511_v4  ;;  %v6537_v4 = vld [vmem:[%s7898_s16 + $0x30] sm:$0xff]  }
 0x996   :  { %6044 = vmatpush3.bf16.msra.mxu0 %v6512_v9  ;;  %v6538_v9 = vld [vmem:[%s7898_s16 + $0x78] sm:$0xff]  }
 0x997   :  { %6045 = vmatprep.subr.bf16.mxu0 %v6513_v5  ;;  %v6539_v5 = vld [vmem:[%s7898_s16 + $0x38] sm:$0xff]  }
 0x99a   :  { %6046 = vmatpush3.bf16.msra.mxu0 %v6514_v55 }
 0x99b   :  { %6047 = vmatprep.subr.bf16.mxu0 %v6515_v6 }
 0x99e   :  { %6048 = vmatpush3.bf16.msra.mxu0 %v6516_v34 }
 0x99f   :  { %6049 = vmatprep.subr.bf16.mxu0 %v6517_v11 }
 0x9a2   :  { %6050 = vmatpush3.bf16.msra.mxu0 %v6518_v15 }
 0x9e1   :  { %v6214_v52 = vpop.f32.mrb[48].mxu1 }
 0x9e2   :  { %v4198_v27 = vpop.f32.mrb[49].mxu1 }
 0x9e3   :  { %v6215_v45 = vpop.f32.mrb[50].mxu1 }
 0x9e4   :  { %v4201_v28 = vpop.f32.mrb[51].mxu1 }
 0xa58   :  { %v6014_v7 = vpop.f32.mrb[60].mxu0 }
 0xa59   :  { %v6015_v31 = vpop.f32.mrb[61].mxu0 }
 0xa5a   :  { %v6016_v13 = vadd.f32 %v6015_v31, %v6014_v7  ;;  %v6017_v30 = vpop.f32.mrb[62].mxu0 }
 0xa5b   :  { %v6018_v33 = vpop.f32.mrb[63].mxu0 }
 0xa5c   :  { %v4150_v35 = vadd.f32 %v6016_v13, %v5790_v8  ;;  %v6019_v36 = vadd.f32 %v6018_v33, %v6017_v30  ;;  %v6521_v33 = vld [vmem:[%s7871_s1 + $0x4] ss:$8 sps:$4 sm:$0xff]  }
 0xa5e   :  { %v4199_v38 = vadd.f32 %v4198_v27, %v4150_v35  ;;  %v4153_v37 = vadd.f32 %v6019_v36, %v5790_v8  ;;  %v6519_v35 = vld [vmem:[%s7871_s1] ss:$8 sps:$4 sm:$0xff]   ;;  %s7982_s1 = sld [smem:[%s8091_s0 + %s6637_s28]]  }
 0xa60   :  { %v4202_v39 = vadd.f32 %v4201_v28, %v4153_v37  ;;  %v4213_v25 = vmax.f32 %v4199_v38, 0.0 }
 0xa62   :  { %v4214_v40 = vmax.f32 %v4202_v39, 0.0 }
 0xa64   :  { %v4219_v42 = vpack.c.bf16 %v4214_v40, %v4213_v25  ;;  %v6020_v14 = vpop.f32.mrb[64].mxu0  ;;  %v6522_v25 = vld [vmem:[%s5621_s6] sm:$0xff]  }
 0xa65   :  { %v6021_v44 = vpop.f32.mrb[65].mxu0 }
 0xa66   :  { %v6022_v12 = vadd.f32 %v6021_v44, %v6020_v14  ;;  %v6023_v46 = vpop.f32.mrb[66].mxu0  ;;  %6217 = vmatpush3.bf16.msra.mxu1 %v4219_v42  ;;  %v5817_v42 = vld [vmem:[%s5620_s10] ss:$0 sm:$0xff]  ;;  %s5635_s10 = sld [smem:[%s8091_s0 + %s6645_s7]]  }
 0xa67   :  { %v6024_v48 = vpop.f32.mrb[67].mxu0  ;;  %6218 = vmatprep.subr.bf16.mxu1 %v6625_v29 }
 0xa68   :  { %v4158_v56 = vadd.f32 %v6022_v12, %v5790_v8  ;;  %v6025_v32 = vadd.f32 %v6024_v48, %v6023_v46 }
 0xa6a   :  { %v4207_v20 = vadd.f32 %v6214_v52, %v4158_v56  ;;  %v4161_v47 = vadd.f32 %v6025_v32, %v5790_v8 }
 0xa6c   :  { %v4210_v57 = vadd.f32 %v6215_v45, %v4161_v47  ;;  %v4215_v58 = vmax.f32 %v4207_v20, 0.0 }
 0xa6e   :  { %v4216_v59 = vmax.f32 %v4210_v57, 0.0 }
 0xa70   :  { %v4220_v62 = vpack.c.bf16 %v4216_v59, %v4215_v58  ;;  %v6523_v58 = vld [vmem:[%s5621_s6 + $0x8] sm:$0xff]   ;;  %v6524_v59 = vld [vmem:[%s7898_s16 + $0x40] sm:$0xff]   ;;  %s5634_s6 = sld [smem:[%s8091_s0 + %s6644_s2]]  }
 0xa72   :  { %6219 = vmatpush3.bf16.msra.mxu1 %v4220_v62  ;;  %v6525_v62 = vld [vmem:[%s7898_s16] sm:$0xff]  }
 0xa73   :  { %6224 = vmatprep.subr.bf16.mxu1 %v6625_v29 }
 0xa75   :  { %6221 = vmatmul.mubr.msk.bf16.vlgmr.msra.gmra.mrb[52].mxu1 %vm2896_vm3, %v6501_v63  ;;  %v6526_v63 = vld [vmem:[%s7898_s16 + $0x48] sm:$0xff]  }
 0xa76   :  { %6226 = vmatprep.mubr.msk.bf16.mxu1 %vm6626_vm7, %v6625_v29 }
 0xb48   :  { %v4263_v16 = vpop.f32.mrb[52].mxu1 }
 0xb49   :  { %v6222_v49 = vpop.f32.mrb[53].mxu1 }
 0xb4a   :  { %v4266_v0 = vpop.f32.mrb[54].mxu1  ;;  %v6528_v49 = vld [vmem:[%s7898_s16 + $0x50] sm:$0xff]  }
 0xb4b   :  { %v4272_v18 = vpack.c.bf16 %v4266_v0, %v4263_v16  ;;  %v6223_v21 = vpop.f32.mrb[55].mxu1  ;;  %v6527_v16 = vld [vmem:[%s7898_s16 + $0x8] sm:$0xff]   ;;  %v6529_v0 = vld [vmem:[%s7898_s16 + $0x10] sm:$0xff]  }
 0xb4c   :  { %v6531_v21 = vld [vmem:[%s7898_s16 + $0x18] sm:$0xff]  }
 0xb4d   :  { %6225 = vmatpush3.bf16.msra.mxu1 %v4272_v18  ;;  %v6530_v18 = vld [vmem:[%s7898_s16 + $0x58] sm:$0xff]  }
 0xb50   :  { %6227 = vmatmul.mubr.msk.bf16.vlgmr.msra.gmra.mrb[56].mxu1 %vm1039_vm11, %v6502_v41  ;;  %v6532_v41 = vld [vmem:[%s7898_s16 + $0x60] sm:$0xff]  }
 0xb51   :  { %6232 = vmatprep.mubr.msk.bf16.mxu1 %vm1039_vm11, %v6522_v25  ;;  %v6540_v25 = vld [vmem:[%s7927_s20] ss:$8 sps:$4 sm:$0xff]  }
 0xc23   :  { %v4315_v19 = vpop.f32.mrb[56].mxu1 }
 0xc24   :  { %v6228_v54 = vpop.f32.mrb[57].mxu1  ;;  %4323 = vst.msk [vmem:[#allocation2] sm:$0xff] %vm4322_vm8, %v4315_v19  ;;  %4325 = vst.msk [vmem:[#allocation2 + $0x10] sm:$0xff] %vm4322_vm8, %v4315_v19 }
 0xc25   :  { %v4318_v23 = vpop.f32.mrb[58].mxu1 }
 0xc26   :  { %v6229_v10 = vpop.f32.mrb[59].mxu1  ;;  %4324 = vst.msk [vmem:[#allocation2 + $0x8] sm:$0xff] %vm4322_vm8, %v4318_v23  ;;  %4326 = vst.msk [vmem:[#allocation2 + $0x18] sm:$0xff] %vm4322_vm8, %v4318_v23 }
 0xc2b   :  { %v4327_v7 = vld [vmem:[#allocation2] sm:$0xff] }
 0xc2d   :  { %v4344_v17 = vld [vmem:[#allocation2 + $0x3] sm:$0xff]  ;;  %v4345_v61 = vld [vmem:[#allocation2 + $0xb] sm:$0xff] }
 0xc2e   :  { %v4331_v22 = vld [vmem:[#allocation2 + $0x1] sm:$0xff]  ;;  %v4346_v24 = vpack.c.bf16 %v4345_v61, %v4344_v17  ;;  %v4332_v26 = vld [vmem:[#allocation2 + $0x9] sm:$0xff] }
 0xc2f   :  { %v4340_v52 = vld [vmem:[#allocation2 + $0x2] sm:$0xff]  ;;  %v4341_v27 = vld [vmem:[#allocation2 + $0xa] sm:$0xff]  ;;  %v4333_v45 = vpack.c.bf16 %v4332_v26, %v4331_v22 }
 0xc30   :  { %v4342_v28 = vpack.c.bf16 %v4341_v27, %v4340_v52  ;;  %v4328_v8 = vld [vmem:[#allocation2 + $0x8] sm:$0xff]  ;;  %4348 = vrot.lane.b32.xlu0 %v4346_v24, %s6606_s24 }
 0xc31   :  { %v4329_v31 = vpack.c.bf16 %v4328_v8, %v4327_v7  ;;  %4335 = vrot.lane.b32.xlu1 %v4333_v45, %s6606_s24 }
 0xc32   :  { %4343 = vst.msk [vmem:[#allocation3 + $0x8] sm:$0xff] %vm4322_vm8, %v4342_v28 }
 0xc33   :  { %4330 = vst.msk [vmem:[#allocation3] sm:$0xff] %vm4322_vm8, %v4329_v31 }
 0xca2   :  { %v4349_v13 = vpop.permute.xlu0 %4348 }
 0xca3   :  { %4351 = vst.msk [vmem:[#allocation3 + $0x8] sm:$0xff] %vm4338_vm9, %v4349_v13  ;;  %v4336_v30 = vpop.permute.xlu1 %4335 }
 0xca4   :  { %4339 = vst.msk [vmem:[#allocation3] sm:$0xff] %vm4338_vm9, %v4336_v30 }
 0xcaa   :  { %v4353_v36 = vld [vmem:[#allocation3 + $0x8] sm:$0xff] }
 0xcab   :  { %v4352_v38 = vld [vmem:[#allocation3] sm:$0xff]  ;;  %v4367_v37 = vmul.bf16 %v6521_v33, %v4353_v36 }
 0xcac   :  { %v4366_v39 = vmul.bf16 %v6519_v35, %v4352_v38 }
 0xcad   :  { %4535 = vmatprep.mubr.bf16.mxu0 %v4367_v37 }
 0xcae   :  { %4536 = vmatmul.mubr.bf16.vlgmr.msra.gmra.mrb[68].mxu0 %v4366_v39  ;;  %v6542_v39 = vld [vmem:[%s7927_s20 + $0x4] ss:$8 sps:$4 sm:$0xff]  }
 0xd81   :  { %v6051_v40 = vpop.f32.mrb[68].mxu0 }
 0xd82   :  { %v6052_v14 = vpop.f32.mrb[69].mxu0 }
 0xd83   :  { %v6053_v44 = vadd.f32 %v6052_v14, %v6051_v40  ;;  %v6054_v12 = vpop.f32.mrb[70].mxu0 }
 0xd84   :  { %v6055_v46 = vpop.f32.mrb[71].mxu0 }
 0xd85   :  { %v4538_v48 = vadd.f32 %v6053_v44, %v5817_v42  ;;  %v6056_v56 = vadd.f32 %v6055_v46, %v6054_v12  ;;  %v6543_v44 = vld [vmem:[%s7927_s20 + $0x14] ss:$8 sps:$4 sm:$0xff]  }
 0xd87   :  { %v4541_v32 = vadd.f32 %v6056_v56, %v5817_v42  ;;  %v4544_v20 = vmax.f32 %v4538_v48, 0.0  ;;  %v6545_v56 = vld [vmem:[%s7927_s20 + $0x10] ss:$8 sps:$4 sm:$0xff]  }
 0xd89   :  { %v4545_v47 = vmax.f32 %v4541_v32, 0.0 }
 0xd8b   :  { %v4550_v57 = vpack.c.bf16 %v4545_v47, %v4544_v20  ;;  %v6546_v47 = vld [vmem:[%s7951_s9 + $0x40] sm:$0xff]  }
 0xd8c   :  { %6088 = vmatprep.subr.bf16.mxu0 %v6546_v47 }
 0xd8d   :  { %6230 = vmatprep.subr.bf16.mxu1 %v4550_v57 }
 0xd8e   :  { %6231 = vmatpush3.bf16.msra.mxu1 %v4550_v57  ;;  %v6547_v57 = vld [vmem:[%s7951_s9] sm:$0xff]  }
 0xd8f   :  { %6060 = vmatprep.subr.bf16.mxu1 %v6524_v59  ;;  %6089 = vmatpush3.bf16.msra.mxu0 %v6547_v57  ;;  %v6549_v59 = vld [vmem:[%s7951_s9 + $0x8] sm:$0xff]  }
 0xd91   :  { %6233 = vmatmul.mubr.msk.bf16.vlgmr.msra.gmra.mrb[60].mxu1 %vm1039_vm11, %v6523_v58  ;;  %v6548_v58 = vld [vmem:[%s7951_s9 + $0x48] sm:$0xff]  }
 0xd92   :  { %6061 = vmatpush3.bf16.msra.mxu1 %v6525_v62  ;;  %6090 = vmatprep.subr.bf16.mxu0 %v6548_v58  ;;  %v6550_v62 = vld [vmem:[%s7951_s9 + $0x50] sm:$0xff]   ;;  %v6562_v58 = vld [vmem:[%s7982_s1] ss:$8 sps:$4 sm:$0xff]  }
 0xd93   :  { %6062 = vmatprep.subr.bf16.mxu1 %v6526_v63  ;;  %6091 = vmatpush3.bf16.msra.mxu0 %v6549_v59  ;;  %v6551_v63 = vld [vmem:[%s7951_s9 + $0x10] sm:$0xff]   ;;  %v6564_v59 = vld [vmem:[%s7982_s1 + $0x4] ss:$8 sps:$4 sm:$0xff]  }
 0xd94   :  { %6092 = vmatprep.subr.bf16.mxu0 %v6550_v62 }
 0xd96   :  { %6063 = vmatpush3.bf16.msra.mxu1 %v6527_v16  ;;  %v6552_v16 = vld [vmem:[%s7951_s9 + $0x58] sm:$0xff]  }
 0xd97   :  { %6064 = vmatprep.subr.bf16.mxu1 %v6528_v49  ;;  %v6553_v49 = vld [vmem:[%s7951_s9 + $0x18] sm:$0xff]   ;;  %6093 = vmatpush3.bf16.msra.mxu0 %v6551_v63 }
 0xd98   :  { %6094 = vmatprep.subr.bf16.mxu0 %v6552_v16 }
 0xd9a   :  { %6065 = vmatpush3.bf16.msra.mxu1 %v6529_v0  ;;  %v6554_v0 = vld [vmem:[%s7951_s9 + $0x60] sm:$0xff]  }
 0xd9b   :  { %6066 = vmatprep.subr.bf16.mxu1 %v6530_v18  ;;  %6095 = vmatpush3.bf16.msra.mxu0 %v6553_v49  ;;  %v6555_v18 = vld [vmem:[%s7951_s9 + $0x20] sm:$0xff]  }
 0xd9c   :  { %6096 = vmatprep.subr.bf16.mxu0 %v6554_v0  ;;  %v6565_v0 = vld [vmem:[%s7982_s1 + $0x14] ss:$8 sps:$4 sm:$0xff]  }
 0xd9e   :  { %6067 = vmatpush3.bf16.msra.mxu1 %v6531_v21  ;;  %v6556_v21 = vld [vmem:[%s7951_s9 + $0x68] sm:$0xff]  }
 0xd9f   :  { %6068 = vmatprep.subr.bf16.mxu1 %v6532_v41  ;;  %6097 = vmatpush3.bf16.msra.mxu0 %v6555_v18 }
 0xda0   :  { %6098 = vmatprep.subr.bf16.mxu0 %v6556_v21 }
 0xda2   :  { %6069 = vmatpush3.bf16.msra.mxu1 %v6533_v50  ;;  %v5842_v50 = vld [vmem:[%s5624_s27] ss:$0 sm:$0xff] }
 0xda3   :  { %6070 = vmatprep.subr.bf16.mxu1 %v6534_v43 }
 0xda6   :  { %6071 = vmatpush3.bf16.msra.mxu1 %v6535_v51 }
 0xda7   :  { %6072 = vmatprep.subr.bf16.mxu1 %v6536_v60 }
 0xdaa   :  { %6073 = vmatpush3.bf16.msra.mxu1 %v6537_v4 }
 0xdab   :  { %6074 = vmatprep.subr.bf16.mxu1 %v6538_v9 }
 0xdae   :  { %6075 = vmatpush3.bf16.msra.mxu1 %v6539_v5 }
 0xdaf   :  { %6244 = vmatprep.subr.bf16.mxu1 %v6625_v29 }
 0xe64   :  { %v6234_v1 = vpop.f32.mrb[60].mxu1 }
 0xe65   :  { %4622 = vst.msk [vmem:[#allocation2 + $0x30] sm:$0xff] %vm4322_vm8, %v6234_v1  ;;  %4618 = vst.msk [vmem:[#allocation2 + $0x10] sm:$0xff] %vm4322_vm8, %v6234_v1  ;;  %v4601_v2 = vpop.f32.mrb[61].mxu1 }
 0xe66   :  { %4616 = vst.msk [vmem:[#allocation2] sm:$0xff] %vm4322_vm8, %v4601_v2  ;;  %4620 = vst.msk [vmem:[#allocation2 + $0x20] sm:$0xff] %vm4322_vm8, %v4601_v2  ;;  %v6235_v3 = vpop.f32.mrb[62].mxu1 }
 0xe67   :  { %4623 = vst.msk [vmem:[#allocation2 + $0x38] sm:$0xff] %vm4322_vm8, %v6235_v3  ;;  %4619 = vst.msk [vmem:[#allocation2 + $0x18] sm:$0xff] %vm4322_vm8, %v6235_v3  ;;  %v4604_v53 = vpop.f32.mrb[63].mxu1 }
 0xe68   :  { %4621 = vst.msk [vmem:[#allocation2 + $0x28] sm:$0xff] %vm4322_vm8, %v4604_v53  ;;  %4617 = vst.msk [vmem:[#allocation2 + $0x8] sm:$0xff] %vm4322_vm8, %v4604_v53 }
 0xe6c   :  { %v4626_v22 = vld [vmem:[#allocation2 + $0x10] sm:$0xff] }
 0xe6d   :  { %v4624_v10 = vld [vmem:[#allocation2] sm:$0xff] }
 0xe6e   :  { %v4658_v6 = vld [vmem:[#allocation2 + $0x14] sm:$0xff]  ;;  %v4659_v23 = vld [vmem:[#allocation2 + $0x1c] sm:$0xff] }
 0xe6f   :  { %v4656_v19 = vld [vmem:[#allocation2 + $0x4] sm:$0xff]  ;;  %v4657_v54 = vld [vmem:[#allocation2 + $0xc] sm:$0xff]  ;;  %v4635_v17 = vld [vmem:[#allocation2 + $0x19] sm:$0xff]  ;;  %v4661_v30 = vpack.c.bf16 %v4659_v23, %v4658_v6 }
 0xe70   :  { %v4632_v55 = vld [vmem:[#allocation2 + $0x1] sm:$0xff]  ;;  %v4660_v34 = vpack.c.bf16 %v4657_v54, %v4656_v19  ;;  %v4633_v11 = vld [vmem:[#allocation2 + $0x9] sm:$0xff]  ;;  %v4634_v15 = vld [vmem:[#allocation2 + $0x11] sm:$0xff] }
 0xe71   :  { %v4648_v61 = vld [vmem:[#allocation2 + $0x3] sm:$0xff]  ;;  %v4636_v24 = vpack.c.bf16 %v4633_v11, %v4632_v55  ;;  %v4649_v26 = vld [vmem:[#allocation2 + $0xb] sm:$0xff]  ;;  %v4650_v27 = vld [vmem:[#allocation2 + $0x13] sm:$0xff]  ;;  %v4637_v33 = vpack.c.bf16 %v4635_v17, %v4634_v15 }
 0xe72   :  { %v4625_v52 = vld [vmem:[#allocation2 + $0x8] sm:$0xff]  ;;  %4664 = vrot.lane.b32.xlu0 %v4660_v34, %s6606_s24  ;;  %v4652_v45 = vpack.c.bf16 %v4649_v26, %v4648_v61  ;;  %v4651_v7 = vld [vmem:[#allocation2 + $0x1b] sm:$0xff]  ;;  %v6558_v11 = vld [vmem:[%s7951_s9 + $0x70] sm:$0xff]  }
 0xe73   :  { %v4628_v28 = vpack.c.bf16 %v4625_v52, %v4624_v10  ;;  %v4627_v8 = vld [vmem:[#allocation2 + $0x18] sm:$0xff]  ;;  %4640 = vrot.lane.b32.xlu1 %v4636_v24, %s6606_s24  ;;  %v4653_v31 = vpack.c.bf16 %v4651_v7, %v4650_v27  ;;  %v6557_v34 = vld [vmem:[%s7951_s9 + $0x28] sm:$0xff]   ;;  %v6559_v26 = vld [vmem:[%s7951_s9 + $0x30] sm:$0xff]  }
 0xe74   :  { %v4629_v13 = vpack.c.bf16 %v4627_v8, %v4626_v22  ;;  %4654 = vst.msk [vmem:[#allocation3 + $0x8] sm:$0xff] %vm4322_vm8, %v4652_v45  ;;  %6099 = vmatpush3.bf16.msra.mxu0 %v6557_v34  ;;  %v6560_v52 = vld [vmem:[%s7951_s9 + $0x78] sm:$0xff]  }
 0xe75   :  { %4630 = vst.msk [vmem:[#allocation3] sm:$0xff] %vm4322_vm8, %v4628_v28  ;;  %4655 = vst.msk [vmem:[#allocation3 + $0x20] sm:$0xff] %vm4322_vm8, %v4653_v31  ;;  %6100 = vmatprep.subr.bf16.mxu0 %v6558_v11  ;;  %v6561_v45 = vld [vmem:[%s7951_s9 + $0x38] sm:$0xff]  }
 0xe76   :  { %4631 = vst.msk [vmem:[#allocation3 + $0x18] sm:$0xff] %vm4322_vm8, %v4629_v13  ;;  %4666 = vrot.lane.b32.xlu0 %v4661_v30, %s6606_s24 }
 0xe77   :  { %4642 = vrot.lane.b32.xlu1 %v4637_v33, %s6606_s24 }
 0xe78   :  { %6101 = vmatpush3.bf16.msra.mxu0 %v6559_v26 }
 0xe79   :  { %6102 = vmatprep.subr.bf16.mxu0 %v6560_v52 }
 0xe7c   :  { %6103 = vmatpush3.bf16.msra.mxu0 %v6561_v45 }
 0xe7d   :  { %6236 = vmatprep.subr.bf16.mxu0 %v6625_v29 }
 0xee4   :  { %v4665_v35 = vpop.permute.xlu0 %4664 }
 0xee5   :  { %4670 = vst.msk [vmem:[#allocation3 + $0x8] sm:$0xff] %vm4338_vm9, %v4665_v35  ;;  %v4641_v36 = vpop.permute.xlu1 %4640 }
 0xee6   :  { %4646 = vst.msk [vmem:[#allocation3] sm:$0xff] %vm4338_vm9, %v4641_v36 }
 0xee8   :  { %v4667_v38 = vpop.permute.xlu0 %4666 }
 0xee9   :  { %4671 = vst.msk [vmem:[#allocation3 + $0x20] sm:$0xff] %vm4338_vm9, %v4667_v38  ;;  %v4643_v37 = vpop.permute.xlu1 %4642 }
 0xeea   :  { %4647 = vst.msk [vmem:[#allocation3 + $0x18] sm:$0xff] %vm4338_vm9, %v4643_v37 }
 0xeec   :  { %v4673_v40 = vld [vmem:[#allocation3 + $0x8] sm:$0xff] }
 0xeed   :  { %v4701_v42 = vmul.bf16 %v6542_v39, %v4673_v40  ;;  %v4672_v14 = vld [vmem:[#allocation3] sm:$0xff] }
 0xeee   :  { %v4700_v12 = vmul.bf16 %v6540_v25, %v4672_v14 }
 0xeef   :  { %4871 = vmatprep.mubr.bf16.mxu1 %v4701_v42 }
 0xef0   :  { %4872 = vmatmul.mubr.bf16.vlgmr.msra.gmra.mrb[64].mxu1 %v4700_v12  ;;  %v4675_v46 = vld [vmem:[#allocation3 + $0x20] sm:$0xff] }
 0xef1   :  { %v4703_v48 = vmul.bf16 %v6543_v44, %v4675_v46  ;;  %v4674_v32 = vld [vmem:[#allocation3 + $0x18] sm:$0xff] }
 0xef2   :  { %v4702_v20 = vmul.bf16 %v6545_v56, %v4674_v32 }
 0xef3   :  { %4879 = vmatprep.mubr.bf16.mxu1 %v4703_v48 }
 0xef8   :  { %4880 = vmatmul.mubr.bf16.gmra.mrb[68].mxu1 %v4702_v20 }
 0xef9   :  { %6260 = vmatprep.mubr.msk.bf16.mxu1 %vm6626_vm7, %v6625_v29 }
 0xfc3   :  { %v6076_v41 = vpop.f32.mrb[64].mxu1 }
 0xfc4   :  { %v6077_v43 = vpop.f32.mrb[65].mxu1 }
 0xfc5   :  { %v6078_v1 = vadd.f32 %v6077_v43, %v6076_v41  ;;  %v6079_v2 = vpop.f32.mrb[66].mxu1  ;;  %v6567_v41 = vld [vmem:[%s7982_s1 + $0x10] ss:$8 sps:$4 sm:$0xff]  }
 0xfc6   :  { %v6080_v3 = vpop.f32.mrb[67].mxu1 }
 0xfc7   :  { %v4874_v51 = vadd.f32 %v6078_v1, %v5842_v50  ;;  %v6081_v60 = vadd.f32 %v6080_v3, %v6079_v2  ;;  %v6569_v1 = vld [vmem:[%s8013_s8] sm:$0xff]   ;;  %v6570_v2 = vld [vmem:[%s8013_s8 + $0x8] sm:$0xff]   ;;  %v6571_v3 = vld [vmem:[%s8013_s8 + $0x10] sm:$0xff]  }
 0xfc8   :  { %6245 = vmatpush3.bf16.msra.mxu1 %v6569_v1  ;;  %v5891_v1 = vld [vmem:[%s5632_s29] ss:$0 sm:$0xff] }
 0xfc9   :  { %v4888_v53 = vmax.f32 %v4874_v51, 0.0  ;;  %v4877_v4 = vadd.f32 %v6081_v60, %v5842_v50  ;;  %6246 = vmatprep.subr.bf16.mxu1 %v6625_v29  ;;  %v6572_v51 = vld [vmem:[%s8013_s8 + $0x18] sm:$0xff]   ;;  %v6573_v60 = vld [vmem:[%s8013_s8 + $0x20] sm:$0xff]  }
 0xfcb   :  { %4892 = vst.msk [vmem:[#allocation2] sm:$0xff] %vm4322_vm8, %v4888_v53  ;;  %4896 = vst.msk [vmem:[#allocation2 + $0x20] sm:$0xff] %vm4322_vm8, %v4888_v53  ;;  %v4889_v9 = vmax.f32 %v4877_v4, 0.0  ;;  %v6082_v5 = vpop.f32.mrb[68].mxu1  ;;  %v6574_v53 = vld [vmem:[%s8013_s8 + $0x28] sm:$0xff]   ;;  %v6575_v4 = vld [vmem:[%s8013_s8 + $0x30] sm:$0xff]  }
 0xfcc   :  { %v6083_v19 = vpop.f32.mrb[69].mxu1  ;;  %6247 = vmatpush3.bf16.msra.mxu1 %v6570_v2 }
 0xfcd   :  { %4897 = vst.msk [vmem:[#allocation2 + $0x28] sm:$0xff] %vm4322_vm8, %v4889_v9  ;;  %4893 = vst.msk [vmem:[#allocation2 + $0x8] sm:$0xff] %vm4322_vm8, %v4889_v9  ;;  %v6084_v54 = vadd.f32 %v6083_v19, %v6082_v5  ;;  %v6085_v55 = vpop.f32.mrb[70].mxu1  ;;  %6248 = vmatprep.subr.bf16.mxu1 %v6625_v29  ;;  %v5863_v5 = vld [vmem:[%s5627_s15] ss:$0 sm:$0xff] }
 0xfce   :  { %v6086_v6 = vpop.f32.mrb[71].mxu1 }
 0xfcf   :  { %v4882_v23 = vadd.f32 %v6084_v54, %v5842_v50  ;;  %v6087_v10 = vadd.f32 %v6086_v6, %v6085_v55 }
 0xfd0   :  { %6249 = vmatpush3.bf16.msra.mxu1 %v6571_v3 }
 0xfd1   :  { %v4890_v15 = vmax.f32 %v4882_v23, 0.0  ;;  %v4885_v17 = vadd.f32 %v6087_v10, %v5842_v50  ;;  %6250 = vmatprep.subr.bf16.mxu1 %v6625_v29 }
 0xfd2   :  { %v4900_v22 = vld [vmem:[#allocation2] sm:$0xff] }
 0xfd3   :  { %4898 = vst.msk [vmem:[#allocation2 + $0x30] sm:$0xff] %vm4322_vm8, %v4890_v15  ;;  %4894 = vst.msk [vmem:[#allocation2 + $0x10] sm:$0xff] %vm4322_vm8, %v4890_v15  ;;  %v4891_v61 = vmax.f32 %v4885_v17, 0.0 }
 0xfd4   :  { %v4901_v24 = vld [vmem:[#allocation2 + $0x8] sm:$0xff]  ;;  %6251 = vmatpush3.bf16.msra.mxu1 %v6572_v51 }
 0xfd5   :  { %4899 = vst.msk [vmem:[#allocation2 + $0x38] sm:$0xff] %vm4322_vm8, %v4891_v61  ;;  %4895 = vst.msk [vmem:[#allocation2 + $0x18] sm:$0xff] %vm4322_vm8, %v4891_v61  ;;  %v4904_v27 = vpack.c.bf16 %v4901_v24, %v4900_v22  ;;  %v4932_v28 = vld [vmem:[#allocation2 + $0x4] sm:$0xff]  ;;  %6252 = vmatprep.subr.bf16.mxu1 %v6625_v29 }
 0xfd6   :  { %v4908_v7 = vld [vmem:[#allocation2 + $0x1] sm:$0xff] }
 0xfd7   :  { %4906 = vst.msk [vmem:[#allocation3] sm:$0xff] %vm4322_vm8, %v4904_v27  ;;  %v4924_v8 = vld [vmem:[#allocation2 + $0x3] sm:$0xff] }
 0xfd8   :  { %6253 = vmatpush3.bf16.msra.mxu1 %v6573_v60 }
 0xfd9   :  { %6254 = vmatprep.subr.bf16.mxu1 %v6625_v29 }
 0xfda   :  { %v4933_v31 = vld [vmem:[#allocation2 + $0xc] sm:$0xff] }
 0xfdb   :  { %v4909_v13 = vld [vmem:[#allocation2 + $0x9] sm:$0xff]  ;;  %v4936_v33 = vpack.c.bf16 %v4933_v31, %v4932_v28 }
 0xfdc   :  { %v4925_v30 = vld [vmem:[#allocation2 + $0xb] sm:$0xff]  ;;  %v4912_v35 = vpack.c.bf16 %v4909_v13, %v4908_v7  ;;  %v4934_v38 = vld [vmem:[#allocation2 + $0x14] sm:$0xff]  ;;  %v4935_v37 = vld [vmem:[#allocation2 + $0x1c] sm:$0xff]  ;;  %6255 = vmatpush3.bf16.msra.mxu1 %v6574_v53 }
 0xfdd   :  { %v4928_v36 = vpack.c.bf16 %v4925_v30, %v4924_v8  ;;  %v4910_v39 = vld [vmem:[#allocation2 + $0x11] sm:$0xff]  ;;  %4940 = vrot.lane.b32.xlu0 %v4936_v33, %s6606_s24  ;;  %v4911_v25 = vld [vmem:[#allocation2 + $0x19] sm:$0xff]  ;;  %v4937_v46 = vpack.c.bf16 %v4935_v37, %v4934_v38  ;;  %6256 = vmatprep.subr.bf16.mxu1 %v6625_v29 }
 0xfde   :  { %4916 = vrot.lane.b32.xlu1 %v4912_v35, %s6606_s24  ;;  %v4926_v40 = vld [vmem:[#allocation2 + $0x13] sm:$0xff]  ;;  %v4927_v42 = vld [vmem:[#allocation2 + $0x1b] sm:$0xff]  ;;  %v4913_v48 = vpack.c.bf16 %v4911_v25, %v4910_v39  ;;  %v6578_v35 = vld [vmem:[%s5631_s18 + $0x8] sm:$0xff]  }
 0xfdf   :  { %4930 = vst.msk [vmem:[#allocation3 + $0x8] sm:$0xff] %vm4322_vm8, %v4928_v36  ;;  %v4929_v14 = vpack.c.bf16 %v4927_v42, %v4926_v40  ;;  %v4902_v44 = vld [vmem:[#allocation2 + $0x10] sm:$0xff]  ;;  %v4903_v12 = vld [vmem:[#allocation2 + $0x18] sm:$0xff]  ;;  %v6568_v13 = vld [vmem:[%s8008_s3] sm:$0xff]  }
 0xfe0   :  { %v4905_v56 = vpack.c.bf16 %v4903_v12, %v4902_v44  ;;  %6257 = vmatpush3.bf16.msra.mxu1 %v6575_v4  ;;  %v6576_v30 = vld [vmem:[%s8013_s8 + $0x38] sm:$0xff]   ;;  %v6577_v33 = vld [vmem:[%s5631_s18] sm:$0xff]   ;;  %v6579_v36 = vld [vmem:[%s5631_s18 + $0x10] sm:$0xff]  }
 0xfe1   :  { %4931 = vst.msk [vmem:[#allocation3 + $0x20] sm:$0xff] %vm4322_vm8, %v4929_v14  ;;  %4942 = vrot.lane.b32.xlu0 %v4937_v46, %s6606_s24  ;;  %6258 = vmatprep.subr.bf16.mxu1 %v6625_v29  ;;  %v6580_v38 = vld [vmem:[%s5631_s18 + $0x18] sm:$0xff]   ;;  %v6581_v37 = vld [vmem:[%s5631_s18 + $0x20] sm:$0xff]   ;;  %v6582_v39 = vld [vmem:[%s5631_s18 + $0x28] sm:$0xff]  }
 0xfe2   :  { %4918 = vrot.lane.b32.xlu1 %v4913_v48, %s6606_s24  ;;  %4907 = vst.msk [vmem:[#allocation3 + $0x18] sm:$0xff] %vm4322_vm8, %v4905_v56  ;;  %v6583_v12 = vld [vmem:[%s5631_s18 + $0x30] sm:$0xff]   ;;  %v6584_v46 = vld [vmem:[%s5631_s18 + $0x38] sm:$0xff]   ;;  %v6585_v48 = vld [vmem:[%s8055_s22] sm:$0xff]   ;;  %s5636_s24 = sld [smem:[%s8091_s0 + %s6601_s13]]   ;;  %s6646_s13 = smov 41  }
 0xfe3   :  { %v6586_v56 = vld [vmem:[%s8055_s22 + $0x8] sm:$0xff]   ;;  %s5637_s11 = sld [smem:[%s8091_s0 + %s6646_s13]]  }
 0xfe4   :  { %6259 = vmatpush3.bf16.msra.mxu1 %v6576_v30 }
 0xfe5   :  { %6284 = vmatprep.subr.bf16.mxu1 %v6625_v29 }
0x104f   :  { %v4941_v32 = vpop.permute.xlu0 %4940 }
0x1050   :  { %v4917_v20 = vpop.permute.xlu1 %4916  ;;  %4946 = vst.msk [vmem:[#allocation3 + $0x8] sm:$0xff] %vm4338_vm9, %v4941_v32  ;;  %v6587_v32 = vld [vmem:[%s8055_s22 + $0x10] sm:$0xff]  }
0x1051   :  { %4922 = vst.msk [vmem:[#allocation3] sm:$0xff] %vm4338_vm9, %v4917_v20  ;;  %v6588_v20 = vld [vmem:[%s8055_s22 + $0x18] sm:$0xff]  }
0x1053   :  { %v4943_v47 = vpop.permute.xlu0 %4942 }
0x1054   :  { %v4919_v57 = vpop.permute.xlu1 %4918  ;;  %4947 = vst.msk [vmem:[#allocation3 + $0x20] sm:$0xff] %vm4338_vm9, %v4943_v47  ;;  %v6589_v47 = vld [vmem:[%s8055_s22 + $0x20] sm:$0xff]  }
0x1055   :  { %4923 = vst.msk [vmem:[#allocation3 + $0x18] sm:$0xff] %vm4338_vm9, %v4919_v57  ;;  %v6590_v57 = vld [vmem:[%s8055_s22 + $0x28] sm:$0xff]  }
0x1057   :  { %v4949_v62 = vld [vmem:[#allocation3 + $0x8] sm:$0xff] }
0x1058   :  { %v4948_v63 = vld [vmem:[#allocation3] sm:$0xff]  ;;  %v4977_v16 = vmul.bf16 %v6564_v59, %v4949_v62 }
0x1059   :  { %v4976_v49 = vmul.bf16 %v6562_v58, %v4948_v63  ;;  %v5882_v58 = vld [vmem:[%s5630_s25] ss:$0 sm:$0xff] }
0x105a   :  { %5147 = vmatprep.mubr.bf16.mxu0 %v4977_v16 }
0x105b   :  { %5148 = vmatmul.mubr.bf16.vlgmr.msra.gmra.mrb[72].mxu0 %v4976_v49  ;;  %v4951_v18 = vld [vmem:[#allocation3 + $0x20] sm:$0xff] }
0x105c   :  { %v4979_v21 = vmul.bf16 %v6565_v0, %v4951_v18  ;;  %v4950_v50 = vld [vmem:[#allocation3 + $0x18] sm:$0xff] }
0x105d   :  { %v4978_v43 = vmul.bf16 %v6567_v41, %v4950_v50  ;;  %v6591_v50 = vld [vmem:[%s8055_s22 + $0x30] sm:$0xff]  }
0x105e   :  { %5155 = vmatprep.mubr.bf16.mxu0 %v4979_v21 }
0x1063   :  { %5156 = vmatmul.mubr.bf16.gmra.mrb[76].mxu0 %v4978_v43  ;;  %v6592_v43 = vld [vmem:[%s8055_s22 + $0x38] sm:$0xff]  }
0x1064   :  { %6240 = vmatprep.mubr.msk.bf16.mxu0 %vm6626_vm7, %v6625_v29 }
0x112e   :  { %v6104_v9 = vpop.f32.mrb[72].mxu0 }
0x112f   :  { %v6105_v19 = vpop.f32.mrb[73].mxu0 }
0x1130   :  { %v6106_v54 = vadd.f32 %v6105_v19, %v6104_v9  ;;  %v6107_v55 = vpop.f32.mrb[74].mxu0 }
0x1131   :  { %v6108_v6 = vpop.f32.mrb[75].mxu0 }
0x1132   :  { %v5150_v23 = vadd.f32 %v6106_v54, %v5863_v5  ;;  %v6109_v10 = vadd.f32 %v6108_v6, %v6107_v55  ;;  %v5900_v54 = vld [vmem:[%s5634_s6] ss:$0 sm:$0xff] }
0x1134   :  { %v5153_v34 = vadd.f32 %v6109_v10, %v5863_v5  ;;  %v5164_v11 = vmax.f32 %v5150_v23, 0.0  ;;  %v5909_v10 = vld [vmem:[%s5635_s10] ss:$0 sm:$0xff] }
0x1136   :  { %v5165_v15 = vmax.f32 %v5153_v34, 0.0  ;;  %v6110_v17 = vpop.f32.mrb[76].mxu0 }
0x1137   :  { %v6111_v61 = vpop.f32.mrb[77].mxu0 }
0x1138   :  { %v5170_v22 = vpack.c.bf16 %v5165_v15, %v5164_v11  ;;  %v6112_v24 = vadd.f32 %v6111_v61, %v6110_v17  ;;  %v6113_v26 = vpop.f32.mrb[78].mxu0 }
0x1139   :  { %v6114_v52 = vpop.f32.mrb[79].mxu0 }
0x113a   :  { %v5158_v27 = vadd.f32 %v6112_v24, %v5863_v5  ;;  %v6115_v45 = vadd.f32 %v6114_v52, %v6113_v26  ;;  %6237 = vmatpush3.bf16.msra.mxu0 %v5170_v22 }
0x113b   :  { %6238 = vmatprep.subr.bf16.mxu0 %v6625_v29 }
0x113c   :  { %v5161_v28 = vadd.f32 %v6115_v45, %v5863_v5  ;;  %v5166_v7 = vmax.f32 %v5158_v27, 0.0 }
0x113e   :  { %v5167_v8 = vmax.f32 %v5161_v28, 0.0 }
0x1140   :  { %v5171_v31 = vpack.c.bf16 %v5167_v8, %v5166_v7 }
0x1142   :  { %6239 = vmatpush3.bf16.msra.mxu0 %v5171_v31 }
0x1143   :  { %6264 = vmatprep.subr.bf16.mxu0 %v6625_v29 }
0x1145   :  { %6241 = vmatmul.mubr.msk.bf16.vlgmr.msra.gmra.mrb[80].mxu0 %vm2896_vm3, %v6568_v13 }
0x1146   :  { %6280 = vmatprep.mubr.msk.bf16.mxu0 %vm6626_vm7, %v6625_v29  ;;  %6265 = vmatpush3.bf16.msra.mxu0 %v6577_v33 }
0x1147   :  { %6266 = vmatprep.subr.bf16.mxu0 %v6625_v29 }
0x114a   :  { %6267 = vmatpush3.bf16.msra.mxu0 %v6578_v35 }
0x114b   :  { %6268 = vmatprep.subr.bf16.mxu0 %v6625_v29 }
0x114e   :  { %6269 = vmatpush3.bf16.msra.mxu0 %v6579_v36 }
0x114f   :  { %6270 = vmatprep.subr.bf16.mxu0 %v6625_v29 }
0x1152   :  { %6271 = vmatpush3.bf16.msra.mxu0 %v6580_v38 }
0x1153   :  { %6272 = vmatprep.subr.bf16.mxu0 %v6625_v29 }
0x1156   :  { %6273 = vmatpush3.bf16.msra.mxu0 %v6581_v37 }
0x1157   :  { %6274 = vmatprep.subr.bf16.mxu0 %v6625_v29 }
0x115a   :  { %6275 = vmatpush3.bf16.msra.mxu0 %v6582_v39 }
0x115b   :  { %6276 = vmatprep.subr.bf16.mxu0 %v6625_v29 }
0x115e   :  { %6277 = vmatpush3.bf16.msra.mxu0 %v6583_v12 }
0x115f   :  { %6278 = vmatprep.subr.bf16.mxu0 %v6625_v29 }
0x1162   :  { %6279 = vmatpush3.bf16.msra.mxu0 %v6584_v46 }
0x1218   :  { %v5214_v25 = vpop.f32.mrb[80].mxu0 }
0x1219   :  { %v6242_v40 = vpop.f32.mrb[81].mxu0 }
0x121a   :  { %v5217_v42 = vpop.f32.mrb[82].mxu0 }
0x121b   :  { %v5221_v14 = vpack.c.bf16 %v5217_v42, %v5214_v25  ;;  %v6243_v44 = vpop.f32.mrb[83].mxu0 }
0x121d   :  { %6261 = vmatmul.mubr.bf16.vlgmr.msra.gmra.mrb[72].mxu1 %v5221_v14 }
0x121e   :  { %6300 = vmatprep.mubr.msk.bf16.mxu1 %vm6626_vm7, %v6625_v29  ;;  %6285 = vmatpush3.bf16.msra.mxu1 %v6585_v48 }
0x121f   :  { %6286 = vmatprep.subr.bf16.mxu1 %v6625_v29 }
0x1222   :  { %6287 = vmatpush3.bf16.msra.mxu1 %v6586_v56 }
0x1223   :  { %6288 = vmatprep.subr.bf16.mxu1 %v6625_v29 }
0x1226   :  { %6289 = vmatpush3.bf16.msra.mxu1 %v6587_v32 }
0x1227   :  { %6290 = vmatprep.subr.bf16.mxu1 %v6625_v29 }
0x122a   :  { %6291 = vmatpush3.bf16.msra.mxu1 %v6588_v20 }
0x122b   :  { %6292 = vmatprep.subr.bf16.mxu1 %v6625_v29 }
0x122e   :  { %6293 = vmatpush3.bf16.msra.mxu1 %v6589_v47 }
0x122f   :  { %6294 = vmatprep.subr.bf16.mxu1 %v6625_v29 }
0x1232   :  { %6295 = vmatpush3.bf16.msra.mxu1 %v6590_v57 }
0x1233   :  { %6296 = vmatprep.subr.bf16.mxu1 %v6625_v29 }
0x1236   :  { %6297 = vmatpush3.bf16.msra.mxu1 %v6591_v50 }
0x1237   :  { %6298 = vmatprep.subr.bf16.mxu1 %v6625_v29  ;;  %v88_v29 = vstv %s5636_s24 }
0x1238   :  { %89 = vst [vmem:[#allocation4] sm:$0x1] %v88_v29 }
0x123a   :  { %6299 = vmatpush3.bf16.msra.mxu1 %v6592_v43 }
0x123f   :  { %v5910_v26 = vld [vmem:[#allocation4] ss:$0 sm:$0xff] }
0x12f0   :  { %v5327_v59 = vpop.f32.mrb[72].mxu1 }
0x12f1   :  { %v5328_v62 = vadd.f32 %v5882_v58, %v5327_v59  ;;  %v6262_v63 = vpop.f32.mrb[73].mxu1 }
0x12f2   :  { %v5330_v16 = vpop.f32.mrb[74].mxu1 }
0x12f3   :  { %v5331_v49 = vadd.f32 %v5882_v58, %v5330_v16  ;;  %v6263_v0 = vpop.f32.mrb[75].mxu1  ;;  %v5334_v18 = vmax.f32 %v5328_v62, 0.0 }
0x12f5   :  { %v5335_v21 = vmax.f32 %v5331_v49, 0.0 }
0x12f7   :  { %v5336_v41 = vpack.c.bf16 %v5335_v21, %v5334_v18 }
0x12f9   :  { %6281 = vmatmul.mubr.bf16.vlgmr.msra.gmra.mrb[84].mxu0 %v5336_v41 }
0x13cc   :  { %v5442_v2 = vpop.f32.mrb[84].mxu0 }
0x13cd   :  { %v5443_v3 = vadd.f32 %v5891_v1, %v5442_v2  ;;  %v6282_v51 = vpop.f32.mrb[85].mxu0 }
0x13ce   :  { %v5445_v60 = vpop.f32.mrb[86].mxu0 }
0x13cf   :  { %v5446_v53 = vadd.f32 %v5891_v1, %v5445_v60  ;;  %v6283_v4 = vpop.f32.mrb[87].mxu0  ;;  %v5449_v9 = vmax.f32 %v5443_v3, 0.0 }
0x13d1   :  { %v5450_v5 = vmax.f32 %v5446_v53, 0.0 }
0x13d3   :  { %v5451_v19 = vpack.c.bf16 %v5450_v5, %v5449_v9 }
0x13d5   :  { %6301 = vmatmul.mubr.bf16.vlgmr.msra.gmra.mrb[76].mxu1 %v5451_v19 }
0x14a8   :  { %v5557_v55 = vpop.f32.mrb[76].mxu1 }
0x14a9   :  { %v5558_v6 = vadd.f32 %v5900_v54, %v5557_v55  ;;  %v6302_v23 = vpop.f32.mrb[77].mxu1 }
0x14aa   :  { %v5560_v34 = vpop.f32.mrb[78].mxu1 }
0x14ab   :  { %v5564_v11 = vmax.f32 %v5558_v6, 0.0  ;;  %v5561_v15 = vadd.f32 %v5900_v54, %v5560_v34  ;;  %v6303_v17 = vpop.f32.mrb[79].mxu1 }
0x14ad   :  { %v5573_v61 = vmul.f32 %v5909_v10, %v5564_v11  ;;  %v5565_v22 = vmax.f32 %v5561_v15, 0.0 }
0x14af   :  { %v5574_v24 = vmul.f32 %v5909_v10, %v5565_v22  ;;  %5575 = vadd.xlane.f32.xlu0 %v5573_v61 }
0x14b1   :  { %5577 = vadd.xlane.f32.xlu1 %v5574_v24 }
0x153c   :  { %v5576_v52 = vpop.xlane.xlu0 %5575 }
0x153d   :  { %v5586_v27 = vadd.f32 %v5910_v26, %v5576_v52 }
0x153e   :  { %v5578_v45 = vpop.xlane.xlu1 %5577 }
0x153f   :  { %6593 = vtanh.f32 %v5586_v27  ;;  %v5587_v28 = vadd.f32 %v5910_v26, %v5578_v45 }
0x1541   :  { %6595 = vtanh.f32 %v5587_v28 }
0x1549   :  { %v6594_v7 = vpop.eup %6593 }
0x154a   :  { %5591 = vst.msk [vmem:[%s5637_s11] sm:$0xff] %vm5590_vm10, %v6594_v7 }
0x154b   :  { %v6596_v8 = vpop.eup %6595 }
0x154c   :  { %5592 = vst.msk [vmem:[%s5637_s11 + $0x8] sm:$0xff] %vm5590_vm10, %v6596_v8 }

</bundles_post_ra>
